<compile_context>
chip_gen: v6e
topology: v6e:2x2x1
jax: 0.10.0
libtpu: 0.0.40
codegen_flags: <defaults>
</compile_context>

<pallas_src>
import functools

import jax
import jax.numpy as jnp
from jax import lax
from jax.experimental import pallas as pl
from jax.experimental.pallas import tpu as pltpu


NEG_INF = -1e30          # large finite negative (no NaN on fully-masked rows)
LN_EPS = 1e-5            # torch.nn.LayerNorm default eps


def _layer_norm(y, g, b):
    mu = jnp.mean(y, axis=-1, keepdims=True)
    var = jnp.mean(jnp.square(y - mu), axis=-1, keepdims=True)
    return (y - mu) * lax.rsqrt(var + LN_EPS) * g + b


# ----------------------------------------------------------------------------
# Single fused kernel: self-MHA -> cross-MHA -> FeedForward (one batch element)
# ----------------------------------------------------------------------------
def _decoder_layer_kernel(dec_ref, enc_ref, omask_ref, imask_ref,
                          # self-attention (MHA1) params
                          wq1_ref, bq1_ref, wkv1_ref, bkv1_ref,
                          wo1_ref, bo1_ref, g1_ref, be1_ref,
                          # cross-attention (MHA2) params
                          wq2_ref, bq2_ref, wkv2_ref, bkv2_ref,
                          wo2_ref, bo2_ref, g2_ref, be2_ref,
                          # feed-forward params
                          w1_ref, bf1_ref, w2_ref, bf2_ref, gf_ref, bef_ref,
                          o_ref, *, head, d_head):
    hd = head * d_head

    def mha(xq, xkv, mask, wq_ref, bq_ref, wkv_ref, bkv_ref,
            wo_ref, bo_ref, g_ref, b_ref):
        # Projections: bf16 operands, f32 MXU accumulation.  The softmax scale
        # is pre-folded into wq / bq, so no per-step score multiply is needed.
        q = jnp.dot(xq.astype(jnp.bfloat16), wq_ref[...],
                    preferred_element_type=jnp.float32) + bq_ref[...]    # (Lq, H*D)
        kv = jnp.dot(xkv.astype(jnp.bfloat16), wkv_ref[...],
                     preferred_element_type=jnp.float32) + bkv_ref[...]  # (Lk, 2*H*D)

        # Head-batched attention: arrange q/k/v once as (H, L, D) (static lane
        # slices, batch dim leading), then two batched dot_generals instead of
        # 2*H tiny per-head matmuls.
        q3 = jnp.stack([q[:, h * d_head:(h + 1) * d_head]
                        for h in range(head)], axis=0)                   # (H, Lq, D)
        k3 = jnp.stack([kv[:, h * d_head:(h + 1) * d_head]
                        for h in range(head)], axis=0)                   # (H, Lk, D)
        v3 = jnp.stack([kv[:, hd + h * d_head: hd + (h + 1) * d_head]
                        for h in range(head)], axis=0)                   # (H, Lk, D)

        s = jnp.einsum('hqd,hkd->hqk', q3, k3,
                       preferred_element_type=jnp.float32)               # (H, Lq, Lk)
        # Mask applied in-kernel (free VPU filler); finite NEG_INF avoids the
        # -inf -> NaN hazard on fully-masked rows (uniform attention instead).
        s = jnp.where(mask[None, :, :] != 0.0, s, NEG_INF)
        s = s - jnp.max(s, axis=-1, keepdims=True)
        p = jnp.exp(s)
        # approx reciprocal: ~2^-12 rel. error, EUP slot => effectively free.
        p = p * pl.reciprocal(jnp.sum(p, axis=-1, keepdims=True), approx=True)
        att3 = jnp.einsum('hqk,hkd->hqd', p, v3,
                          preferred_element_type=jnp.float32)            # (H, Lq, D)

        # Back to (Lq, H*D), head-major lanes; PyTorch's '(d n)' interleave is
        # absorbed by the pre-permuted Wo rows.
        att = jnp.concatenate([att3[h] for h in range(head)], axis=-1)

        y = jnp.dot(att.astype(jnp.bfloat16), wo_ref[...],
                    preferred_element_type=jnp.float32) + bo_ref[...]
        y = y + xq                                                       # residual
        return _layer_norm(y, g_ref[...], b_ref[...])

    x = dec_ref[...]                                                     # (Ld, dim) f32

    # 1) masked self-attention + residual + LN
    x = mha(x, x, omask_ref[...],
            wq1_ref, bq1_ref, wkv1_ref, bkv1_ref, wo1_ref, bo1_ref, g1_ref, be1_ref)

    # 2) cross-attention over encoder output + residual + LN
    x = mha(x, enc_ref[...], imask_ref[...],
            wq2_ref, bq2_ref, wkv2_ref, bkv2_ref, wo2_ref, bo2_ref, g2_ref, be2_ref)

    # 3) feed-forward + residual + LN
    # TODO(synk): tile over `hide` with an f32 accumulator once rows-per-block
    #             grows beyond ~64 (keeps the (rows, hide) activation tiny).
    h1 = jnp.dot(x.astype(jnp.bfloat16), w1_ref[...],
                 preferred_element_type=jnp.float32) + bf1_ref[...]
    h1 = jnp.maximum(h1, 0.0)
    y = jnp.dot(h1.astype(jnp.bfloat16), w2_ref[...],
                preferred_element_type=jnp.float32) + bf2_ref[...]
    y = y + x
    o_ref[...] = _layer_norm(y, gf_ref[...], bef_ref[...])


# ----------------------------------------------------------------------------
# DecoderLayer forward: one pallas_call for the whole layer
# ----------------------------------------------------------------------------
def decoder_layer(params, encode, decode, input_mask, output_mask,
                  *, head, atten_dim):
    """params: output of prepare_params().  encode:(B,Le,dim)  decode:(B,Ld,dim).
    masks: nonzero = attend, zero = masked."""
    B, Ld, dim = decode.shape
    Le = encode.shape[1]
    hd = head * atten_dim
    p1, p2, pf = params["mha1"], params["mha2"], params["ff"]
    hide = pf["w1"].shape[1]

    dec2 = decode.reshape(B * Ld, dim)
    enc2 = encode.reshape(B * Le, dim)
    omask2 = output_mask.astype(jnp.float32).reshape(B * Ld, Ld)
    imask2 = input_mask.astype(jnp.float32).reshape(B * Ld, Le)

    kernel = functools.partial(_decoder_layer_kernel, head=head, d_head=atten_dim)
    row = lambda b: (b, 0)      # per-batch-element activation/mask blocks
    const = lambda b: (0, 0)    # weights: resident, DMA'd once

    in_specs = [
        pl.BlockSpec((Ld, dim), row),          # decode (residual for MHA1)
        pl.BlockSpec((Le, dim), row),          # encode
        pl.BlockSpec((Ld, Ld), row),           # self-attention mask (0/1)
        pl.BlockSpec((Ld, Le), row),           # cross-attention mask (0/1)
        # MHA1 (scale folded into wq/bq; wkv = [Wk|Wv]; wo rows pre-permuted)
        pl.BlockSpec((dim, hd), const), pl.BlockSpec((1, hd), const),
        pl.BlockSpec((dim, 2 * hd), const), pl.BlockSpec((1, 2 * hd), const),
        pl.BlockSpec((hd, dim), const), pl.BlockSpec((1, dim), const),
        pl.BlockSpec((1, dim), const), pl.BlockSpec((1, dim), const),
        # MHA2
        pl.BlockSpec((dim, hd), const), pl.BlockSpec((1, hd), const),
        pl.BlockSpec((dim, 2 * hd), const), pl.BlockSpec((1, 2 * hd), const),
        pl.BlockSpec((hd, dim), const), pl.BlockSpec((1, dim), const),
        pl.BlockSpec((1, dim), const), pl.BlockSpec((1, dim), const),
        # FeedForward
        pl.BlockSpec((dim, hide), const), pl.BlockSpec((1, hide), const),
        pl.BlockSpec((hide, dim), const), pl.BlockSpec((1, dim), const),
        pl.BlockSpec((1, dim), const), pl.BlockSpec((1, dim), const),
    ]

    out = pl.pallas_call(
        kernel,
        out_shape=jax.ShapeDtypeStruct((B * Ld, dim), jnp.float32),
        grid=(B,),
        in_specs=in_specs,
        out_specs=pl.BlockSpec((Ld, dim), row),
        compiler_params=pltpu.CompilerParams(
            dimension_semantics=("parallel",),
            vmem_limit_bytes=32 * 1024 * 1024),
    )(dec2, enc2, omask2, imask2,
      p1["wq"], p1["bq"], p1["wkv"], p1["bkv"], p1["wo"], p1["bo"],
      p1["ln_g"], p1["ln_b"],
      p2["wq"], p2["bq"], p2["wkv"], p2["bkv"], p2["wo"], p2["bo"],
      p2["ln_g"], p2["ln_b"],
      pf["w1"], pf["b1"], pf["w2"], pf["b2"], pf["ln_g"], pf["ln_b"])
    return out.reshape(B, Ld, dim)


# ----------------------------------------------------------------------------
# Parameters: deterministic init (PyTorch-style layout) + kernel-ready prep
# ----------------------------------------------------------------------------
def init_params(key, dim, atten_dim, head, hide_dim):
    hd = head * atten_dim

    def mha_params(k):
        ks = jax.random.split(k, 8)
        return {
            "wq": jax.random.normal(ks[0], (dim, hd), jnp.float32) * 0.05,
            "bq": jax.random.normal(ks[1], (hd,), jnp.float32) * 0.05,
            "wk": jax.random.normal(ks[2], (dim, hd), jnp.float32) * 0.05,
            "bk": jax.random.normal(ks[3], (hd,), jnp.float32) * 0.05,
            "wv": jax.random.normal(ks[4], (dim, hd), jnp.float32) * 0.05,
            "bv": jax.random.normal(ks[5], (hd,), jnp.float32) * 0.05,
            "wo": jax.random.normal(ks[6], (hd, dim), jnp.float32) * 0.05,
            "bo": jax.random.normal(ks[7], (dim,), jnp.float32) * 0.05,
            "ln_g": jnp.ones((dim,), jnp.float32),
            "ln_b": jnp.zeros((dim,), jnp.float32),
        }

    k1, k2, k3 = jax.random.split(key, 3)
    ks = jax.random.split(k3, 4)
    ff = {
        "w1": jax.random.normal(ks[0], (dim, hide_dim), jnp.float32) * 0.05,
        "b1": jax.random.normal(ks[1], (hide_dim,), jnp.float32) * 0.05,
        "w2": jax.random.normal(ks[2], (hide_dim, dim), jnp.float32) * 0.05,
        "b2": jax.random.normal(ks[3], (dim,), jnp.float32) * 0.05,
        "ln_g": jnp.ones((dim,), jnp.float32),
        "ln_b": jnp.zeros((dim,), jnp.float32),
    }
    return {"mha1": mha_params(k1), "mha2": mha_params(k2), "ff": ff}


def _prep_mha(p, head, d_head, dim):
    hd = head * d_head
    scale = float(d_head) ** -0.5       # fold softmax scale into Wq / bq (exact)
    # Kernel concatenates head outputs head-major '(n d)'; the PyTorch reference
    # feeds the output projection in '(d n)' order.  Absorb the interleave by
    # permuting Wo rows once: row (n*D + d) must hold original row (d*H + n).
    d_idx = jnp.arange(d_head)[None, :]
    n_idx = jnp.arange(head)[:, None]
    perm = (d_idx * head + n_idx).reshape(-1)           # perm[n*D+d] = d*H+n
    return {
        "wq": (p["wq"] * scale).astype(jnp.bfloat16),
        "bq": (p["bq"] * scale).reshape(1, hd).astype(jnp.float32),
        "wkv": jnp.concatenate([p["wk"], p["wv"]], axis=1).astype(jnp.bfloat16),
        "bkv": jnp.concatenate([p["bk"], p["bv"]]).reshape(1, 2 * hd),
        "wo": p["wo"][perm, :].astype(jnp.bfloat16),
        "bo": p["bo"].reshape(1, dim),
        "ln_g": p["ln_g"].reshape(1, dim),
        "ln_b": p["ln_b"].reshape(1, dim),
    }


def _prep_ff(p, dim, hide_dim):
    return {
        "w1": p["w1"].astype(jnp.bfloat16),
        "b1": p["b1"].reshape(1, hide_dim),
        "w2": p["w2"].astype(jnp.bfloat16),
        "b2": p["b2"].reshape(1, dim),
        "ln_g": p["ln_g"].reshape(1, dim),
        "ln_b": p["ln_b"].reshape(1, dim),
    }


def prepare_params(params, *, dim, head, atten_dim, hide_dim):
    return {
        "mha1": _prep_mha(params["mha1"], head, atten_dim, dim),
        "mha2": _prep_mha(params["mha2"], head, atten_dim, dim),
        "ff": _prep_ff(params["ff"], dim, hide_dim),
    }


# ----------------------------------------------------------------------------
if __name__ == "__main__":
    B = 2          # batch
    L_dec = 8      # decoder sequence length
    L_enc = 8      # encoder sequence length
    DIM = 32       # model dim
    ATTEN_DIM = 8  # per-head attention dim
    HEAD = 8       # heads (PyTorch default)
    HIDE = 2048    # FeedForward hidden dim (PyTorch default)

    key = jax.random.PRNGKey(0)
    kp, ke, kd = jax.random.split(key, 3)

    raw = init_params(kp, DIM, ATTEN_DIM, HEAD, HIDE)
    params = prepare_params(raw, dim=DIM, head=HEAD,
                            atten_dim=ATTEN_DIM, hide_dim=HIDE)

    encode = jax.random.normal(ke, (B, L_enc, DIM), jnp.float32)
    decode = jax.random.normal(kd, (B, L_dec, DIM), jnp.float32)

    # masks: 1.0 = attend, 0.0 = masked (PyTorch: masked_fill(mask==False, -inf))
    input_mask = jnp.ones((B, L_dec, L_enc), jnp.float32)
    causal = jnp.tril(jnp.ones((L_dec, L_dec), jnp.float32))
    output_mask = jnp.broadcast_to(causal, (B, L_dec, L_dec))

    # TODO(synk): nn.Dropout is eval-mode identity here (no stochastic dropout).
    fwd = jax.jit(functools.partial(decoder_layer, head=HEAD, atten_dim=ATTEN_DIM))
    out = jax.block_until_ready(fwd(params, encode, decode, input_mask, output_mask))

    assert out.shape == (B, L_dec, DIM)
    assert bool(jnp.all(jnp.isfinite(out)))
    print("KERNEL_OK")
</pallas_src>

<mosaic_0001>
module attributes {stable_mosaic.version = 11 : i64} {
  func.func @_decoder_layer_kernel(%arg0: i32, %arg1: memref<8x32xf32, #tpu.memory_space<vmem>>, %arg2: memref<8x32xf32, #tpu.memory_space<vmem>>, %arg3: memref<8x8xf32, #tpu.memory_space<vmem>>, %arg4: memref<8x8xf32, #tpu.memory_space<vmem>>, %arg5: memref<32x64xbf16, #tpu.memory_space<vmem>>, %arg6: memref<1x64xf32, #tpu.memory_space<vmem>>, %arg7: memref<32x128xbf16, #tpu.memory_space<vmem>>, %arg8: memref<1x128xf32, #tpu.memory_space<vmem>>, %arg9: memref<64x32xbf16, #tpu.memory_space<vmem>>, %arg10: memref<1x32xf32, #tpu.memory_space<vmem>>, %arg11: memref<1x32xf32, #tpu.memory_space<vmem>>, %arg12: memref<1x32xf32, #tpu.memory_space<vmem>>, %arg13: memref<32x64xbf16, #tpu.memory_space<vmem>>, %arg14: memref<1x64xf32, #tpu.memory_space<vmem>>, %arg15: memref<32x128xbf16, #tpu.memory_space<vmem>>, %arg16: memref<1x128xf32, #tpu.memory_space<vmem>>, %arg17: memref<64x32xbf16, #tpu.memory_space<vmem>>, %arg18: memref<1x32xf32, #tpu.memory_space<vmem>>, %arg19: memref<1x32xf32, #tpu.memory_space<vmem>>, %arg20: memref<1x32xf32, #tpu.memory_space<vmem>>, %arg21: memref<32x2048xbf16, #tpu.memory_space<vmem>>, %arg22: memref<1x2048xf32, #tpu.memory_space<vmem>>, %arg23: memref<2048x32xbf16, #tpu.memory_space<vmem>>, %arg24: memref<1x32xf32, #tpu.memory_space<vmem>>, %arg25: memref<1x32xf32, #tpu.memory_space<vmem>>, %arg26: memref<1x32xf32, #tpu.memory_space<vmem>>, %arg27: memref<8x32xf32, #tpu.memory_space<vmem>>) attributes {dimension_semantics = [#tpu.dimension_semantics<parallel>], iteration_bounds = array<i64: 2>, scalar_prefetch = 0 : i64, scratch_operands = 0 : i64, tpu.core_type = #tpu.core_type<tc>, window_params = [{transform_indices = @transform_0, window_bounds = array<i64: 8, 32>}, {transform_indices = @transform_1, window_bounds = array<i64: 8, 32>}, {transform_indices = @transform_2, window_bounds = array<i64: 8, 8>}, {transform_indices = @transform_3, window_bounds = array<i64: 8, 8>}, {pipeline_mode = #tpu.pipeline_mode<synchronous>, transform_indices = @transform_4, window_bounds = array<i64: 32, 64>}, {pipeline_mode = #tpu.pipeline_mode<synchronous>, transform_indices = @transform_5, window_bounds = array<i64: 1, 64>}, {pipeline_mode = #tpu.pipeline_mode<synchronous>, transform_indices = @transform_6, window_bounds = array<i64: 32, 128>}, {pipeline_mode = #tpu.pipeline_mode<synchronous>, transform_indices = @transform_7, window_bounds = array<i64: 1, 128>}, {pipeline_mode = #tpu.pipeline_mode<synchronous>, transform_indices = @transform_8, window_bounds = array<i64: 64, 32>}, {pipeline_mode = #tpu.pipeline_mode<synchronous>, transform_indices = @transform_9, window_bounds = array<i64: 1, 32>}, {pipeline_mode = #tpu.pipeline_mode<synchronous>, transform_indices = @transform_10, window_bounds = array<i64: 1, 32>}, {pipeline_mode = #tpu.pipeline_mode<synchronous>, transform_indices = @transform_11, window_bounds = array<i64: 1, 32>}, {pipeline_mode = #tpu.pipeline_mode<synchronous>, transform_indices = @transform_12, window_bounds = array<i64: 32, 64>}, {pipeline_mode = #tpu.pipeline_mode<synchronous>, transform_indices = @transform_13, window_bounds = array<i64: 1, 64>}, {pipeline_mode = #tpu.pipeline_mode<synchronous>, transform_indices = @transform_14, window_bounds = array<i64: 32, 128>}, {pipeline_mode = #tpu.pipeline_mode<synchronous>, transform_indices = @transform_15, window_bounds = array<i64: 1, 128>}, {pipeline_mode = #tpu.pipeline_mode<synchronous>, transform_indices = @transform_16, window_bounds = array<i64: 64, 32>}, {pipeline_mode = #tpu.pipeline_mode<synchronous>, transform_indices = @transform_17, window_bounds = array<i64: 1, 32>}, {pipeline_mode = #tpu.pipeline_mode<synchronous>, transform_indices = @transform_18, window_bounds = array<i64: 1, 32>}, {pipeline_mode = #tpu.pipeline_mode<synchronous>, transform_indices = @transform_19, window_bounds = array<i64: 1, 32>}, {pipeline_mode = #tpu.pipeline_mode<synchronous>, transform_indices = @transform_20, window_bounds = array<i64: 32, 2048>}, {pipeline_mode = #tpu.pipeline_mode<synchronous>, transform_indices = @transform_21, window_bounds = array<i64: 1, 2048>}, {pipeline_mode = #tpu.pipeline_mode<synchronous>, transform_indices = @transform_22, window_bounds = array<i64: 2048, 32>}, {pipeline_mode = #tpu.pipeline_mode<synchronous>, transform_indices = @transform_23, window_bounds = array<i64: 1, 32>}, {pipeline_mode = #tpu.pipeline_mode<synchronous>, transform_indices = @transform_24, window_bounds = array<i64: 1, 32>}, {pipeline_mode = #tpu.pipeline_mode<synchronous>, transform_indices = @transform_25, window_bounds = array<i64: 1, 32>}, {transform_indices = @transform_26, window_bounds = array<i64: 8, 32>}]} {
    %c0 = arith.constant 0 : index
    %c0_0 = arith.constant 0 : index
    %0 = vector.load %arg1[%c0, %c0_0] : memref<8x32xf32, #tpu.memory_space<vmem>>, vector<8x32xf32>
    %c0_1 = arith.constant 0 : index
    %c0_2 = arith.constant 0 : index
    %1 = vector.load %arg3[%c0_1, %c0_2] : memref<8x8xf32, #tpu.memory_space<vmem>>, vector<8x8xf32>
    %2 = arith.truncf %0 : vector<8x32xf32> to vector<8x32xbf16>
    %c0_3 = arith.constant 0 : index
    %c0_4 = arith.constant 0 : index
    %3 = vector.load %arg5[%c0_3, %c0_4] : memref<32x64xbf16, #tpu.memory_space<vmem>>, vector<32x64xbf16>
    %cst = arith.constant dense<0.000000e+00> : vector<8x64xf32>
    %4 = tpu.matmul %2, %3, %cst {dimension_numbers = #tpu.dot_dimension_numbers<[1], [0], [0], [1], [0, 0, 1, 1], [], []>} : vector<8x32xbf16>, vector<32x64xbf16>, vector<8x64xf32> -> vector<8x64xf32>
    %c0_5 = arith.constant 0 : index
    %c0_6 = arith.constant 0 : index
    %5 = vector.load %arg6[%c0_5, %c0_6] : memref<1x64xf32, #tpu.memory_space<vmem>>, vector<1x64xf32>
    %6 = vector.broadcast %5 : vector<1x64xf32> to vector<8x64xf32>
    %7 = arith.addf %4, %6 : vector<8x64xf32>
    %8 = arith.truncf %0 : vector<8x32xf32> to vector<8x32xbf16>
    %c0_7 = arith.constant 0 : index
    %c0_8 = arith.constant 0 : index
    %9 = vector.load %arg7[%c0_7, %c0_8] : memref<32x128xbf16, #tpu.memory_space<vmem>>, vector<32x128xbf16>
    %cst_9 = arith.constant dense<0.000000e+00> : vector<8x128xf32>
    %10 = tpu.matmul %8, %9, %cst_9 {dimension_numbers = #tpu.dot_dimension_numbers<[1], [0], [0], [1], [0, 0, 1, 1], [], []>} : vector<8x32xbf16>, vector<32x128xbf16>, vector<8x128xf32> -> vector<8x128xf32>
    %c0_10 = arith.constant 0 : index
    %c0_11 = arith.constant 0 : index
    %11 = vector.load %arg8[%c0_10, %c0_11] : memref<1x128xf32, #tpu.memory_space<vmem>>, vector<1x128xf32>
    %12 = vector.broadcast %11 : vector<1x128xf32> to vector<8x128xf32>
    %13 = arith.addf %10, %12 : vector<8x128xf32>
    %14 = vector.extract_strided_slice %7 {offsets = [0, 0], sizes = [8, 8], strides = [1, 1]} : vector<8x64xf32> to vector<8x8xf32>
    %15 = vector.extract_strided_slice %7 {offsets = [0, 8], sizes = [8, 8], strides = [1, 1]} : vector<8x64xf32> to vector<8x8xf32>
    %16 = vector.extract_strided_slice %7 {offsets = [0, 16], sizes = [8, 8], strides = [1, 1]} : vector<8x64xf32> to vector<8x8xf32>
    %17 = vector.extract_strided_slice %7 {offsets = [0, 24], sizes = [8, 8], strides = [1, 1]} : vector<8x64xf32> to vector<8x8xf32>
    %18 = vector.extract_strided_slice %7 {offsets = [0, 32], sizes = [8, 8], strides = [1, 1]} : vector<8x64xf32> to vector<8x8xf32>
    %19 = vector.extract_strided_slice %7 {offsets = [0, 40], sizes = [8, 8], strides = [1, 1]} : vector<8x64xf32> to vector<8x8xf32>
    %20 = vector.extract_strided_slice %7 {offsets = [0, 48], sizes = [8, 8], strides = [1, 1]} : vector<8x64xf32> to vector<8x8xf32>
    %21 = vector.extract_strided_slice %7 {offsets = [0, 56], sizes = [8, 8], strides = [1, 1]} : vector<8x64xf32> to vector<8x8xf32>
    %22 = vector.shape_cast %14 : vector<8x8xf32> to vector<1x8x8xf32>
    %23 = vector.shape_cast %15 : vector<8x8xf32> to vector<1x8x8xf32>
    %24 = vector.shape_cast %16 : vector<8x8xf32> to vector<1x8x8xf32>
    %25 = vector.shape_cast %17 : vector<8x8xf32> to vector<1x8x8xf32>
    %26 = vector.shape_cast %18 : vector<8x8xf32> to vector<1x8x8xf32>
    %27 = vector.shape_cast %19 : vector<8x8xf32> to vector<1x8x8xf32>
    %28 = vector.shape_cast %20 : vector<8x8xf32> to vector<1x8x8xf32>
    %29 = vector.shape_cast %21 : vector<8x8xf32> to vector<1x8x8xf32>
    %30 = tpu.concatenate %22, %23, %24, %25, %26, %27, %28, %29 in 0 : vector<1x8x8xf32>, vector<1x8x8xf32>, vector<1x8x8xf32>, vector<1x8x8xf32>, vector<1x8x8xf32>, vector<1x8x8xf32>, vector<1x8x8xf32>, vector<1x8x8xf32> -> vector<8x8x8xf32>
    %31 = vector.extract_strided_slice %13 {offsets = [0, 0], sizes = [8, 8], strides = [1, 1]} : vector<8x128xf32> to vector<8x8xf32>
    %32 = vector.extract_strided_slice %13 {offsets = [0, 8], sizes = [8, 8], strides = [1, 1]} : vector<8x128xf32> to vector<8x8xf32>
    %33 = vector.extract_strided_slice %13 {offsets = [0, 16], sizes = [8, 8], strides = [1, 1]} : vector<8x128xf32> to vector<8x8xf32>
    %34 = vector.extract_strided_slice %13 {offsets = [0, 24], sizes = [8, 8], strides = [1, 1]} : vector<8x128xf32> to vector<8x8xf32>
    %35 = vector.extract_strided_slice %13 {offsets = [0, 32], sizes = [8, 8], strides = [1, 1]} : vector<8x128xf32> to vector<8x8xf32>
    %36 = vector.extract_strided_slice %13 {offsets = [0, 40], sizes = [8, 8], strides = [1, 1]} : vector<8x128xf32> to vector<8x8xf32>
    %37 = vector.extract_strided_slice %13 {offsets = [0, 48], sizes = [8, 8], strides = [1, 1]} : vector<8x128xf32> to vector<8x8xf32>
    %38 = vector.extract_strided_slice %13 {offsets = [0, 56], sizes = [8, 8], strides = [1, 1]} : vector<8x128xf32> to vector<8x8xf32>
    %39 = vector.shape_cast %31 : vector<8x8xf32> to vector<1x8x8xf32>
    %40 = vector.shape_cast %32 : vector<8x8xf32> to vector<1x8x8xf32>
    %41 = vector.shape_cast %33 : vector<8x8xf32> to vector<1x8x8xf32>
    %42 = vector.shape_cast %34 : vector<8x8xf32> to vector<1x8x8xf32>
    %43 = vector.shape_cast %35 : vector<8x8xf32> to vector<1x8x8xf32>
    %44 = vector.shape_cast %36 : vector<8x8xf32> to vector<1x8x8xf32>
    %45 = vector.shape_cast %37 : vector<8x8xf32> to vector<1x8x8xf32>
    %46 = vector.shape_cast %38 : vector<8x8xf32> to vector<1x8x8xf32>
    %47 = tpu.concatenate %39, %40, %41, %42, %43, %44, %45, %46 in 0 : vector<1x8x8xf32>, vector<1x8x8xf32>, vector<1x8x8xf32>, vector<1x8x8xf32>, vector<1x8x8xf32>, vector<1x8x8xf32>, vector<1x8x8xf32>, vector<1x8x8xf32> -> vector<8x8x8xf32>
    %48 = vector.extract_strided_slice %13 {offsets = [0, 64], sizes = [8, 8], strides = [1, 1]} : vector<8x128xf32> to vector<8x8xf32>
    %49 = vector.extract_strided_slice %13 {offsets = [0, 72], sizes = [8, 8], strides = [1, 1]} : vector<8x128xf32> to vector<8x8xf32>
    %50 = vector.extract_strided_slice %13 {offsets = [0, 80], sizes = [8, 8], strides = [1, 1]} : vector<8x128xf32> to vector<8x8xf32>
    %51 = vector.extract_strided_slice %13 {offsets = [0, 88], sizes = [8, 8], strides = [1, 1]} : vector<8x128xf32> to vector<8x8xf32>
    %52 = vector.extract_strided_slice %13 {offsets = [0, 96], sizes = [8, 8], strides = [1, 1]} : vector<8x128xf32> to vector<8x8xf32>
    %53 = vector.extract_strided_slice %13 {offsets = [0, 104], sizes = [8, 8], strides = [1, 1]} : vector<8x128xf32> to vector<8x8xf32>
    %54 = vector.extract_strided_slice %13 {offsets = [0, 112], sizes = [8, 8], strides = [1, 1]} : vector<8x128xf32> to vector<8x8xf32>
    %55 = vector.extract_strided_slice %13 {offsets = [0, 120], sizes = [8, 8], strides = [1, 1]} : vector<8x128xf32> to vector<8x8xf32>
    %56 = vector.shape_cast %48 : vector<8x8xf32> to vector<1x8x8xf32>
    %57 = vector.shape_cast %49 : vector<8x8xf32> to vector<1x8x8xf32>
    %58 = vector.shape_cast %50 : vector<8x8xf32> to vector<1x8x8xf32>
    %59 = vector.shape_cast %51 : vector<8x8xf32> to vector<1x8x8xf32>
    %60 = vector.shape_cast %52 : vector<8x8xf32> to vector<1x8x8xf32>
    %61 = vector.shape_cast %53 : vector<8x8xf32> to vector<1x8x8xf32>
    %62 = vector.shape_cast %54 : vector<8x8xf32> to vector<1x8x8xf32>
    %63 = vector.shape_cast %55 : vector<8x8xf32> to vector<1x8x8xf32>
    %64 = tpu.concatenate %56, %57, %58, %59, %60, %61, %62, %63 in 0 : vector<1x8x8xf32>, vector<1x8x8xf32>, vector<1x8x8xf32>, vector<1x8x8xf32>, vector<1x8x8xf32>, vector<1x8x8xf32>, vector<1x8x8xf32>, vector<1x8x8xf32> -> vector<8x8x8xf32>
    "tpu.trace_start"() <{level = 10 : i32, message = "hqd,hkd->hqk"}> : () -> ()
    %cst_12 = arith.constant dense<0.000000e+00> : vector<8x8x8xf32>
    %65 = tpu.matmul %30, %47, %cst_12 {dimension_numbers = #tpu.dot_dimension_numbers<[2], [2], [1], [1], [0, 0, 0, 1, 1, 1], [0], [0]>} : vector<8x8x8xf32>, vector<8x8x8xf32>, vector<8x8x8xf32> -> vector<8x8x8xf32>
    "tpu.trace_stop"() : () -> ()
    %66 = vector.shape_cast %1 : vector<8x8xf32> to vector<1x8x8xf32>
    %cst_13 = arith.constant 0.000000e+00 : f32
    %67 = vector.broadcast %cst_13 : f32 to vector<1x8x8xf32>
    %68 = arith.cmpf one, %66, %67 : vector<1x8x8xf32>
    %cst_14 = arith.constant -1.000000e+30 : f32
    %69 = vector.shape_cast %68 : vector<1x8x8xi1> to vector<1x8x8xi1>
    %70 = vector.broadcast %69 : vector<1x8x8xi1> to vector<8x8x8xi1>
    %71 = vector.broadcast %cst_14 : f32 to vector<8x8x8xf32>
    %72 = arith.select %70, %65, %71 : vector<8x8x8xi1>, vector<8x8x8xf32>
    %cst_15 = arith.constant dense<0xFF800000> : vector<8x8xf32>
    %73 = vector.multi_reduction <maximumf>, %72, %cst_15 [2] : vector<8x8x8xf32> to vector<8x8xf32>
    %74 = vector.shape_cast %73 : vector<8x8xf32> to vector<8x8x1xf32>
    %75 = vector.broadcast %74 : vector<8x8x1xf32> to vector<8x8x8xf32>
    %76 = arith.subf %72, %75 : vector<8x8x8xf32>
    %77 = math.exp %76 : vector<8x8x8xf32>
    %cst_16 = arith.constant dense<0.000000e+00> : vector<8x8xf32>
    %78 = vector.multi_reduction <add>, %77, %cst_16 [2] : vector<8x8x8xf32> to vector<8x8xf32>
    %79 = vector.shape_cast %78 : vector<8x8xf32> to vector<8x8x1xf32>
    %80 = tpu.reciprocal %79 {approx = true} : vector<8x8x1xf32> -> vector<8x8x1xf32>
    %81 = vector.broadcast %80 : vector<8x8x1xf32> to vector<8x8x8xf32>
    %82 = arith.mulf %77, %81 : vector<8x8x8xf32>
    "tpu.trace_start"() <{level = 10 : i32, message = "hqk,hkd->hqd"}> : () -> ()
    %cst_17 = arith.constant dense<0.000000e+00> : vector<8x8x8xf32>
    %83 = tpu.matmul %82, %64, %cst_17 {dimension_numbers = #tpu.dot_dimension_numbers<[2], [1], [1], [2], [0, 0, 0, 1, 1, 2], [0], [0]>} : vector<8x8x8xf32>, vector<8x8x8xf32>, vector<8x8x8xf32> -> vector<8x8x8xf32>
    "tpu.trace_stop"() : () -> ()
    %84 = vector.extract_strided_slice %83 {offsets = [0, 0, 0], sizes = [1, 8, 8], strides = [1, 1, 1]} : vector<8x8x8xf32> to vector<1x8x8xf32>
    %85 = vector.shape_cast %84 : vector<1x8x8xf32> to vector<8x8xf32>
    %86 = vector.extract_strided_slice %83 {offsets = [1, 0, 0], sizes = [1, 8, 8], strides = [1, 1, 1]} : vector<8x8x8xf32> to vector<1x8x8xf32>
    %87 = vector.shape_cast %86 : vector<1x8x8xf32> to vector<8x8xf32>
    %88 = vector.extract_strided_slice %83 {offsets = [2, 0, 0], sizes = [1, 8, 8], strides = [1, 1, 1]} : vector<8x8x8xf32> to vector<1x8x8xf32>
    %89 = vector.shape_cast %88 : vector<1x8x8xf32> to vector<8x8xf32>
    %90 = vector.extract_strided_slice %83 {offsets = [3, 0, 0], sizes = [1, 8, 8], strides = [1, 1, 1]} : vector<8x8x8xf32> to vector<1x8x8xf32>
    %91 = vector.shape_cast %90 : vector<1x8x8xf32> to vector<8x8xf32>
    %92 = vector.extract_strided_slice %83 {offsets = [4, 0, 0], sizes = [1, 8, 8], strides = [1, 1, 1]} : vector<8x8x8xf32> to vector<1x8x8xf32>
    %93 = vector.shape_cast %92 : vector<1x8x8xf32> to vector<8x8xf32>
    %94 = vector.extract_strided_slice %83 {offsets = [5, 0, 0], sizes = [1, 8, 8], strides = [1, 1, 1]} : vector<8x8x8xf32> to vector<1x8x8xf32>
    %95 = vector.shape_cast %94 : vector<1x8x8xf32> to vector<8x8xf32>
    %96 = vector.extract_strided_slice %83 {offsets = [6, 0, 0], sizes = [1, 8, 8], strides = [1, 1, 1]} : vector<8x8x8xf32> to vector<1x8x8xf32>
    %97 = vector.shape_cast %96 : vector<1x8x8xf32> to vector<8x8xf32>
    %98 = vector.extract_strided_slice %83 {offsets = [7, 0, 0], sizes = [1, 8, 8], strides = [1, 1, 1]} : vector<8x8x8xf32> to vector<1x8x8xf32>
    %99 = vector.shape_cast %98 : vector<1x8x8xf32> to vector<8x8xf32>
    %100 = tpu.concatenate %85, %87, %89, %91, %93, %95, %97, %99 in 1 : vector<8x8xf32>, vector<8x8xf32>, vector<8x8xf32>, vector<8x8xf32>, vector<8x8xf32>, vector<8x8xf32>, vector<8x8xf32>, vector<8x8xf32> -> vector<8x64xf32>
    %101 = arith.truncf %100 : vector<8x64xf32> to vector<8x64xbf16>
    %c0_18 = arith.constant 0 : index
    %c0_19 = arith.constant 0 : index
    %102 = vector.load %arg9[%c0_18, %c0_19] : memref<64x32xbf16, #tpu.memory_space<vmem>>, vector<64x32xbf16>
    %cst_20 = arith.constant dense<0.000000e+00> : vector<8x32xf32>
    %103 = tpu.matmul %101, %102, %cst_20 {dimension_numbers = #tpu.dot_dimension_numbers<[1], [0], [0], [1], [0, 0, 1, 1], [], []>} : vector<8x64xbf16>, vector<64x32xbf16>, vector<8x32xf32> -> vector<8x32xf32>
    %c0_21 = arith.constant 0 : index
    %c0_22 = arith.constant 0 : index
    %104 = vector.load %arg10[%c0_21, %c0_22] : memref<1x32xf32, #tpu.memory_space<vmem>>, vector<1x32xf32>
    %105 = vector.broadcast %104 : vector<1x32xf32> to vector<8x32xf32>
    %106 = arith.addf %103, %105 : vector<8x32xf32>
    %107 = arith.addf %106, %0 : vector<8x32xf32>
    %c0_23 = arith.constant 0 : index
    %c0_24 = arith.constant 0 : index
    %108 = vector.load %arg11[%c0_23, %c0_24] : memref<1x32xf32, #tpu.memory_space<vmem>>, vector<1x32xf32>
    %c0_25 = arith.constant 0 : index
    %c0_26 = arith.constant 0 : index
    %109 = vector.load %arg12[%c0_25, %c0_26] : memref<1x32xf32, #tpu.memory_space<vmem>>, vector<1x32xf32>
    %cst_27 = arith.constant dense<0.000000e+00> : vector<8xf32>
    %110 = vector.multi_reduction <add>, %107, %cst_27 [1] : vector<8x32xf32> to vector<8xf32>
    %111 = vector.shape_cast %110 : vector<8xf32> to vector<8x1xf32>
    %cst_28 = arith.constant 3.200000e+01 : f32
    %112 = vector.broadcast %cst_28 : f32 to vector<8x1xf32>
    %113 = arith.divf %111, %112 : vector<8x1xf32>
    %114 = vector.broadcast %113 : vector<8x1xf32> to vector<8x32xf32>
    %115 = arith.subf %107, %114 : vector<8x32xf32>
    %116 = arith.mulf %115, %115 : vector<8x32xf32>
    %cst_29 = arith.constant dense<0.000000e+00> : vector<8xf32>
    %117 = vector.multi_reduction <add>, %116, %cst_29 [1] : vector<8x32xf32> to vector<8xf32>
    %118 = vector.shape_cast %117 : vector<8xf32> to vector<8x1xf32>
    %cst_30 = arith.constant 3.200000e+01 : f32
    %119 = vector.broadcast %cst_30 : f32 to vector<8x1xf32>
    %120 = arith.divf %118, %119 : vector<8x1xf32>
    %121 = vector.broadcast %113 : vector<8x1xf32> to vector<8x32xf32>
    %122 = arith.subf %107, %121 : vector<8x32xf32>
    %cst_31 = arith.constant 9.99999974E-6 : f32
    %123 = vector.broadcast %cst_31 : f32 to vector<8x1xf32>
    %124 = arith.addf %120, %123 : vector<8x1xf32>
    %125 = math.rsqrt %124 : vector<8x1xf32>
    %126 = vector.broadcast %125 : vector<8x1xf32> to vector<8x32xf32>
    %127 = arith.mulf %122, %126 : vector<8x32xf32>
    %128 = vector.broadcast %108 : vector<1x32xf32> to vector<8x32xf32>
    %129 = arith.mulf %127, %128 : vector<8x32xf32>
    %130 = vector.broadcast %109 : vector<1x32xf32> to vector<8x32xf32>
    %131 = arith.addf %129, %130 : vector<8x32xf32>
    %c0_32 = arith.constant 0 : index
    %c0_33 = arith.constant 0 : index
    %132 = vector.load %arg2[%c0_32, %c0_33] : memref<8x32xf32, #tpu.memory_space<vmem>>, vector<8x32xf32>
    %c0_34 = arith.constant 0 : index
    %c0_35 = arith.constant 0 : index
    %133 = vector.load %arg4[%c0_34, %c0_35] : memref<8x8xf32, #tpu.memory_space<vmem>>, vector<8x8xf32>
    %134 = arith.truncf %131 : vector<8x32xf32> to vector<8x32xbf16>
    %c0_36 = arith.constant 0 : index
    %c0_37 = arith.constant 0 : index
    %135 = vector.load %arg13[%c0_36, %c0_37] : memref<32x64xbf16, #tpu.memory_space<vmem>>, vector<32x64xbf16>
    %cst_38 = arith.constant dense<0.000000e+00> : vector<8x64xf32>
    %136 = tpu.matmul %134, %135, %cst_38 {dimension_numbers = #tpu.dot_dimension_numbers<[1], [0], [0], [1], [0, 0, 1, 1], [], []>} : vector<8x32xbf16>, vector<32x64xbf16>, vector<8x64xf32> -> vector<8x64xf32>
    %c0_39 = arith.constant 0 : index
    %c0_40 = arith.constant 0 : index
    %137 = vector.load %arg14[%c0_39, %c0_40] : memref<1x64xf32, #tpu.memory_space<vmem>>, vector<1x64xf32>
    %138 = vector.broadcast %137 : vector<1x64xf32> to vector<8x64xf32>
    %139 = arith.addf %136, %138 : vector<8x64xf32>
    %140 = arith.truncf %132 : vector<8x32xf32> to vector<8x32xbf16>
    %c0_41 = arith.constant 0 : index
    %c0_42 = arith.constant 0 : index
    %141 = vector.load %arg15[%c0_41, %c0_42] : memref<32x128xbf16, #tpu.memory_space<vmem>>, vector<32x128xbf16>
    %cst_43 = arith.constant dense<0.000000e+00> : vector<8x128xf32>
    %142 = tpu.matmul %140, %141, %cst_43 {dimension_numbers = #tpu.dot_dimension_numbers<[1], [0], [0], [1], [0, 0, 1, 1], [], []>} : vector<8x32xbf16>, vector<32x128xbf16>, vector<8x128xf32> -> vector<8x128xf32>
    %c0_44 = arith.constant 0 : index
    %c0_45 = arith.constant 0 : index
    %143 = vector.load %arg16[%c0_44, %c0_45] : memref<1x128xf32, #tpu.memory_space<vmem>>, vector<1x128xf32>
    %144 = vector.broadcast %143 : vector<1x128xf32> to vector<8x128xf32>
    %145 = arith.addf %142, %144 : vector<8x128xf32>
    %146 = vector.extract_strided_slice %139 {offsets = [0, 0], sizes = [8, 8], strides = [1, 1]} : vector<8x64xf32> to vector<8x8xf32>
    %147 = vector.extract_strided_slice %139 {offsets = [0, 8], sizes = [8, 8], strides = [1, 1]} : vector<8x64xf32> to vector<8x8xf32>
    %148 = vector.extract_strided_slice %139 {offsets = [0, 16], sizes = [8, 8], strides = [1, 1]} : vector<8x64xf32> to vector<8x8xf32>
    %149 = vector.extract_strided_slice %139 {offsets = [0, 24], sizes = [8, 8], strides = [1, 1]} : vector<8x64xf32> to vector<8x8xf32>
    %150 = vector.extract_strided_slice %139 {offsets = [0, 32], sizes = [8, 8], strides = [1, 1]} : vector<8x64xf32> to vector<8x8xf32>
    %151 = vector.extract_strided_slice %139 {offsets = [0, 40], sizes = [8, 8], strides = [1, 1]} : vector<8x64xf32> to vector<8x8xf32>
    %152 = vector.extract_strided_slice %139 {offsets = [0, 48], sizes = [8, 8], strides = [1, 1]} : vector<8x64xf32> to vector<8x8xf32>
    %153 = vector.extract_strided_slice %139 {offsets = [0, 56], sizes = [8, 8], strides = [1, 1]} : vector<8x64xf32> to vector<8x8xf32>
    %154 = vector.shape_cast %146 : vector<8x8xf32> to vector<1x8x8xf32>
    %155 = vector.shape_cast %147 : vector<8x8xf32> to vector<1x8x8xf32>
    %156 = vector.shape_cast %148 : vector<8x8xf32> to vector<1x8x8xf32>
    %157 = vector.shape_cast %149 : vector<8x8xf32> to vector<1x8x8xf32>
    %158 = vector.shape_cast %150 : vector<8x8xf32> to vector<1x8x8xf32>
    %159 = vector.shape_cast %151 : vector<8x8xf32> to vector<1x8x8xf32>
    %160 = vector.shape_cast %152 : vector<8x8xf32> to vector<1x8x8xf32>
    %161 = vector.shape_cast %153 : vector<8x8xf32> to vector<1x8x8xf32>
    %162 = tpu.concatenate %154, %155, %156, %157, %158, %159, %160, %161 in 0 : vector<1x8x8xf32>, vector<1x8x8xf32>, vector<1x8x8xf32>, vector<1x8x8xf32>, vector<1x8x8xf32>, vector<1x8x8xf32>, vector<1x8x8xf32>, vector<1x8x8xf32> -> vector<8x8x8xf32>
    %163 = vector.extract_strided_slice %145 {offsets = [0, 0], sizes = [8, 8], strides = [1, 1]} : vector<8x128xf32> to vector<8x8xf32>
    %164 = vector.extract_strided_slice %145 {offsets = [0, 8], sizes = [8, 8], strides = [1, 1]} : vector<8x128xf32> to vector<8x8xf32>
    %165 = vector.extract_strided_slice %145 {offsets = [0, 16], sizes = [8, 8], strides = [1, 1]} : vector<8x128xf32> to vector<8x8xf32>
    %166 = vector.extract_strided_slice %145 {offsets = [0, 24], sizes = [8, 8], strides = [1, 1]} : vector<8x128xf32> to vector<8x8xf32>
    %167 = vector.extract_strided_slice %145 {offsets = [0, 32], sizes = [8, 8], strides = [1, 1]} : vector<8x128xf32> to vector<8x8xf32>
    %168 = vector.extract_strided_slice %145 {offsets = [0, 40], sizes = [8, 8], strides = [1, 1]} : vector<8x128xf32> to vector<8x8xf32>
    %169 = vector.extract_strided_slice %145 {offsets = [0, 48], sizes = [8, 8], strides = [1, 1]} : vector<8x128xf32> to vector<8x8xf32>
    %170 = vector.extract_strided_slice %145 {offsets = [0, 56], sizes = [8, 8], strides = [1, 1]} : vector<8x128xf32> to vector<8x8xf32>
    %171 = vector.shape_cast %163 : vector<8x8xf32> to vector<1x8x8xf32>
    %172 = vector.shape_cast %164 : vector<8x8xf32> to vector<1x8x8xf32>
    %173 = vector.shape_cast %165 : vector<8x8xf32> to vector<1x8x8xf32>
    %174 = vector.shape_cast %166 : vector<8x8xf32> to vector<1x8x8xf32>
    %175 = vector.shape_cast %167 : vector<8x8xf32> to vector<1x8x8xf32>
    %176 = vector.shape_cast %168 : vector<8x8xf32> to vector<1x8x8xf32>
    %177 = vector.shape_cast %169 : vector<8x8xf32> to vector<1x8x8xf32>
    %178 = vector.shape_cast %170 : vector<8x8xf32> to vector<1x8x8xf32>
    %179 = tpu.concatenate %171, %172, %173, %174, %175, %176, %177, %178 in 0 : vector<1x8x8xf32>, vector<1x8x8xf32>, vector<1x8x8xf32>, vector<1x8x8xf32>, vector<1x8x8xf32>, vector<1x8x8xf32>, vector<1x8x8xf32>, vector<1x8x8xf32> -> vector<8x8x8xf32>
    %180 = vector.extract_strided_slice %145 {offsets = [0, 64], sizes = [8, 8], strides = [1, 1]} : vector<8x128xf32> to vector<8x8xf32>
    %181 = vector.extract_strided_slice %145 {offsets = [0, 72], sizes = [8, 8], strides = [1, 1]} : vector<8x128xf32> to vector<8x8xf32>
    %182 = vector.extract_strided_slice %145 {offsets = [0, 80], sizes = [8, 8], strides = [1, 1]} : vector<8x128xf32> to vector<8x8xf32>
    %183 = vector.extract_strided_slice %145 {offsets = [0, 88], sizes = [8, 8], strides = [1, 1]} : vector<8x128xf32> to vector<8x8xf32>
    %184 = vector.extract_strided_slice %145 {offsets = [0, 96], sizes = [8, 8], strides = [1, 1]} : vector<8x128xf32> to vector<8x8xf32>
    %185 = vector.extract_strided_slice %145 {offsets = [0, 104], sizes = [8, 8], strides = [1, 1]} : vector<8x128xf32> to vector<8x8xf32>
    %186 = vector.extract_strided_slice %145 {offsets = [0, 112], sizes = [8, 8], strides = [1, 1]} : vector<8x128xf32> to vector<8x8xf32>
    %187 = vector.extract_strided_slice %145 {offsets = [0, 120], sizes = [8, 8], strides = [1, 1]} : vector<8x128xf32> to vector<8x8xf32>
    %188 = vector.shape_cast %180 : vector<8x8xf32> to vector<1x8x8xf32>
    %189 = vector.shape_cast %181 : vector<8x8xf32> to vector<1x8x8xf32>
    %190 = vector.shape_cast %182 : vector<8x8xf32> to vector<1x8x8xf32>
    %191 = vector.shape_cast %183 : vector<8x8xf32> to vector<1x8x8xf32>
    %192 = vector.shape_cast %184 : vector<8x8xf32> to vector<1x8x8xf32>
    %193 = vector.shape_cast %185 : vector<8x8xf32> to vector<1x8x8xf32>
    %194 = vector.shape_cast %186 : vector<8x8xf32> to vector<1x8x8xf32>
    %195 = vector.shape_cast %187 : vector<8x8xf32> to vector<1x8x8xf32>
    %196 = tpu.concatenate %188, %189, %190, %191, %192, %193, %194, %195 in 0 : vector<1x8x8xf32>, vector<1x8x8xf32>, vector<1x8x8xf32>, vector<1x8x8xf32>, vector<1x8x8xf32>, vector<1x8x8xf32>, vector<1x8x8xf32>, vector<1x8x8xf32> -> vector<8x8x8xf32>
    "tpu.trace_start"() <{level = 10 : i32, message = "hqd,hkd->hqk"}> : () -> ()
    %cst_46 = arith.constant dense<0.000000e+00> : vector<8x8x8xf32>
    %197 = tpu.matmul %162, %179, %cst_46 {dimension_numbers = #tpu.dot_dimension_numbers<[2], [2], [1], [1], [0, 0, 0, 1, 1, 1], [0], [0]>} : vector<8x8x8xf32>, vector<8x8x8xf32>, vector<8x8x8xf32> -> vector<8x8x8xf32>
    "tpu.trace_stop"() : () -> ()
    %198 = vector.shape_cast %133 : vector<8x8xf32> to vector<1x8x8xf32>
    %cst_47 = arith.constant 0.000000e+00 : f32
    %199 = vector.broadcast %cst_47 : f32 to vector<1x8x8xf32>
    %200 = arith.cmpf one, %198, %199 : vector<1x8x8xf32>
    %cst_48 = arith.constant -1.000000e+30 : f32
    %201 = vector.shape_cast %200 : vector<1x8x8xi1> to vector<1x8x8xi1>
    %202 = vector.broadcast %201 : vector<1x8x8xi1> to vector<8x8x8xi1>
    %203 = vector.broadcast %cst_48 : f32 to vector<8x8x8xf32>
    %204 = arith.select %202, %197, %203 : vector<8x8x8xi1>, vector<8x8x8xf32>
    %cst_49 = arith.constant dense<0xFF800000> : vector<8x8xf32>
    %205 = vector.multi_reduction <maximumf>, %204, %cst_49 [2] : vector<8x8x8xf32> to vector<8x8xf32>
    %206 = vector.shape_cast %205 : vector<8x8xf32> to vector<8x8x1xf32>
    %207 = vector.broadcast %206 : vector<8x8x1xf32> to vector<8x8x8xf32>
    %208 = arith.subf %204, %207 : vector<8x8x8xf32>
    %209 = math.exp %208 : vector<8x8x8xf32>
    %cst_50 = arith.constant dense<0.000000e+00> : vector<8x8xf32>
    %210 = vector.multi_reduction <add>, %209, %cst_50 [2] : vector<8x8x8xf32> to vector<8x8xf32>
    %211 = vector.shape_cast %210 : vector<8x8xf32> to vector<8x8x1xf32>
    %212 = tpu.reciprocal %211 {approx = true} : vector<8x8x1xf32> -> vector<8x8x1xf32>
    %213 = vector.broadcast %212 : vector<8x8x1xf32> to vector<8x8x8xf32>
    %214 = arith.mulf %209, %213 : vector<8x8x8xf32>
    "tpu.trace_start"() <{level = 10 : i32, message = "hqk,hkd->hqd"}> : () -> ()
    %cst_51 = arith.constant dense<0.000000e+00> : vector<8x8x8xf32>
    %215 = tpu.matmul %214, %196, %cst_51 {dimension_numbers = #tpu.dot_dimension_numbers<[2], [1], [1], [2], [0, 0, 0, 1, 1, 2], [0], [0]>} : vector<8x8x8xf32>, vector<8x8x8xf32>, vector<8x8x8xf32> -> vector<8x8x8xf32>
    "tpu.trace_stop"() : () -> ()
    %216 = vector.extract_strided_slice %215 {offsets = [0, 0, 0], sizes = [1, 8, 8], strides = [1, 1, 1]} : vector<8x8x8xf32> to vector<1x8x8xf32>
    %217 = vector.shape_cast %216 : vector<1x8x8xf32> to vector<8x8xf32>
    %218 = vector.extract_strided_slice %215 {offsets = [1, 0, 0], sizes = [1, 8, 8], strides = [1, 1, 1]} : vector<8x8x8xf32> to vector<1x8x8xf32>
    %219 = vector.shape_cast %218 : vector<1x8x8xf32> to vector<8x8xf32>
    %220 = vector.extract_strided_slice %215 {offsets = [2, 0, 0], sizes = [1, 8, 8], strides = [1, 1, 1]} : vector<8x8x8xf32> to vector<1x8x8xf32>
    %221 = vector.shape_cast %220 : vector<1x8x8xf32> to vector<8x8xf32>
    %222 = vector.extract_strided_slice %215 {offsets = [3, 0, 0], sizes = [1, 8, 8], strides = [1, 1, 1]} : vector<8x8x8xf32> to vector<1x8x8xf32>
    %223 = vector.shape_cast %222 : vector<1x8x8xf32> to vector<8x8xf32>
    %224 = vector.extract_strided_slice %215 {offsets = [4, 0, 0], sizes = [1, 8, 8], strides = [1, 1, 1]} : vector<8x8x8xf32> to vector<1x8x8xf32>
    %225 = vector.shape_cast %224 : vector<1x8x8xf32> to vector<8x8xf32>
    %226 = vector.extract_strided_slice %215 {offsets = [5, 0, 0], sizes = [1, 8, 8], strides = [1, 1, 1]} : vector<8x8x8xf32> to vector<1x8x8xf32>
    %227 = vector.shape_cast %226 : vector<1x8x8xf32> to vector<8x8xf32>
    %228 = vector.extract_strided_slice %215 {offsets = [6, 0, 0], sizes = [1, 8, 8], strides = [1, 1, 1]} : vector<8x8x8xf32> to vector<1x8x8xf32>
    %229 = vector.shape_cast %228 : vector<1x8x8xf32> to vector<8x8xf32>
    %230 = vector.extract_strided_slice %215 {offsets = [7, 0, 0], sizes = [1, 8, 8], strides = [1, 1, 1]} : vector<8x8x8xf32> to vector<1x8x8xf32>
    %231 = vector.shape_cast %230 : vector<1x8x8xf32> to vector<8x8xf32>
    %232 = tpu.concatenate %217, %219, %221, %223, %225, %227, %229, %231 in 1 : vector<8x8xf32>, vector<8x8xf32>, vector<8x8xf32>, vector<8x8xf32>, vector<8x8xf32>, vector<8x8xf32>, vector<8x8xf32>, vector<8x8xf32> -> vector<8x64xf32>
    %233 = arith.truncf %232 : vector<8x64xf32> to vector<8x64xbf16>
    %c0_52 = arith.constant 0 : index
    %c0_53 = arith.constant 0 : index
    %234 = vector.load %arg17[%c0_52, %c0_53] : memref<64x32xbf16, #tpu.memory_space<vmem>>, vector<64x32xbf16>
    %cst_54 = arith.constant dense<0.000000e+00> : vector<8x32xf32>
    %235 = tpu.matmul %233, %234, %cst_54 {dimension_numbers = #tpu.dot_dimension_numbers<[1], [0], [0], [1], [0, 0, 1, 1], [], []>} : vector<8x64xbf16>, vector<64x32xbf16>, vector<8x32xf32> -> vector<8x32xf32>
    %c0_55 = arith.constant 0 : index
    %c0_56 = arith.constant 0 : index
    %236 = vector.load %arg18[%c0_55, %c0_56] : memref<1x32xf32, #tpu.memory_space<vmem>>, vector<1x32xf32>
    %237 = vector.broadcast %236 : vector<1x32xf32> to vector<8x32xf32>
    %238 = arith.addf %235, %237 : vector<8x32xf32>
    %239 = arith.addf %238, %131 : vector<8x32xf32>
    %c0_57 = arith.constant 0 : index
    %c0_58 = arith.constant 0 : index
    %240 = vector.load %arg19[%c0_57, %c0_58] : memref<1x32xf32, #tpu.memory_space<vmem>>, vector<1x32xf32>
    %c0_59 = arith.constant 0 : index
    %c0_60 = arith.constant 0 : index
    %241 = vector.load %arg20[%c0_59, %c0_60] : memref<1x32xf32, #tpu.memory_space<vmem>>, vector<1x32xf32>
    %cst_61 = arith.constant dense<0.000000e+00> : vector<8xf32>
    %242 = vector.multi_reduction <add>, %239, %cst_61 [1] : vector<8x32xf32> to vector<8xf32>
    %243 = vector.shape_cast %242 : vector<8xf32> to vector<8x1xf32>
    %cst_62 = arith.constant 3.200000e+01 : f32
    %244 = vector.broadcast %cst_62 : f32 to vector<8x1xf32>
    %245 = arith.divf %243, %244 : vector<8x1xf32>
    %246 = vector.broadcast %245 : vector<8x1xf32> to vector<8x32xf32>
    %247 = arith.subf %239, %246 : vector<8x32xf32>
    %248 = arith.mulf %247, %247 : vector<8x32xf32>
    %cst_63 = arith.constant dense<0.000000e+00> : vector<8xf32>
    %249 = vector.multi_reduction <add>, %248, %cst_63 [1] : vector<8x32xf32> to vector<8xf32>
    %250 = vector.shape_cast %249 : vector<8xf32> to vector<8x1xf32>
    %cst_64 = arith.constant 3.200000e+01 : f32
    %251 = vector.broadcast %cst_64 : f32 to vector<8x1xf32>
    %252 = arith.divf %250, %251 : vector<8x1xf32>
    %253 = vector.broadcast %245 : vector<8x1xf32> to vector<8x32xf32>
    %254 = arith.subf %239, %253 : vector<8x32xf32>
    %cst_65 = arith.constant 9.99999974E-6 : f32
    %255 = vector.broadcast %cst_65 : f32 to vector<8x1xf32>
    %256 = arith.addf %252, %255 : vector<8x1xf32>
    %257 = math.rsqrt %256 : vector<8x1xf32>
    %258 = vector.broadcast %257 : vector<8x1xf32> to vector<8x32xf32>
    %259 = arith.mulf %254, %258 : vector<8x32xf32>
    %260 = vector.broadcast %240 : vector<1x32xf32> to vector<8x32xf32>
    %261 = arith.mulf %259, %260 : vector<8x32xf32>
    %262 = vector.broadcast %241 : vector<1x32xf32> to vector<8x32xf32>
    %263 = arith.addf %261, %262 : vector<8x32xf32>
    %264 = arith.truncf %263 : vector<8x32xf32> to vector<8x32xbf16>
    %c0_66 = arith.constant 0 : index
    %c0_67 = arith.constant 0 : index
    %265 = vector.load %arg21[%c0_66, %c0_67] : memref<32x2048xbf16, #tpu.memory_space<vmem>>, vector<32x2048xbf16>
    %cst_68 = arith.constant dense<0.000000e+00> : vector<8x2048xf32>
    %266 = tpu.matmul %264, %265, %cst_68 {dimension_numbers = #tpu.dot_dimension_numbers<[1], [0], [0], [1], [0, 0, 1, 1], [], []>} : vector<8x32xbf16>, vector<32x2048xbf16>, vector<8x2048xf32> -> vector<8x2048xf32>
    %c0_69 = arith.constant 0 : index
    %c0_70 = arith.constant 0 : index
    %267 = vector.load %arg22[%c0_69, %c0_70] : memref<1x2048xf32, #tpu.memory_space<vmem>>, vector<1x2048xf32>
    %268 = vector.broadcast %267 : vector<1x2048xf32> to vector<8x2048xf32>
    %269 = arith.addf %266, %268 : vector<8x2048xf32>
    %cst_71 = arith.constant 0.000000e+00 : f32
    %270 = vector.broadcast %cst_71 : f32 to vector<8x2048xf32>
    %271 = arith.maximumf %269, %270 : vector<8x2048xf32>
    %272 = arith.truncf %271 : vector<8x2048xf32> to vector<8x2048xbf16>
    %c0_72 = arith.constant 0 : index
    %c0_73 = arith.constant 0 : index
    %273 = vector.load %arg23[%c0_72, %c0_73] : memref<2048x32xbf16, #tpu.memory_space<vmem>>, vector<2048x32xbf16>
    %cst_74 = arith.constant dense<0.000000e+00> : vector<8x32xf32>
    %274 = tpu.matmul %272, %273, %cst_74 {dimension_numbers = #tpu.dot_dimension_numbers<[1], [0], [0], [1], [0, 0, 1, 1], [], []>} : vector<8x2048xbf16>, vector<2048x32xbf16>, vector<8x32xf32> -> vector<8x32xf32>
    %c0_75 = arith.constant 0 : index
    %c0_76 = arith.constant 0 : index
    %275 = vector.load %arg24[%c0_75, %c0_76] : memref<1x32xf32, #tpu.memory_space<vmem>>, vector<1x32xf32>
    %276 = vector.broadcast %275 : vector<1x32xf32> to vector<8x32xf32>
    %277 = arith.addf %274, %276 : vector<8x32xf32>
    %278 = arith.addf %277, %263 : vector<8x32xf32>
    %c0_77 = arith.constant 0 : index
    %c0_78 = arith.constant 0 : index
    %279 = vector.load %arg25[%c0_77, %c0_78] : memref<1x32xf32, #tpu.memory_space<vmem>>, vector<1x32xf32>
    %c0_79 = arith.constant 0 : index
    %c0_80 = arith.constant 0 : index
    %280 = vector.load %arg26[%c0_79, %c0_80] : memref<1x32xf32, #tpu.memory_space<vmem>>, vector<1x32xf32>
    %cst_81 = arith.constant dense<0.000000e+00> : vector<8xf32>
    %281 = vector.multi_reduction <add>, %278, %cst_81 [1] : vector<8x32xf32> to vector<8xf32>
    %282 = vector.shape_cast %281 : vector<8xf32> to vector<8x1xf32>
    %cst_82 = arith.constant 3.200000e+01 : f32
    %283 = vector.broadcast %cst_82 : f32 to vector<8x1xf32>
    %284 = arith.divf %282, %283 : vector<8x1xf32>
    %285 = vector.broadcast %284 : vector<8x1xf32> to vector<8x32xf32>
    %286 = arith.subf %278, %285 : vector<8x32xf32>
    %287 = arith.mulf %286, %286 : vector<8x32xf32>
    %cst_83 = arith.constant dense<0.000000e+00> : vector<8xf32>
    %288 = vector.multi_reduction <add>, %287, %cst_83 [1] : vector<8x32xf32> to vector<8xf32>
    %289 = vector.shape_cast %288 : vector<8xf32> to vector<8x1xf32>
    %cst_84 = arith.constant 3.200000e+01 : f32
    %290 = vector.broadcast %cst_84 : f32 to vector<8x1xf32>
    %291 = arith.divf %289, %290 : vector<8x1xf32>
    %292 = vector.broadcast %284 : vector<8x1xf32> to vector<8x32xf32>
    %293 = arith.subf %278, %292 : vector<8x32xf32>
    %cst_85 = arith.constant 9.99999974E-6 : f32
    %294 = vector.broadcast %cst_85 : f32 to vector<8x1xf32>
    %295 = arith.addf %291, %294 : vector<8x1xf32>
    %296 = math.rsqrt %295 : vector<8x1xf32>
    %297 = vector.broadcast %296 : vector<8x1xf32> to vector<8x32xf32>
    %298 = arith.mulf %293, %297 : vector<8x32xf32>
    %299 = vector.broadcast %279 : vector<1x32xf32> to vector<8x32xf32>
    %300 = arith.mulf %298, %299 : vector<8x32xf32>
    %301 = vector.broadcast %280 : vector<1x32xf32> to vector<8x32xf32>
    %302 = arith.addf %300, %301 : vector<8x32xf32>
    %c0_86 = arith.constant 0 : index
    %c0_87 = arith.constant 0 : index
    %303 = vector.load %arg27[%c0_86, %c0_87] : memref<8x32xf32, #tpu.memory_space<vmem>>, vector<8x32xf32>
    tpu.vector_store %arg27[%c0_86, %c0_87], %302 {strides = array<i32>} : memref<8x32xf32, #tpu.memory_space<vmem>>, vector<8x32xf32>,
    return
  }
  func.func @transform_0(%arg0: i32) -> (i32, i32) {
    %c0_i32 = arith.constant 0 : i32
    %c0_i32_0 = arith.constant 0 : i32
    return %arg0, %c0_i32 : i32, i32
  }
  func.func @transform_1(%arg0: i32) -> (i32, i32) {
    %c0_i32 = arith.constant 0 : i32
    %c0_i32_0 = arith.constant 0 : i32
    return %arg0, %c0_i32 : i32, i32
  }
  func.func @transform_2(%arg0: i32) -> (i32, i32) {
    %c0_i32 = arith.constant 0 : i32
    %c0_i32_0 = arith.constant 0 : i32
    return %arg0, %c0_i32 : i32, i32
  }
  func.func @transform_3(%arg0: i32) -> (i32, i32) {
    %c0_i32 = arith.constant 0 : i32
    %c0_i32_0 = arith.constant 0 : i32
    return %arg0, %c0_i32 : i32, i32
  }
  func.func @transform_4(%arg0: i32) -> (i32, i32) {
    %c0_i32 = arith.constant 0 : i32
    %c0_i32_0 = arith.constant 0 : i32
    %c0_i32_1 = arith.constant 0 : i32
    return %c0_i32, %c0_i32_0 : i32, i32
  }
  func.func @transform_5(%arg0: i32) -> (i32, i32) {
    %c0_i32 = arith.constant 0 : i32
    %c0_i32_0 = arith.constant 0 : i32
    %c0_i32_1 = arith.constant 0 : i32
    return %c0_i32, %c0_i32_0 : i32, i32
  }
  func.func @transform_6(%arg0: i32) -> (i32, i32) {
    %c0_i32 = arith.constant 0 : i32
    %c0_i32_0 = arith.constant 0 : i32
    %c0_i32_1 = arith.constant 0 : i32
    return %c0_i32, %c0_i32_0 : i32, i32
  }
  func.func @transform_7(%arg0: i32) -> (i32, i32) {
    %c0_i32 = arith.constant 0 : i32
    %c0_i32_0 = arith.constant 0 : i32
    %c0_i32_1 = arith.constant 0 : i32
    return %c0_i32, %c0_i32_0 : i32, i32
  }
  func.func @transform_8(%arg0: i32) -> (i32, i32) {
    %c0_i32 = arith.constant 0 : i32
    %c0_i32_0 = arith.constant 0 : i32
    %c0_i32_1 = arith.constant 0 : i32
    return %c0_i32, %c0_i32_0 : i32, i32
  }
  func.func @transform_9(%arg0: i32) -> (i32, i32) {
    %c0_i32 = arith.constant 0 : i32
    %c0_i32_0 = arith.constant 0 : i32
    %c0_i32_1 = arith.constant 0 : i32
    return %c0_i32, %c0_i32_0 : i32, i32
  }
  func.func @transform_10(%arg0: i32) -> (i32, i32) {
    %c0_i32 = arith.constant 0 : i32
    %c0_i32_0 = arith.constant 0 : i32
    %c0_i32_1 = arith.constant 0 : i32
    return %c0_i32, %c0_i32_0 : i32, i32
  }
  func.func @transform_11(%arg0: i32) -> (i32, i32) {
    %c0_i32 = arith.constant 0 : i32
    %c0_i32_0 = arith.constant 0 : i32
    %c0_i32_1 = arith.constant 0 : i32
    return %c0_i32, %c0_i32_0 : i32, i32
  }
  func.func @transform_12(%arg0: i32) -> (i32, i32) {
    %c0_i32 = arith.constant 0 : i32
    %c0_i32_0 = arith.constant 0 : i32
    %c0_i32_1 = arith.constant 0 : i32
    return %c0_i32, %c0_i32_0 : i32, i32
  }
  func.func @transform_13(%arg0: i32) -> (i32, i32) {
    %c0_i32 = arith.constant 0 : i32
    %c0_i32_0 = arith.constant 0 : i32
    %c0_i32_1 = arith.constant 0 : i32
    return %c0_i32, %c0_i32_0 : i32, i32
  }
  func.func @transform_14(%arg0: i32) -> (i32, i32) {
    %c0_i32 = arith.constant 0 : i32
    %c0_i32_0 = arith.constant 0 : i32
    %c0_i32_1 = arith.constant 0 : i32
    return %c0_i32, %c0_i32_0 : i32, i32
  }
  func.func @transform_15(%arg0: i32) -> (i32, i32) {
    %c0_i32 = arith.constant 0 : i32
    %c0_i32_0 = arith.constant 0 : i32
    %c0_i32_1 = arith.constant 0 : i32
    return %c0_i32, %c0_i32_0 : i32, i32
  }
  func.func @transform_16(%arg0: i32) -> (i32, i32) {
    %c0_i32 = arith.constant 0 : i32
    %c0_i32_0 = arith.constant 0 : i32
    %c0_i32_1 = arith.constant 0 : i32
    return %c0_i32, %c0_i32_0 : i32, i32
  }
  func.func @transform_17(%arg0: i32) -> (i32, i32) {
    %c0_i32 = arith.constant 0 : i32
    %c0_i32_0 = arith.constant 0 : i32
    %c0_i32_1 = arith.constant 0 : i32
    return %c0_i32, %c0_i32_0 : i32, i32
  }
  func.func @transform_18(%arg0: i32) -> (i32, i32) {
    %c0_i32 = arith.constant 0 : i32
    %c0_i32_0 = arith.constant 0 : i32
    %c0_i32_1 = arith.constant 0 : i32
    return %c0_i32, %c0_i32_0 : i32, i32
  }
  func.func @transform_19(%arg0: i32) -> (i32, i32) {
    %c0_i32 = arith.constant 0 : i32
    %c0_i32_0 = arith.constant 0 : i32
    %c0_i32_1 = arith.constant 0 : i32
    return %c0_i32, %c0_i32_0 : i32, i32
  }
  func.func @transform_20(%arg0: i32) -> (i32, i32) {
    %c0_i32 = arith.constant 0 : i32
    %c0_i32_0 = arith.constant 0 : i32
    %c0_i32_1 = arith.constant 0 : i32
    return %c0_i32, %c0_i32_0 : i32, i32
  }
  func.func @transform_21(%arg0: i32) -> (i32, i32) {
    %c0_i32 = arith.constant 0 : i32
    %c0_i32_0 = arith.constant 0 : i32
    %c0_i32_1 = arith.constant 0 : i32
    return %c0_i32, %c0_i32_0 : i32, i32
  }
  func.func @transform_22(%arg0: i32) -> (i32, i32) {
    %c0_i32 = arith.constant 0 : i32
    %c0_i32_0 = arith.constant 0 : i32
    %c0_i32_1 = arith.constant 0 : i32
    return %c0_i32, %c0_i32_0 : i32, i32
  }
  func.func @transform_23(%arg0: i32) -> (i32, i32) {
    %c0_i32 = arith.constant 0 : i32
    %c0_i32_0 = arith.constant 0 : i32
    %c0_i32_1 = arith.constant 0 : i32
    return %c0_i32, %c0_i32_0 : i32, i32
  }
  func.func @transform_24(%arg0: i32) -> (i32, i32) {
    %c0_i32 = arith.constant 0 : i32
    %c0_i32_0 = arith.constant 0 : i32
    %c0_i32_1 = arith.constant 0 : i32
    return %c0_i32, %c0_i32_0 : i32, i32
  }
  func.func @transform_25(%arg0: i32) -> (i32, i32) {
    %c0_i32 = arith.constant 0 : i32
    %c0_i32_0 = arith.constant 0 : i32
    %c0_i32_1 = arith.constant 0 : i32
    return %c0_i32, %c0_i32_0 : i32, i32
  }
  func.func @transform_26(%arg0: i32) -> (i32, i32) {
    %c0_i32 = arith.constant 0 : i32
    %c0_i32_0 = arith.constant 0 : i32
    return %arg0, %c0_i32 : i32, i32
  }
}

</mosaic_0001>

<bundles_post_ra>
// kernel: decoder_layer.1
= control target key start
LH: loop header
LB: loop body
LE: loop exit
PB: predicated region body
PF: predicated region fallthrough
CT: control target
= control target key end

     0   :  { %s8641_s0 = inlined_call_operand.vmem [shape: f32[16,32], index: 0, kind: input, shape index: {}]   ;;  %s8642_s1 = inlined_call_operand.vmem [shape: f32[16,32], index: 1, kind: input, shape index: {}]   ;;  %s8643_s2 = inlined_call_operand.vmem [shape: f32[16,8], index: 2, kind: input, shape index: {}]   ;;  %s8644_s3 = inlined_call_operand.vmem [shape: f32[16,8], index: 3, kind: input, shape index: {}]   ;;  %s8645_s4 = inlined_call_operand.vmem [shape: bf16[32,64], index: 4, kind: input, shape index: {}]   ;;  %s8646_s5 = inlined_call_operand.vmem [shape: f32[1,64], index: 5, kind: input, shape index: {}]   ;;  %s8647_s6 = inlined_call_operand.vmem [shape: bf16[32,128], index: 6, kind: input, shape index: {}]   ;;  %s8648_s7 = inlined_call_operand.vmem [shape: f32[1,128], index: 7, kind: input, shape index: {}]   ;;  %s8649_s8 = inlined_call_operand.vmem [shape: bf16[64,32], index: 8, kind: input, shape index: {}]   ;;  %s8650_s9 = inlined_call_operand.vmem [shape: f32[1,32], index: 9, kind: input, shape index: {}]   ;;  %s8651_s10 = inlined_call_operand.vmem [shape: f32[1,32], index: 10, kind: input, shape index: {}]   ;;  %s8652_s11 = inlined_call_operand.vmem [shape: f32[1,32], index: 11, kind: input, shape index: {}]   ;;  %s8653_s12 = inlined_call_operand.vmem [shape: bf16[32,64], index: 12, kind: input, shape index: {}]   ;;  %s8654_s13 = inlined_call_operand.vmem [shape: f32[1,64], index: 13, kind: input, shape index: {}]   ;;  %s8655_s14 = inlined_call_operand.vmem [shape: bf16[32,128], index: 14, kind: input, shape index: {}]   ;;  %s8656_s15 = inlined_call_operand.vmem [shape: f32[1,128], index: 15, kind: input, shape index: {}]   ;;  %s8657_s16 = inlined_call_operand.vmem [shape: bf16[64,32], index: 16, kind: input, shape index: {}]   ;;  %s8658_s17 = inlined_call_operand.vmem [shape: f32[1,32], index: 17, kind: input, shape index: {}]   ;;  %s8659_s18 = inlined_call_operand.vmem [shape: f32[1,32], index: 18, kind: input, shape index: {}]   ;;  %s8660_s19 = inlined_call_operand.vmem [shape: f32[1,32], index: 19, kind: input, shape index: {}]   ;;  %s8661_s20 = inlined_call_operand.vmem [shape: bf16[32,2048], index: 20, kind: input, shape index: {}]   ;;  %s8662_s21 = inlined_call_operand.vmem [shape: f32[1,2048], index: 21, kind: input, shape index: {}]   ;;  %s8663_s22 = inlined_call_operand.vmem [shape: bf16[2048,32], index: 22, kind: input, shape index: {}]   ;;  %s8664_s23 = inlined_call_operand.vmem [shape: f32[1,32], index: 23, kind: input, shape index: {}]   ;;  %s8665_s24 = inlined_call_operand.vmem [shape: f32[1,32], index: 24, kind: input, shape index: {}]   ;;  %s8666_s25 = inlined_call_operand.vmem [shape: f32[1,32], index: 25, kind: input, shape index: {}]   ;;  %s8667_s26 = inlined_call_operand.hbm [shape: f32[16,32], index: 26, kind: output, shape index: {}]  }
   0x1   :  { %8701 = sst [smem:[#allocation9_spill]] %s8641_s0 }
   0x2   :  { %8702 = sst [smem:[#allocation10_spill]] %s8642_s1 }
   0x3   :  { %8703 = sst [smem:[#allocation11_spill]] %s8643_s2 }
   0x4   :  { %8704 = sst [smem:[#allocation12_spill]] %s8644_s3 }
   0x5   :  { %8705 = sst [smem:[#allocation13_spill]] %s8645_s4 }
   0x6   :  { %8706 = sst [smem:[#allocation14_spill]] %s8646_s5 }
   0x7   :  { %8707 = sst [smem:[#allocation15_spill]] %s8647_s6 }
   0x8   :  { %8708 = sst [smem:[#allocation16_spill]] %s8648_s7 }
   0x9   :  { %8709 = sst [smem:[#allocation17_spill]] %s8649_s8 }
   0xa   :  { %8710 = sst [smem:[#allocation18_spill]] %s8650_s9 }
   0xb   :  { %8711 = sst [smem:[#allocation19_spill]] %s8651_s10 }
   0xc   :  { %8712 = sst [smem:[#allocation20_spill]] %s8652_s11 }
   0xd   :  { %8713 = sst [smem:[#allocation21_spill]] %s8653_s12 }
   0xe   :  { %8714 = sst [smem:[#allocation22_spill]] %s8654_s13 }
   0xf   :  { %31 = vsyncpa [#allocation3], 0 }
  0x10   :  { %33 = vsyncpa [#allocation3 + $0x1], 0  ;;  %s7431_s27 = smov 0   ;;  %s7433_s3 = smov 0  }
  0x11   :  { %s7435_s7 = smov 0   ;;  %s7437_s28 = smov 0  }
  0x12 LB: > { %8715 = sst [smem:[#allocation5_spill]] %s7271_s7  ;;  %s7452_s8 = sadd.s32 4294967295, %s7275_s28   ;;  %s7275_s28 = sphi %s7437_s28, %s8751_s28   ;;  %s7271_s7 = sphi %s7435_s7, %s8756_s7   ;;  %s7267_s3 = sphi %s7433_s3, %s8755_s3   ;;  %s7263_s27 = sphi %s7431_s27, %s8754_s27  }
  0x13   : > { %s6201_s4 = sadd.s32 4294967294, %s7275_s28   ;;  %s7456_s29 = sadd.s32 1, %s7275_s28  }
  0x14   : > { %8716 = sst [smem:[#allocation6_spill]] %s7456_s29  ;;  %s612_s0 = sadd.s32 1, %s7271_s7 }
  0x15   : > { %s609_s9 = ssub.s32 %s7275_s28, %s7456_s29  ;;  %p622_p0 = scmp.ne.s32.totalorder %s7271_s7, %s7267_s3 }
  0x16   : > { %p610_p1 = scmp.eq.s32.totalorder %s609_s9, 0  ;;  %p623_p2 = scmp.eq.s32.totalorder %s7452_s8, 1 }
  0x17   : > { %p628_p3 = scmp.ne.s32.totalorder %s7267_s3, %s7263_s27  ;;  %p629_p4 = scmp.eq.s32.totalorder %s6201_s4, 1 }
  0x18   : > { %s7467_s30 = scalar_select %p610_p1, %s7271_s7, %s612_s0  }
  0x19   : > { %p7469_p5 = por %p623_p2, %p622_p0  ;;  %p7473_p6 = por %p629_p4, %p628_p3 }
  0x1a   : > { %8717 = sst [smem:[#allocation7_spill]] %s7467_s30  ;;  %p6204_p7 = scmp.ge.s32.totalorder %s7275_s28, 1 }
  0x1b   : > { %s8719_s5 = scalar_select %p7473_p6, 1, 0 }
  0x1c   : > { %p741_p8 = scmp.lt.s32.totalorder %s7275_s28, 3 }
  0x1d   : > { %8720 = sst [smem:[#allocation8_spill]] %s8719_s5 }
  0x1e   : > { %p742_p9 = pnand %p6204_p7, %p741_p8 }
  0x1f   : > { %s8721_s1 = sld [smem:[#allocation13_spill]] (!%p742_p9)  ;;  %p822_p10 = scmp.lt.s32.totalorder (!%p742_p9), %s7452_s8, 1 }
  0x20   : > { %745 = sbr.rel (%p742_p9) target bundleno = 4195 (0x1063), region = 124  ;;  %s8722_s9 = sld [smem:[#allocation15_spill]] (!%p742_p9) }
  0x21   : > { %s8724_s6 = sld [smem:[#allocation16_spill]] (!%p742_p9)  ;;  %s8689_s5 = smov (!%p742_p9), 120  }
  0x22   : > { %s8725_s0 = sld [smem:[#allocation14_spill]] (!%p742_p9)  ;;  %s8687_s10 = smov (!%p742_p9), 88  }
  0x23   : > { %s8679_s30 = smov (!%p742_p9), 80   ;;  %s8729_s12 = sld [smem:[#allocation21_spill]] (!%p742_p9) }
  0x24   : > { %s8731_s11 = sld [smem:[#allocation20_spill]] (!%p742_p9) }
  0x25   : > { %v7000_v0 = vld [vmem:[%s8721_s1 + $0x8] sm:$0xff]   ;;  %v7277_v1 = vmov 0.0   ;;  %v7002_v3 = vld [vmem:[%s8721_s1] sm:$0xff]   ;;  %vm7278_vm0 = vmmov 0   ;;  %s823_s4 = scalar_select %p822_p10, %s7452_s8, 1  ;;  %vm865_vm1 = vcmask 261120  }
  0x26   : > { %6727 = vmatprep.subr.bf16.mxu0 %v7277_v1  ;;  %6735 = vmatprep.subr.bf16.mxu1 %v7277_v1  ;;  %v7001_v2 = vld [vmem:[%s8722_s9 + $0x8] sm:$0xff]   ;;  %v7003_v4 = vld [vmem:[%s8722_s9] sm:$0xff]   ;;  %s8723_s1 = sld [smem:[#allocation9_spill]]  ;;  %vm1002_vm2 = vcmask 64512   ;;  %s8685_s9 = smov 112   ;;  %vm2331_vm4 = vcmask 130048  }
  0x27   : > { %6728 = vmatpush3.bf16.msra.mxu0 %v7000_v0  ;;  %6731 = vmatprep.mubr.msk.bf16.mxu0 %vm7278_vm0, %v7277_v1  ;;  %s7501_s7 = sshll.u32 %s823_s4, 3  ;;  %v6214_v7 = vld [vmem:[%s8724_s6] ss:$0 sm:$0xff]  ;;  %s8681_s6 = smov 96   ;;  %vm2333_vm5 = vcmask 195584   ;;  %vm2336_vm6 = vcmask 326656  }
  0x28   : > { %6736 = vmatpush3.bf16.msra.mxu1 %v7001_v2  ;;  %6729 = vmatprep.subr.bf16.mxu0 %v7277_v1  ;;  %v6210_v8 = vld [vmem:[%s8725_s0] ss:$0 sm:$0xff]  ;;  %s8677_s4 = smov 72   ;;  %s8727_s0 = sld [smem:[#allocation17_spill]]  ;;  %vm2338_vm7 = vcmask 392192   ;;  %vm2340_vm8 = vcmask 457728  }
  0x29   : > { %6737 = vmatprep.subr.bf16.mxu1 %v7277_v1  ;;  %6739 = vmatprep.mubr.msk.bf16.mxu1 %vm7278_vm0, %v7277_v1  ;;  %vm2382_vm9 = vcmask 523264   ;;  %s8733_s13 = sld [smem:[#allocation22_spill]] }
  0x2b   : > { %6730 = vmatpush3.bf16.msra.mxu0 %v7002_v3 }
  0x2c   : > { %6738 = vmatpush3.bf16.msra.mxu1 %v7003_v4  ;;  %s7507_s29 = scalar_lea.vmem %s8723_s1, %s7501_s7  ;;  %6743 = vmatprep.subr.mxu0 %v7277_v1  ;;  %s8691_s1 = smov 104  }
  0x2d   : > { %v839_v5 = vld [vmem:[%s7507_s29] sm:$0xff]  ;;  %6748 = vmatprep.subr.mxu1 %v7277_v1 }
  0x2e   : > { %v841_v6 = vpack.c.bf16 %v839_v5, %v839_v5 }
  0x30   : > { %6732 = vmatmul.mubr.msk.bf16.vlgmr.msra.gmra.mxu0 %vm865_vm1, %v841_v6  ;;  %6740 = vmatmul.mubr.msk.bf16.vlgmr.msra.gmra.mxu1 %vm865_vm1, %v841_v6 }
  0x31   : > { %6745 = vmatprep.mubr.msk.f32.mxu0 %vm7278_vm0, %v7277_v1  ;;  %6750 = vmatprep.mubr.msk.f32.mxu1 %vm7278_vm0, %v7277_v1 }
  0xf0   : > { %v903_v9 = vpop.f32.mrf.mxu0  ;;  %v966_v10 = vpop.f32.mrf.mxu1 }
  0xf1   : > { %v7524_v11 = vadd.f32 %v6214_v7, %v966_v10  ;;  %v904_v14 = vadd.f32 %v6210_v8, %v903_v9 }
  0xf2   : > { %v6733_v12 = vpop.f32.mrf.mxu0  ;;  %v6741_v13 = vpop.f32.mrf.mxu1 }
  0xf3   : > { %990 = vrot.lane.b32.xlu1 %v7524_v11, %s8685_s9  ;;  %988 = vrot.lane.b32.xlu0 %v7524_v11, %s8689_s5 }
  0xf4   : > { %6744 = vmatpush3.xpose.msk.msra.mxu0 %vm1002_vm2, %v7524_v11  ;;  %v906_v15 = vpop.f32.mrf.mxu0  ;;  %v969_v16 = vpop.f32.mrf.mxu1 }
  0xf5   : > { %6753 = vmatprep.subr.mxu0 %v7277_v1 }
  0xf6   : > { %v6734_v17 = vpop.f32.mrf.mxu0  ;;  %v6742_v18 = vpop.f32.mrf.mxu1 }
  0xf7   : > { %6746 = vmatmul.mubr.msk.f32.vlgmr.msra.gmra.mxu0 %vm1002_vm2, %v904_v14  ;;  %992 = vrot.lane.b32.xlu1 %v7524_v11, %s8691_s1 }
  0xf8   : > { %973 = vrot.lane.b32.xlu0 %v904_v14, %s8689_s5  ;;  %6755 = vmatprep.mubr.msk.f32.mxu0 %vm7278_vm0, %v7277_v1  ;;  %s8696_s5 = smov 40  }
  0xfb   : > { %977 = vrot.lane.b32.xlu1 %v904_v14, %s8691_s1  ;;  %s8697_s1 = smov 32  }
  0xfc   : > { %975 = vrot.lane.b32.xlu0 %v904_v14, %s8685_s9  ;;  %s8695_s9 = smov 48  }
  0xff   : > { %996 = vrot.lane.b32.xlu1 %v7524_v11, %s8687_s10 }
 0x100   : > { %994 = vrot.lane.b32.xlu0 %v7524_v11, %s8681_s6 }
 0x103   : > { %981 = vrot.lane.b32.xlu1 %v904_v14, %s8687_s10  ;;  %s8738_s10 = smov 96  }
 0x104   : > { %979 = vrot.lane.b32.xlu0 %v904_v14, %s8681_s6 }
 0x107   : > { %1000 = vrot.lane.b32.xlu1 %v7524_v11, %s8677_s4 }
 0x108   : > { %998 = vrot.lane.b32.xlu0 %v7524_v11, %s8679_s30 }
 0x10b   : > { %985 = vrot.lane.b32.xlu1 %v904_v14, %s8677_s4  ;;  %s8698_s4 = smov 16  }
 0x10c   : > { %983 = vrot.lane.b32.xlu0 %v904_v14, %s8679_s30  ;;  %s8726_s30 = sld [smem:[#allocation11_spill]] }
 0x112   : > { %s833_s6 = scalar_lea.vmem %s8726_s30, %s7501_s7  ;;  %s8693_s30 = smov 24  }
 0x113   : > { %v840_v33 = vld [vmem:[%s833_s6] sm:$0xff]  ;;  %s8683_s6 = smov 64  }
 0x114   : > { %vm1595_vm3 = vcmp.ne.f32.partialorder %v840_v33, 0.0 }
 0x165   : > { %v7553_v19 = vpop.permute.xlu1 %990  ;;  %v7555_v20 = vpop.permute.xlu0 %988 }
 0x166   : > { %6749 = vmatpush3.xpose.msk.msra.mxu1 %vm1002_vm2, %v7555_v20  ;;  %6754 = vmatpush3.xpose.msk.msra.mxu0 %vm1002_vm2, %v7553_v19 }
 0x167   : > { %6758 = vmatprep.subr.mxu1 %v7277_v1  ;;  %6763 = vmatprep.subr.mxu0 %v7277_v1 }
 0x169   : > { %v7563_v21 = vpop.permute.xlu1 %992 }
 0x16a   : > { %v974_v22 = vpop.permute.xlu0 %973 }
 0x16b   : > { %6751 = vmatmul.mubr.msk.f32.vlgmr.msra.gmra.mxu1 %vm1002_vm2, %v974_v22 }
 0x16c   : > { %6759 = vmatpush3.xpose.msk.msra.mxu1 %vm1002_vm2, %v7563_v21  ;;  %6760 = vmatprep.mubr.msk.f32.mxu1 %vm7278_vm0, %v7277_v1 }
 0x16d   : > { %v978_v23 = vpop.permute.xlu1 %977  ;;  %6768 = vmatprep.subr.mxu1 %v7277_v1 }
 0x16e   : > { %v976_v24 = vpop.permute.xlu0 %975 }
 0x16f   : > { %6756 = vmatmul.mubr.msk.f32.vlgmr.msra.gmra.mxu0 %vm1002_vm2, %v976_v24  ;;  %6761 = vmatmul.mubr.msk.f32.vlgmr.msra.gmra.mxu1 %vm1002_vm2, %v978_v23 }
 0x170   : > { %6770 = vmatprep.mubr.msk.f32.mxu1 %vm7278_vm0, %v7277_v1  ;;  %6765 = vmatprep.mubr.msk.f32.mxu0 %vm7278_vm0, %v7277_v1 }
 0x171   : > { %v7577_v25 = vpop.permute.xlu1 %996 }
 0x172   : > { %v7579_v26 = vpop.permute.xlu0 %994  ;;  %6769 = vmatpush3.xpose.msk.msra.mxu1 %vm1002_vm2, %v7577_v25 }
 0x173   : > { %6764 = vmatpush3.xpose.msk.msra.mxu0 %vm1002_vm2, %v7579_v26  ;;  %6778 = vmatprep.subr.mxu1 %v7277_v1 }
 0x174   : > { %6773 = vmatprep.subr.mxu0 %v7277_v1 }
 0x175   : > { %v982_v27 = vpop.permute.xlu1 %981 }
 0x176   : > { %v980_v28 = vpop.permute.xlu0 %979  ;;  %6771 = vmatmul.mubr.msk.f32.vlgmr.msra.gmra.mxu1 %vm1002_vm2, %v982_v27 }
 0x177   : > { %6766 = vmatmul.mubr.msk.f32.vlgmr.msra.gmra.mxu0 %vm1002_vm2, %v980_v28  ;;  %6780 = vmatprep.mubr.msk.f32.mxu1 %vm7278_vm0, %v7277_v1 }
 0x178   : > { %6775 = vmatprep.mubr.msk.f32.mxu0 %vm7278_vm0, %v7277_v1 }
 0x179   : > { %v7593_v29 = vpop.permute.xlu1 %1000 }
 0x17a   : > { %v7595_v30 = vpop.permute.xlu0 %998  ;;  %6779 = vmatpush3.xpose.msk.msra.mxu1 %vm1002_vm2, %v7593_v29 }
 0x17b   : > { %6774 = vmatpush3.xpose.msk.msra.mxu0 %vm1002_vm2, %v7595_v30  ;;  %6788 = vmatprep.subr.mxu1 %v7277_v1 }
 0x17c   : > { %6783 = vmatprep.subr.mxu0 %v7277_v1 }
 0x17d   : > { %v986_v31 = vpop.permute.xlu1 %985 }
 0x17e   : > { %v984_v32 = vpop.permute.xlu0 %983  ;;  %6781 = vmatmul.mubr.msk.f32.vlgmr.msra.gmra.mxu1 %vm1002_vm2, %v986_v31 }
 0x17f   : > { %6776 = vmatmul.mubr.msk.f32.vlgmr.msra.gmra.mxu0 %vm1002_vm2, %v984_v32  ;;  %6790 = vmatprep.mubr.msk.f32.mxu1 %vm7278_vm0, %v7277_v1 }
 0x180   : > { %6785 = vmatprep.mubr.msk.f32.mxu0 %vm7278_vm0, %v7277_v1 }
 0x1b7   : > { %v1073_v34 = vpop.f32.mrf.mxu0 }
 0x1b8   : > { %v1598_v35 = vsel %vm1595_vm3, %v1073_v34, -1e+30 }
 0x1b9   : > { %v6747_v36 = vpop.f32.mrf.mxu0  ;;  %v1606_v37 = vsel %vm1002_vm2, %v1598_v35, -inf }
 0x1ba   : > { %1607 = vmax.xlane.f32.xlu0 %v1606_v37 }
 0x22b   : > { %v1147_v38 = vpop.f32.mrf.mxu1 }
 0x22c   : > { %v1599_v39 = vsel %vm1595_vm3, %v1147_v38, -1e+30 }
 0x22d   : > { %v6752_v40 = vpop.f32.mrf.mxu1  ;;  %v1609_v41 = vsel %vm1002_vm2, %v1599_v39, -inf }
 0x22e   : > { %1610 = vmax.xlane.f32.xlu1 %v1609_v41 }
 0x22f   : > { %v1221_v42 = vpop.f32.mrf.mxu0  ;;  %v1295_v43 = vpop.f32.mrf.mxu1 }
 0x230   : > { %v1600_v44 = vsel %vm1595_vm3, %v1221_v42, -1e+30  ;;  %v1601_v48 = vsel %vm1595_vm3, %v1295_v43, -1e+30 }
 0x231   : > { %v6757_v45 = vpop.f32.mrf.mxu0  ;;  %v6762_v46 = vpop.f32.mrf.mxu1  ;;  %v1612_v47 = vsel %vm1002_vm2, %v1600_v44, -inf  ;;  %v1615_v49 = vsel %vm1002_vm2, %v1601_v48, -inf }
 0x232   : > { %1613 = vmax.xlane.f32.xlu0 %v1612_v47 }
 0x236   : > { %1616 = vmax.xlane.f32.xlu0 %v1615_v49  ;;  %v1443_v50 = vpop.f32.mrf.mxu1 }
 0x237   : > { %v1369_v51 = vpop.f32.mrf.mxu0  ;;  %v1603_v52 = vsel %vm1595_vm3, %v1443_v50, -1e+30 }
 0x238   : > { %v1602_v53 = vsel %vm1595_vm3, %v1369_v51, -1e+30  ;;  %v6772_v54 = vpop.f32.mrf.mxu1  ;;  %v1621_v55 = vsel %vm1002_vm2, %v1603_v52, -inf }
 0x239   : > { %v6767_v56 = vpop.f32.mrf.mxu0  ;;  %v1618_v57 = vsel %vm1002_vm2, %v1602_v53, -inf }
 0x23a   : > { %1622 = vmax.xlane.f32.xlu0 %v1621_v55  ;;  %1619 = vmax.xlane.f32.xlu1 %v1618_v57 }
 0x23e   : > { %v1591_v58 = vpop.f32.mrf.mxu1 }
 0x23f   : > { %v1517_v59 = vpop.f32.mrf.mxu0  ;;  %v1605_v60 = vsel %vm1595_vm3, %v1591_v58, -1e+30 }
 0x240   : > { %v1604_v61 = vsel %vm1595_vm3, %v1517_v59, -1e+30  ;;  %v6782_v62 = vpop.f32.mrf.mxu1  ;;  %v1627_v63 = vsel %vm1002_vm2, %v1605_v60, -inf }
 0x241   : > { %v6777_v0 = vpop.f32.mrf.mxu0  ;;  %1628 = vmax.xlane.f32.xlu0 %v1627_v63  ;;  %v1624_v2 = vsel %vm1002_vm2, %v1604_v61, -inf }
 0x242   : > { %1625 = vmax.xlane.f32.xlu1 %v1624_v2 }
 0x243   : > { %v1608_v3 = vpop.xlane.xlu0 %1607 }
 0x244   : > { %v1630_v4 = vsub.f32 %v1598_v35, %v1608_v3 }
 0x246   : > { %v1638_v5 = vmul.f32 1.442695, %v1630_v4 }
 0x248   : > { %7144 = vpow2.f32 %v1638_v5 }
 0x253   : > { %1694 = vrot.lane.b32.xlu1 %v7524_v11, %s8683_s6 }
 0x255   : > { %v7641_v6 = vpop.eup %7144 }
 0x256   : > { %v1654_v7 = vsel %vm1002_vm2, %v7641_v6, 0.0 }
 0x257   : > { %1846 = vrot.lane.b32.xlu1 %v7553_v19, %s8683_s6  ;;  %1770 = vrot.lane.b32.xlu0 %v7555_v20, %s8683_s6 }
 0x25b   : > { %1922 = vrot.lane.b32.xlu1 %v7563_v21, %s8683_s6  ;;  %1998 = vrot.lane.b32.xlu0 %v7579_v26, %s8683_s6 }
 0x25f   : > { %2074 = vrot.lane.b32.xlu1 %v7577_v25, %s8683_s6 }
 0x283   : > { %1655 = vadd.xlane.f32.xlu1 %v1654_v7 }
 0x2b7   : > { %v1611_v8 = vpop.xlane.xlu1 %1610 }
 0x2b8   : > { %v1631_v9 = vsub.f32 %v1599_v39, %v1611_v8 }
 0x2ba   : > { %v1640_v10 = vmul.f32 1.442695, %v1631_v9 }
 0x2bb   : > { %v1614_v11 = vpop.xlane.xlu0 %1613 }
 0x2bc   : > { %7146 = vpow2.f32 %v1640_v10  ;;  %v1632_v12 = vsub.f32 %v1600_v44, %v1614_v11 }
 0x2be   : > { %v1642_v13 = vmul.f32 1.442695, %v1632_v12 }
 0x2bf   : > { %v1617_v14 = vpop.xlane.xlu0 %1616 }
 0x2c0   : > { %7148 = vpow2.f32 %v1642_v13  ;;  %v1633_v15 = vsub.f32 %v1601_v48, %v1617_v14  ;;  %v7004_v14 = vld [vmem:[%s8727_s0 + $0x18] sm:$0xff]  }
 0x2c2   : > { %v1644_v16 = vmul.f32 1.442695, %v1633_v15 }
 0x2c3   : > { %v1623_v17 = vpop.xlane.xlu0 %1622  ;;  %v1620_v18 = vpop.xlane.xlu1 %1619 }
 0x2c4   : > { %7150 = vpow2.f32 %v1644_v16  ;;  %v1635_v19 = vsub.f32 %v1603_v52, %v1623_v17  ;;  %v1634_v20 = vsub.f32 %v1602_v53, %v1620_v18  ;;  %v7005_v16 = vld [vmem:[%s8727_s0 + $0x10] sm:$0xff]   ;;  %v7006_v18 = vld [vmem:[%s8727_s0 + $0x8] sm:$0xff]  }
 0x2c6   : > { %v1648_v21 = vmul.f32 1.442695, %v1635_v19  ;;  %v1646_v22 = vmul.f32 1.442695, %v1634_v20 }
 0x2c8   : > { %7152 = vpow2.f32 %v1648_v21 }
 0x2c9   : > { %v7147_v23 = vpop.eup %7146  ;;  %7154 = vpow2.f32 %v1646_v22  ;;  %v7007_v22 = vld [vmem:[%s8727_s0] sm:$0xff]   ;;  %s8734_s0 = smov 104  }
 0x2ca   : > { %v1657_v24 = vsel %vm1002_vm2, %v7147_v23, 0.0  ;;  %v1629_v25 = vpop.xlane.xlu0 %1628 }
 0x2cb   : > { %1658 = vadd.xlane.f32.xlu0 %v1657_v24  ;;  %v1637_v26 = vsub.f32 %v1605_v60, %v1629_v25  ;;  %v1626_v27 = vpop.xlane.xlu1 %1625 }
 0x2cc   : > { %v1636_v28 = vsub.f32 %v1604_v61, %v1626_v27 }
 0x2cd   : > { %v7149_v31 = vpop.eup %7148  ;;  %v1652_v32 = vmul.f32 1.442695, %v1637_v26 }
 0x2ce   : > { %v1650_v33 = vmul.f32 1.442695, %v1636_v28  ;;  %v1771_v34 = vpop.permute.xlu0 %1770  ;;  %v1660_v35 = vsel %vm1002_vm2, %v7149_v31, 0.0 }
 0x2cf   : > { %7156 = vpow2.f32 %v1652_v32  ;;  %1661 = vadd.xlane.f32.xlu1 %v1660_v35  ;;  %v1695_v36 = vpop.permute.xlu1 %1694  ;;  %6789 = vmatpush3.msra.mxu1 %v1771_v34 }
 0x2d0   : > { %7158 = vpow2.f32 %v1650_v33  ;;  %6784 = vmatpush3.msra.mxu0 %v1695_v36  ;;  %6798 = vmatprep.subr.mxu1 %v7277_v1 }
 0x2d1   : > { %v7151_v37 = vpop.eup %7150  ;;  %6793 = vmatprep.subr.mxu0 %v7277_v1 }
 0x2d2   : > { %v1663_v38 = vsel %vm1002_vm2, %v7151_v37, 0.0 }
 0x2d3   : > { %1664 = vadd.xlane.f32.xlu0 %v1663_v38  ;;  %v1847_v47 = vpop.permute.xlu1 %1846 }
 0x2d5   : > { %v7153_v39 = vpop.eup %7152 }
 0x2d6   : > { %v7155_v40 = vpop.eup %7154  ;;  %v1669_v41 = vsel %vm1002_vm2, %v7153_v39, 0.0 }
 0x2d7   : > { %1670 = vadd.xlane.f32.xlu0 %v1669_v41  ;;  %v1666_v42 = vsel %vm1002_vm2, %v7155_v40, 0.0  ;;  %v1923_v48 = vpop.permute.xlu1 %1922 }
 0x2d8   : > { %1667 = vadd.xlane.f32.xlu1 %v1666_v42 }
 0x2db   : > { %v2075_v49 = vpop.permute.xlu1 %2074 }
 0x2dc   : > { %v7652_v43 = vpop.eup %7156 }
 0x2dd   : > { %v7654_v44 = vpop.eup %7158  ;;  %v1675_v45 = vsel %vm1002_vm2, %v7652_v43, 0.0 }
 0x2de   : > { %1676 = vadd.xlane.f32.xlu0 %v1675_v45  ;;  %v1672_v46 = vsel %vm1002_vm2, %v7654_v44, 0.0 }
 0x2df   : > { %1673 = vadd.xlane.f32.xlu1 %v1672_v46 }
 0x2f0   : > { %2226 = vrot.lane.b32.xlu1 %v7593_v29, %s8683_s6  ;;  %v1999_v29 = vpop.permute.xlu0 %1998 }
 0x2f4   : > { %2150 = vrot.lane.b32.xlu0 %v7595_v30, %s8683_s6  ;;  %s8699_s6 = smov 8  }
 0x30c   : > { %v1656_v50 = vpop.xlane.xlu1 %1655 }
 0x30d   : > { %7160 = vrcp.f32 %v1656_v50 }
 0x31a   : > { %v7161_v51 = vpop.eup %7160 }
 0x31b   : > { %v1686_v52 = vmul.f32 %v7161_v51, %v7641_v6 }
 0x31d   : > { %6786 = vmatmul.mubr.msk.f32.vlgmr.msra.gmra.mxu0 %vm1002_vm2, %v1686_v52 }
 0x31e   : > { %6794 = vmatpush3.msra.mxu0 %v1847_v47  ;;  %6795 = vmatprep.mubr.msk.f32.mxu0 %vm7278_vm0, %v7277_v1 }
 0x31f   : > { %6803 = vmatprep.subr.mxu0 %v7277_v1 }
 0x354   : > { %v1659_v53 = vpop.xlane.xlu0 %1658 }
 0x355   : > { %7162 = vrcp.f32 %v1659_v53 }
 0x358   : > { %v1662_v30 = vpop.xlane.xlu1 %1661 }
 0x359   : > { %7164 = vrcp.f32 %v1662_v30 }
 0x35c   : > { %v1665_v54 = vpop.xlane.xlu0 %1664 }
 0x35d   : > { %7166 = vrcp.f32 %v1665_v54 }
 0x360   : > { %v1671_v55 = vpop.xlane.xlu0 %1670 }
 0x361   : > { %7168 = vrcp.f32 %v1671_v55  ;;  %v1668_v56 = vpop.xlane.xlu1 %1667 }
 0x362   : > { %v7163_v57 = vpop.eup %7162  ;;  %7170 = vrcp.f32 %v1668_v56 }
 0x363   : > { %v1687_v58 = vmul.f32 %v7163_v57, %v7147_v23 }
 0x365   : > { %6791 = vmatmul.mubr.msk.f32.vlgmr.msra.gmra.mxu1 %vm1002_vm2, %v1687_v58 }
 0x366   : > { %v7165_v59 = vpop.eup %7164  ;;  %6799 = vmatpush3.msra.mxu1 %v1923_v48  ;;  %6800 = vmatprep.mubr.msk.f32.mxu1 %vm7278_vm0, %v7277_v1 }
 0x367   : > { %v1677_v60 = vpop.xlane.xlu0 %1676  ;;  %v1688_v61 = vmul.f32 %v7165_v59, %v7149_v31  ;;  %6808 = vmatprep.subr.mxu1 %v7277_v1 }
 0x368   : > { %7172 = vrcp.f32 %v1677_v60  ;;  %v1674_v62 = vpop.xlane.xlu1 %1673 }
 0x369   : > { %7174 = vrcp.f32 %v1674_v62  ;;  %6796 = vmatmul.mubr.msk.f32.vlgmr.msra.gmra.mxu0 %vm1002_vm2, %v1688_v61  ;;  %v7008_v61 = vld [vmem:[%s8729_s12 + $0x8] sm:$0xff]   ;;  %v7009_v62 = vld [vmem:[%s8729_s12] sm:$0xff]   ;;  %s8732_s12 = sld [smem:[#allocation10_spill]] }
 0x36a   : > { %v7167_v63 = vpop.eup %7166  ;;  %6804 = vmatpush3.msra.mxu0 %v1999_v29  ;;  %6805 = vmatprep.mubr.msk.f32.mxu0 %vm7278_vm0, %v7277_v1  ;;  %v7214_v29 = vld [vmem:[%s7507_s29] sm:$0xff]  ;;  %s8736_s29 = smov 88  }
 0x36b   : > { %v1689_v0 = vmul.f32 %v7167_v63, %v7151_v37  ;;  %6813 = vmatprep.subr.mxu0 %v7277_v1  ;;  %v2151_v7 = vpop.permute.xlu0 %2150 }
 0x36c   : > { %v2227_v6 = vpop.permute.xlu1 %2226 }
 0x36d   : > { %6801 = vmatmul.mubr.msk.f32.vlgmr.msra.gmra.mxu1 %vm1002_vm2, %v1689_v0 }
 0x36e   : > { %v7169_v2 = vpop.eup %7168  ;;  %6809 = vmatpush3.msra.mxu1 %v2075_v49  ;;  %6810 = vmatprep.mubr.msk.f32.mxu1 %vm7278_vm0, %v7277_v1 }
 0x36f   : > { %v7171_v3 = vpop.eup %7170  ;;  %6818 = vmatprep.subr.mxu1 %v7277_v1  ;;  %v1691_v4 = vmul.f32 %v7169_v2, %v7153_v39 }
 0x370   : > { %v1690_v5 = vmul.f32 %v7171_v3, %v7155_v40 }
 0x371   : > { %6811 = vmatmul.mubr.msk.f32.vlgmr.msra.gmra.mxu1 %vm1002_vm2, %v1691_v4 }
 0x372   : > { %6806 = vmatmul.mubr.msk.f32.vlgmr.msra.gmra.mxu0 %vm1002_vm2, %v1690_v5  ;;  %6819 = vmatpush3.msra.mxu1 %v2227_v6  ;;  %v6249_v6 = vld [vmem:[%s8731_s11] ss:$0 sm:$0xff] }
 0x373   : > { %6814 = vmatpush3.msra.mxu0 %v2151_v7  ;;  %6815 = vmatprep.mubr.msk.f32.mxu0 %vm7278_vm0, %v7277_v1 }
 0x374   : > { %6820 = vmatprep.mubr.msk.f32.mxu1 %vm7278_vm0, %v7277_v1  ;;  %6823 = vmatprep.subr.bf16.mxu0 %v7277_v1 }
 0x375   : > { %v7173_v8 = vpop.eup %7172  ;;  %6835 = vmatprep.subr.bf16.mxu1 %v7277_v1 }
 0x376   : > { %v7175_v9 = vpop.eup %7174  ;;  %v1693_v10 = vmul.f32 %v7173_v8, %v7652_v43 }
 0x377   : > { %v1692_v11 = vmul.f32 %v7175_v9, %v7654_v44  ;;  %v7010_v9 = vld [vmem:[%s8655_s14 + $0x8] sm:$0xff]  }
 0x378   : > { %6821 = vmatmul.mubr.msk.f32.vlgmr.msra.gmra.mxu1 %vm1002_vm2, %v1693_v10 }
 0x379   : > { %6816 = vmatmul.mubr.msk.f32.vlgmr.msra.gmra.mxu0 %vm1002_vm2, %v1692_v11  ;;  %6839 = vmatprep.mubr.msk.bf16.mxu1 %vm7278_vm0, %v7277_v1  ;;  %v7011_v11 = vld [vmem:[%s8655_s14] sm:$0xff]  }
 0x37a   : > { %6831 = vmatprep.mubr.msk.bf16.mxu0 %vm7278_vm0, %v7277_v1  ;;  %6824 = vmatpush3.bf16.msra.mxu0 %v7004_v14  ;;  %v6250_v14 = vld [vmem:[%s8733_s13] ss:$0 sm:$0xff] }
 0x37b   : > { %6825 = vmatprep.subr.bf16.mxu0 %v7277_v1  ;;  %6836 = vmatpush3.bf16.msra.mxu1 %v7008_v61 }
 0x37c   : > { %6837 = vmatprep.subr.bf16.mxu1 %v7277_v1 }
 0x37e   : > { %6826 = vmatpush3.bf16.msra.mxu0 %v7005_v16 }
 0x37f   : > { %6827 = vmatprep.subr.bf16.mxu0 %v7277_v1  ;;  %6838 = vmatpush3.bf16.msra.mxu1 %v7009_v62 }
 0x380   : > { %6843 = vmatprep.subr.bf16.mxu1 %v7277_v1 }
 0x382   : > { %6828 = vmatpush3.bf16.msra.mxu0 %v7006_v18 }
 0x383   : > { %6829 = vmatprep.subr.bf16.mxu0 %v7277_v1 }
 0x386   : > { %6830 = vmatpush3.bf16.msra.mxu0 %v7007_v22 }
 0x387   : > { %6851 = vmatprep.subr.mxu0 %v7277_v1 }
 0x3dd   : > { %v1766_v12 = vpop.f32.mrf.mxu0 }
 0x3df   : > { %v6787_v13 = vpop.f32.mrf.mxu0 }
 0x425   : > { %v1842_v15 = vpop.f32.mrf.mxu1 }
 0x426   : > { %2303 = vrot.lane.b32.xlu0 %v1842_v15, %s8699_s6  ;;  %s8743_s6 = smov 8  }
 0x427   : > { %v6792_v17 = vpop.f32.mrf.mxu1 }
 0x429   : > { %v1918_v19 = vpop.f32.mrf.mxu0 }
 0x42a   : > { %2307 = vrot.lane.b32.xlu1 %v1918_v19, %s8698_s4  ;;  %s8739_s4 = smov 80  }
 0x42b   : > { %v6797_v20 = vpop.f32.mrf.mxu0 }
 0x42c   : > { %v6254_v20 = vld [vmem:[%s8656_s15] ss:$0 sm:$0xff] }
 0x42d   : > { %v1994_v21 = vpop.f32.mrf.mxu1 }
 0x42e   : > { %2311 = vrot.lane.b32.xlu0 %v1994_v21, %s8693_s30  ;;  %s8694_s30 = smov 56  }
 0x42f   : > { %v6802_v23 = vpop.f32.mrf.mxu1 }
 0x431   : > { %v2146_v24 = vpop.f32.mrf.mxu1 }
 0x432   : > { %v2070_v25 = vpop.f32.mrf.mxu0  ;;  %2319 = vrot.lane.b32.xlu0 %v2146_v24, %s8696_s5  ;;  %s8730_s5 = sld [smem:[#allocation19_spill]] }
 0x433   : > { %2315 = vrot.lane.b32.xlu1 %v2070_v25, %s8697_s1  ;;  %v6812_v26 = vpop.f32.mrf.mxu1  ;;  %s829_s1 = scalar_lea.vmem %s8732_s12, %s7501_s7  ;;  %s8740_s12 = smov 72  }
 0x434   : > { %v6807_v27 = vpop.f32.mrf.mxu0 }
 0x438   : > { %v2298_v28 = vpop.f32.mrf.mxu1  ;;  %v6248_v4 = vld [vmem:[%s8730_s5] ss:$0 sm:$0xff]  ;;  %s8735_s5 = smov 120  }
 0x439   : > { %v2222_v31 = vpop.f32.mrf.mxu0  ;;  %2327 = vrot.lane.b32.xlu0 %v2298_v28, %s8694_s30 }
 0x43a   : > { %2323 = vrot.lane.b32.xlu1 %v2222_v31, %s8695_s9  ;;  %v6822_v32 = vpop.f32.mrf.mxu1  ;;  %s8728_s9 = sld [smem:[#allocation18_spill]] }
 0x43b   : > { %v6817_v33 = vpop.f32.mrf.mxu0 }
 0x440   : > { %v6242_v49 = vld [vmem:[%s8728_s9] ss:$0 sm:$0xff]  ;;  %s8746_s9 = smov 32  }
 0x498   : > { %v2304_v34 = vpop.permute.xlu0 %2303 }
 0x499   : > { %v2330_v37 = vsel %vm1002_vm2, %v1766_v12, %v2304_v34  ;;  %v2457_v12 = vld [vmem:[%s829_s1] sm:$0xff]  ;;  %s8737_s1 = smov 112  }
 0x49a   : > { %v2526_v13 = vpack.c.bf16 %v2457_v12, %v2457_v12 }
 0x49c   : > { %v2308_v36 = vpop.permute.xlu1 %2307 }
 0x49d   : > { %v2332_v39 = vsel %vm2331_vm4, %v2330_v37, %v2308_v36 }
 0x4a0   : > { %v2312_v35 = vpop.permute.xlu0 %2311 }
 0x4a1   : > { %v2334_v41 = vsel %vm2333_vm5, %v2332_v39, %v2312_v35 }
 0x4a4   : > { %v2320_v40 = vpop.permute.xlu0 %2319 }
 0x4a5   : > { %v2316_v38 = vpop.permute.xlu1 %2315 }
 0x4a6   : > { %v2335_v42 = vsel %vm865_vm1, %v2334_v41, %v2316_v38 }
 0x4a7   : > { %v2337_v44 = vsel %vm2336_vm6, %v2335_v42, %v2320_v40 }
 0x4ab   : > { %v2328_v43 = vpop.permute.xlu0 %2327 }
 0x4ac   : > { %v2324_v45 = vpop.permute.xlu1 %2323 }
 0x4ad   : > { %v2339_v46 = vsel %vm2338_vm7, %v2337_v44, %v2324_v45 }
 0x4ae   : > { %v2341_v47 = vsel %vm2340_vm8, %v2339_v46, %v2328_v43 }
 0x4af   : > { %v2342_v48 = vpack.c.bf16 %v2341_v47, %v2341_v47 }
 0x4b1   : > { %6832 = vmatmul.mubr.msk.bf16.vlgmr.msra.gmra.mxu0 %vm2382_vm9, %v2342_v48 }
 0x4b2   : > { %6853 = vmatprep.mubr.msk.f32.mxu0 %vm7278_vm0, %v7277_v1 }
 0x571   : > { %v2420_v50 = vpop.f32.mrf.mxu0 }
 0x572   : > { %v2421_v51 = vadd.f32 %v6242_v49, %v2420_v50 }
 0x573   : > { %v6833_v52 = vpop.f32.mrf.mxu0 }
 0x574   : > { %v2426_v53 = vadd.f32 %v7214_v29, %v2421_v51 }
 0x575   : > { %v2423_v30 = vpop.f32.mrf.mxu0 }
 0x576   : > { %v2429_v54 = vsel %vm865_vm1, %v2426_v53, 0.0 }
 0x577   : > { %2430 = vadd.xlane.f32.xlu1 %v2429_v54  ;;  %v6834_v55 = vpop.f32.mrf.mxu0 }
 0x600   : > { %v2431_v56 = vpop.xlane.xlu1 %2430 }
 0x601   : > { %v2433_v57 = vmul.f32 0.03125, %v2431_v56 }
 0x603   : > { %v2434_v58 = vsub.f32 %v2426_v53, %v2433_v57 }
 0x605   : > { %v2435_v59 = vmul.f32 %v2434_v58, %v2434_v58 }
 0x607   : > { %v2436_v60 = vsel %vm865_vm1, %v2435_v59, 0.0 }
 0x608   : > { %2437 = vadd.xlane.f32.xlu0 %v2436_v60 }
 0x691   : > { %v2438_v63 = vpop.xlane.xlu0 %2437 }
 0x692   : > { %v2439_v0 = vmul.f32 0.03125, %v2438_v63 }
 0x694   : > { %v2440_v2 = vadd.f32 1e-05, %v2439_v0 }
 0x696   : > { %7176 = vrsqrt.f32 %v2440_v2 }
 0x6a3   : > { %v7177_v3 = vpop.eup %7176 }
 0x6a4   : > { %v2442_v5 = vmul.f32 %v7177_v3, %v2434_v58 }
 0x6a6   : > { %v2449_v7 = vmul.f32 %v6248_v4, %v2442_v5 }
 0x6a8   : > { %v7750_v8 = vadd.f32 %v6249_v6, %v2449_v7 }
 0x6aa   : > { %v2459_v10 = vpack.c.bf16 %v7750_v8, %v7750_v8 }
 0x6ac   : > { %6840 = vmatmul.mubr.msk.bf16.vlgmr.msra.gmra.mxu1 %vm865_vm1, %v2459_v10 }
 0x6ad   : > { %6844 = vmatpush3.bf16.msra.mxu1 %v7010_v9  ;;  %6847 = vmatprep.mubr.msk.bf16.mxu1 %vm7278_vm0, %v7277_v1 }
 0x6ae   : > { %6845 = vmatprep.subr.bf16.mxu1 %v7277_v1 }
 0x6b1   : > { %6846 = vmatpush3.bf16.msra.mxu1 %v7011_v11 }
 0x6b2   : > { %6856 = vmatprep.subr.mxu1 %v7277_v1 }
 0x6b4   : > { %6848 = vmatmul.mubr.msk.bf16.vlgmr.msra.gmra.mxu1 %vm865_vm1, %v2526_v13 }
 0x6b5   : > { %6858 = vmatprep.mubr.msk.f32.mxu1 %vm7278_vm0, %v7277_v1 }
 0x76c   : > { %v2520_v15 = vpop.f32.mrf.mxu1 }
 0x76d   : > { %v2521_v16 = vadd.f32 %v6250_v14, %v2520_v15 }
 0x76e   : > { %v6841_v17 = vpop.f32.mrf.mxu1 }
 0x76f   : > { %2598 = vrot.lane.b32.xlu0 %v2521_v16, %s8734_s0  ;;  %2594 = vrot.lane.b32.xlu1 %v2521_v16, %s8735_s5 }
 0x770   : > { %v2523_v18 = vpop.f32.mrf.mxu1 }
 0x772   : > { %v6842_v19 = vpop.f32.mrf.mxu1 }
 0x773   : > { %2602 = vrot.lane.b32.xlu0 %v2521_v16, %s8736_s29  ;;  %2596 = vrot.lane.b32.xlu1 %v2521_v16, %s8737_s1 }
 0x774   : > { %v2587_v21 = vpop.f32.mrf.mxu1 }
 0x775   : > { %v7782_v22 = vadd.f32 %v6254_v20, %v2587_v21 }
 0x776   : > { %v6849_v23 = vpop.f32.mrf.mxu1 }
 0x777   : > { %2600 = vrot.lane.b32.xlu1 %v2521_v16, %s8738_s10  ;;  %2609 = vrot.lane.b32.xlu0 %v7782_v22, %s8735_s5  ;;  %s8741_s5 = sld [smem:[#allocation12_spill]] }
 0x778   : > { %6852 = vmatpush3.xpose.msk.msra.mxu0 %vm1002_vm2, %v7782_v22  ;;  %v2590_v24 = vpop.f32.mrf.mxu1 }
 0x779   : > { %6861 = vmatprep.subr.mxu0 %v7277_v1 }
 0x77a   : > { %v6850_v25 = vpop.f32.mrf.mxu1 }
 0x77b   : > { %6854 = vmatmul.mubr.msk.f32.vlgmr.msra.gmra.mxu0 %vm1002_vm2, %v2521_v16  ;;  %2611 = vrot.lane.b32.xlu1 %v7782_v22, %s8737_s1  ;;  %s8748_s1 = smov 48  }
 0x77c   : > { %2613 = vrot.lane.b32.xlu0 %v7782_v22, %s8734_s0  ;;  %6863 = vmatprep.mubr.msk.f32.mxu0 %vm7278_vm0, %v7277_v1 }
 0x77d   : > { %s837_s30 = scalar_lea.vmem %s8741_s5, %s7501_s7  ;;  %s8742_s7 = smov 64  }
 0x77e   : > { %v2458_v42 = vld [vmem:[%s837_s30] sm:$0xff]  ;;  %s8744_s30 = smov 16  }
 0x77f   : > { %2615 = vrot.lane.b32.xlu1 %v7782_v22, %s8738_s10  ;;  %vm3215_vm10 = vcmp.ne.f32.partialorder %v2458_v42, 0.0  ;;  %s8749_s10 = smov 56  }
 0x780   : > { %2617 = vrot.lane.b32.xlu0 %v7782_v22, %s8736_s29  ;;  %s8747_s29 = smov 40  }
 0x783   : > { %2619 = vrot.lane.b32.xlu1 %v7782_v22, %s8739_s4 }
 0x784   : > { %2621 = vrot.lane.b32.xlu0 %v7782_v22, %s8740_s12 }
 0x787   : > { %2604 = vrot.lane.b32.xlu1 %v2521_v16, %s8739_s4 }
 0x788   : > { %2606 = vrot.lane.b32.xlu0 %v2521_v16, %s8740_s12 }
 0x7e1   : > { %v2599_v26 = vpop.permute.xlu0 %2598  ;;  %v2595_v27 = vpop.permute.xlu1 %2594 }
 0x7e5   : > { %v2603_v28 = vpop.permute.xlu0 %2602  ;;  %v2597_v31 = vpop.permute.xlu1 %2596 }
 0x7e9   : > { %v2601_v32 = vpop.permute.xlu1 %2600  ;;  %v7807_v33 = vpop.permute.xlu0 %2609 }
 0x7ea   : > { %6857 = vmatpush3.xpose.msk.msra.mxu1 %vm1002_vm2, %v7807_v33 }
 0x7eb   : > { %6866 = vmatprep.subr.mxu1 %v7277_v1 }
 0x7ed   : > { %v7812_v34 = vpop.permute.xlu1 %2611  ;;  %6859 = vmatmul.mubr.msk.f32.vlgmr.msra.gmra.mxu1 %vm1002_vm2, %v2595_v27 }
 0x7ee   : > { %v7815_v35 = vpop.permute.xlu0 %2613  ;;  %6862 = vmatpush3.xpose.msk.msra.mxu0 %vm1002_vm2, %v7812_v34  ;;  %6868 = vmatprep.mubr.msk.f32.mxu1 %vm7278_vm0, %v7277_v1 }
 0x7ef   : > { %6867 = vmatpush3.xpose.msk.msra.mxu1 %vm1002_vm2, %v7815_v35  ;;  %6871 = vmatprep.subr.mxu0 %v7277_v1 }
 0x7f0   : > { %6876 = vmatprep.subr.mxu1 %v7277_v1 }
 0x7f1   : > { %v7825_v36 = vpop.permute.xlu1 %2615  ;;  %6864 = vmatmul.mubr.msk.f32.vlgmr.msra.gmra.mxu0 %vm1002_vm2, %v2597_v31 }
 0x7f2   : > { %6869 = vmatmul.mubr.msk.f32.vlgmr.msra.gmra.mxu1 %vm1002_vm2, %v2599_v26  ;;  %v7829_v37 = vpop.permute.xlu0 %2617  ;;  %6872 = vmatpush3.xpose.msk.msra.mxu0 %vm1002_vm2, %v7825_v36 }
 0x7f3   : > { %6877 = vmatpush3.xpose.msk.msra.mxu1 %vm1002_vm2, %v7829_v37  ;;  %6873 = vmatprep.mubr.msk.f32.mxu0 %vm7278_vm0, %v7277_v1 }
 0x7f4   : > { %6878 = vmatprep.mubr.msk.f32.mxu1 %vm7278_vm0, %v7277_v1  ;;  %6886 = vmatprep.subr.mxu1 %v7277_v1 }
 0x7f5   : > { %v7840_v38 = vpop.permute.xlu1 %2619  ;;  %6874 = vmatmul.mubr.msk.f32.vlgmr.msra.gmra.mxu0 %vm1002_vm2, %v2601_v32  ;;  %6881 = vmatprep.subr.mxu0 %v7277_v1 }
 0x7f6   : > { %6879 = vmatmul.mubr.msk.f32.vlgmr.msra.gmra.mxu1 %vm1002_vm2, %v2603_v28  ;;  %v7845_v39 = vpop.permute.xlu0 %2621  ;;  %6882 = vmatpush3.xpose.msk.msra.mxu0 %vm1002_vm2, %v7840_v38 }
 0x7f7   : > { %6887 = vmatpush3.xpose.msk.msra.mxu1 %vm1002_vm2, %v7845_v39  ;;  %6888 = vmatprep.mubr.msk.f32.mxu1 %vm7278_vm0, %v7277_v1 }
 0x7f8   : > { %6883 = vmatprep.mubr.msk.f32.mxu0 %vm7278_vm0, %v7277_v1  ;;  %6891 = vmatprep.subr.mxu0 %v7277_v1 }
 0x7f9   : > { %v2605_v40 = vpop.permute.xlu1 %2604  ;;  %6896 = vmatprep.subr.mxu1 %v7277_v1 }
 0x7fa   : > { %v2607_v41 = vpop.permute.xlu0 %2606  ;;  %6884 = vmatmul.mubr.msk.f32.vlgmr.msra.gmra.mxu0 %vm1002_vm2, %v2605_v40 }
 0x7fb   : > { %6889 = vmatmul.mubr.msk.f32.vlgmr.msra.gmra.mxu1 %vm1002_vm2, %v2607_v41  ;;  %6893 = vmatprep.mubr.msk.f32.mxu0 %vm7278_vm0, %v7277_v1 }
 0x7fc   : > { %6898 = vmatprep.mubr.msk.f32.mxu1 %vm7278_vm0, %v7277_v1 }
 0x83b   : > { %v2693_v43 = vpop.f32.mrf.mxu0 }
 0x83c   : > { %v3218_v44 = vsel %vm3215_vm10, %v2693_v43, -1e+30 }
 0x83d   : > { %v6855_v45 = vpop.f32.mrf.mxu0  ;;  %v3226_v46 = vsel %vm1002_vm2, %v3218_v44, -inf }
 0x83e   : > { %3227 = vmax.xlane.f32.xlu1 %v3226_v46 }
 0x8ad   : > { %v2767_v47 = vpop.f32.mrf.mxu1 }
 0x8ae   : > { %v3219_v48 = vsel %vm3215_vm10, %v2767_v47, -1e+30 }
 0x8af   : > { %v6860_v49 = vpop.f32.mrf.mxu1  ;;  %v3229_v50 = vsel %vm1002_vm2, %v3219_v48, -inf }
 0x8b0   : > { %3230 = vmax.xlane.f32.xlu0 %v3229_v50 }
 0x8b1   : > { %v2841_v51 = vpop.f32.mrf.mxu0 }
 0x8b2   : > { %v3220_v52 = vsel %vm3215_vm10, %v2841_v51, -1e+30  ;;  %v2915_v29 = vpop.f32.mrf.mxu1 }
 0x8b3   : > { %v3221_v53 = vsel %vm3215_vm10, %v2915_v29, -1e+30  ;;  %v6865_v30 = vpop.f32.mrf.mxu0  ;;  %v3232_v54 = vsel %vm1002_vm2, %v3220_v52, -inf }
 0x8b4   : > { %v6870_v55 = vpop.f32.mrf.mxu1  ;;  %v3235_v56 = vsel %vm1002_vm2, %v3221_v53, -inf  ;;  %3233 = vmax.xlane.f32.xlu0 %v3232_v54 }
 0x8b5   : > { %3236 = vmax.xlane.f32.xlu1 %v3235_v56  ;;  %v2989_v57 = vpop.f32.mrf.mxu0 }
 0x8b6   : > { %v3222_v58 = vsel %vm3215_vm10, %v2989_v57, -1e+30  ;;  %v3063_v59 = vpop.f32.mrf.mxu1 }
 0x8b7   : > { %v3223_v60 = vsel %vm3215_vm10, %v3063_v59, -1e+30  ;;  %v6875_v61 = vpop.f32.mrf.mxu0  ;;  %v3238_v62 = vsel %vm1002_vm2, %v3222_v58, -inf }
 0x8b8   : > { %v6880_v63 = vpop.f32.mrf.mxu1  ;;  %v3241_v0 = vsel %vm1002_vm2, %v3223_v60, -inf  ;;  %3239 = vmax.xlane.f32.xlu0 %v3238_v62 }
 0x8b9   : > { %3242 = vmax.xlane.f32.xlu1 %v3241_v0 }
 0x8ba   : > { %v3137_v2 = vpop.f32.mrf.mxu0 }
 0x8bb   : > { %v3224_v3 = vsel %vm3215_vm10, %v3137_v2, -1e+30  ;;  %v3211_v4 = vpop.f32.mrf.mxu1 }
 0x8bc   : > { %v3225_v5 = vsel %vm3215_vm10, %v3211_v4, -1e+30  ;;  %v6885_v6 = vpop.f32.mrf.mxu0  ;;  %v3244_v7 = vsel %vm1002_vm2, %v3224_v3, -inf }
 0x8bd   : > { %v6890_v9 = vpop.f32.mrf.mxu1  ;;  %v3247_v10 = vsel %vm1002_vm2, %v3225_v5, -inf  ;;  %3245 = vmax.xlane.f32.xlu0 %v3244_v7 }
 0x8be   : > { %3248 = vmax.xlane.f32.xlu1 %v3247_v10 }
 0x8c7   : > { %v3228_v11 = vpop.xlane.xlu1 %3227 }
 0x8c8   : > { %v3250_v12 = vsub.f32 %v3218_v44, %v3228_v11 }
 0x8ca   : > { %v3258_v13 = vmul.f32 1.442695, %v3250_v12 }
 0x8cc   : > { %7178 = vpow2.f32 %v3258_v13 }
 0x8cf   : > { %3390 = vrot.lane.b32.xlu1 %v7807_v33, %s8742_s7 }
 0x8d3   : > { %3466 = vrot.lane.b32.xlu1 %v7812_v34, %s8742_s7  ;;  %3314 = vrot.lane.b32.xlu0 %v7782_v22, %s8742_s7 }
 0x8d7   : > { %3618 = vrot.lane.b32.xlu1 %v7825_v36, %s8742_s7  ;;  %3542 = vrot.lane.b32.xlu0 %v7815_v35, %s8742_s7 }
 0x8d9   : > { %v7895_v14 = vpop.eup %7178 }
 0x8da   : > { %v3274_v15 = vsel %vm1002_vm2, %v7895_v14, 0.0 }
 0x8db   : > { %3694 = vrot.lane.b32.xlu0 %v7829_v37, %s8742_s7 }
 0x8fa   : > { %3275 = vadd.xlane.f32.xlu0 %v3274_v15 }
 0x939   : > { %v3231_v16 = vpop.xlane.xlu0 %3230 }
 0x93a   : > { %v3251_v17 = vsub.f32 %v3219_v48, %v3231_v16 }
 0x93c   : > { %v3260_v18 = vmul.f32 1.442695, %v3251_v17 }
 0x93d   : > { %v3234_v19 = vpop.xlane.xlu0 %3233 }
 0x93e   : > { %7180 = vpow2.f32 %v3260_v18  ;;  %v3237_v20 = vpop.xlane.xlu1 %3236  ;;  %v3252_v21 = vsub.f32 %v3220_v52, %v3234_v19 }
 0x93f   : > { %v3253_v22 = vsub.f32 %v3221_v53, %v3237_v20 }
 0x940   : > { %v3262_v23 = vmul.f32 1.442695, %v3252_v21 }
 0x941   : > { %v3264_v24 = vmul.f32 1.442695, %v3253_v22  ;;  %v3240_v25 = vpop.xlane.xlu0 %3239 }
 0x942   : > { %7182 = vpow2.f32 %v3262_v23  ;;  %v3243_v26 = vpop.xlane.xlu1 %3242  ;;  %v3254_v27 = vsub.f32 %v3222_v58, %v3240_v25  ;;  %v7012_v23 = vld [vmem:[%s8657_s16 + $0x18] sm:$0xff]   ;;  %v7014_v25 = vld [vmem:[%s8657_s16 + $0x8] sm:$0xff]  }
 0x943   : > { %7184 = vpow2.f32 %v3264_v24  ;;  %v3255_v28 = vsub.f32 %v3223_v60, %v3243_v26  ;;  %v7013_v24 = vld [vmem:[%s8657_s16 + $0x10] sm:$0xff]  }
 0x944   : > { %v3266_v31 = vmul.f32 1.442695, %v3254_v27 }
 0x945   : > { %v3268_v32 = vmul.f32 1.442695, %v3255_v28  ;;  %v7015_v28 = vld [vmem:[%s8657_s16] sm:$0xff]  }
 0x946   : > { %7186 = vpow2.f32 %v3266_v31  ;;  %v3246_v33 = vpop.xlane.xlu0 %3245 }
 0x947   : > { %7188 = vpow2.f32 %v3268_v32  ;;  %v3249_v34 = vpop.xlane.xlu1 %3248  ;;  %v3256_v35 = vsub.f32 %v3224_v3, %v3246_v33 }
 0x948   : > { %v3257_v36 = vsub.f32 %v3225_v5, %v3249_v34 }
 0x949   : > { %v3270_v37 = vmul.f32 1.442695, %v3256_v35 }
 0x94a   : > { %v3272_v40 = vmul.f32 1.442695, %v3257_v36  ;;  %v3315_v41 = vpop.permute.xlu0 %3314 }
 0x94b   : > { %v7181_v42 = vpop.eup %7180  ;;  %7190 = vpow2.f32 %v3270_v37  ;;  %v3391_v43 = vpop.permute.xlu1 %3390  ;;  %6892 = vmatpush3.msra.mxu0 %v3315_v41 }
 0x94c   : > { %7192 = vpow2.f32 %v3272_v40  ;;  %6897 = vmatpush3.msra.mxu1 %v3391_v43  ;;  %v3277_v44 = vsel %vm1002_vm2, %v7181_v42, 0.0  ;;  %6901 = vmatprep.subr.mxu0 %v7277_v1 }
 0x94d   : > { %3278 = vadd.xlane.f32.xlu1 %v3277_v44  ;;  %6906 = vmatprep.subr.mxu1 %v7277_v1 }
 0x94e   : > { %v3543_v55 = vpop.permute.xlu0 %3542 }
 0x94f   : > { %v7183_v45 = vpop.eup %7182  ;;  %v3467_v60 = vpop.permute.xlu1 %3466 }
 0x950   : > { %v7185_v46 = vpop.eup %7184  ;;  %v3280_v47 = vsel %vm1002_vm2, %v7183_v45, 0.0 }
 0x951   : > { %v3283_v48 = vsel %vm1002_vm2, %v7185_v46, 0.0  ;;  %3281 = vadd.xlane.f32.xlu0 %v3280_v47 }
 0x952   : > { %3284 = vadd.xlane.f32.xlu1 %v3283_v48  ;;  %v3695_v56 = vpop.permute.xlu0 %3694 }
 0x953   : > { %v7187_v49 = vpop.eup %7186 }
 0x954   : > { %v7189_v50 = vpop.eup %7188  ;;  %v3286_v51 = vsel %vm1002_vm2, %v7187_v49, 0.0 }
 0x955   : > { %v3289_v52 = vsel %vm1002_vm2, %v7189_v50, 0.0  ;;  %3287 = vadd.xlane.f32.xlu0 %v3286_v51 }
 0x956   : > { %3290 = vadd.xlane.f32.xlu1 %v3289_v52 }
 0x958   : > { %v7906_v29 = vpop.eup %7190 }
 0x959   : > { %v7908_v53 = vpop.eup %7192  ;;  %v3292_v30 = vsel %vm1002_vm2, %v7906_v29, 0.0 }
 0x95a   : > { %v3295_v54 = vsel %vm1002_vm2, %v7908_v53, 0.0  ;;  %3293 = vadd.xlane.f32.xlu0 %v3292_v30 }
 0x95b   : > { %3296 = vadd.xlane.f32.xlu1 %v3295_v54 }
 0x96c   : > { %3770 = vrot.lane.b32.xlu1 %v7840_v38, %s8742_s7  ;;  %v3619_v38 = vpop.permute.xlu1 %3618 }
 0x970   : > { %3846 = vrot.lane.b32.xlu0 %v7845_v39, %s8742_s7  ;;  %s8745_s7 = smov 24  }
 0x983   : > { %v3276_v57 = vpop.xlane.xlu0 %3275 }
 0x984   : > { %7194 = vrcp.f32 %v3276_v57  ;;  %v6282_v57 = vld [vmem:[%s8658_s17] ss:$0 sm:$0xff] }
 0x991   : > { %v7195_v58 = vpop.eup %7194 }
 0x992   : > { %v3306_v59 = vmul.f32 %v7195_v58, %v7895_v14 }
 0x994   : > { %6894 = vmatmul.mubr.msk.f32.vlgmr.msra.gmra.mxu0 %vm1002_vm2, %v3306_v59 }
 0x995   : > { %6902 = vmatpush3.msra.mxu0 %v3467_v60  ;;  %6903 = vmatprep.mubr.msk.f32.mxu0 %vm7278_vm0, %v7277_v1 }
 0x996   : > { %6911 = vmatprep.subr.mxu0 %v7277_v1 }
 0x9d6   : > { %v3279_v61 = vpop.xlane.xlu1 %3278 }
 0x9d7   : > { %7196 = vrcp.f32 %v3279_v61 }
 0x9da   : > { %v3282_v39 = vpop.xlane.xlu0 %3281 }
 0x9db   : > { %v3285_v62 = vpop.xlane.xlu1 %3284  ;;  %7198 = vrcp.f32 %v3282_v39 }
 0x9dc   : > { %7200 = vrcp.f32 %v3285_v62 }
 0x9de   : > { %v3288_v63 = vpop.xlane.xlu0 %3287 }
 0x9df   : > { %v3291_v0 = vpop.xlane.xlu1 %3290  ;;  %7202 = vrcp.f32 %v3288_v63 }
 0x9e0   : > { %7204 = vrcp.f32 %v3291_v0 }
 0x9e3   : > { %v3294_v2 = vpop.xlane.xlu0 %3293 }
 0x9e4   : > { %v7197_v3 = vpop.eup %7196  ;;  %v3297_v4 = vpop.xlane.xlu1 %3296  ;;  %7206 = vrcp.f32 %v3294_v2 }
 0x9e5   : > { %7208 = vrcp.f32 %v3297_v4  ;;  %v3307_v5 = vmul.f32 %v7197_v3, %v7181_v42 }
 0x9e7   : > { %6899 = vmatmul.mubr.msk.f32.vlgmr.msra.gmra.mxu1 %vm1002_vm2, %v3307_v5  ;;  %v3847_v16 = vpop.permute.xlu0 %3846  ;;  %v4087_v5 = vld [vmem:[%s8661_s20 + $0x80] sm:$0xff] }
 0x9e8   : > { %v7199_v6 = vpop.eup %7198  ;;  %6907 = vmatpush3.msra.mxu1 %v3543_v55  ;;  %6908 = vmatprep.mubr.msk.f32.mxu1 %vm7278_vm0, %v7277_v1  ;;  %v3771_v15 = vpop.permute.xlu1 %3770 }
 0x9e9   : > { %v7201_v7 = vpop.eup %7200  ;;  %6916 = vmatprep.subr.mxu1 %v7277_v1  ;;  %v3308_v9 = vmul.f32 %v7199_v6, %v7183_v45  ;;  %v4089_v6 = vld [vmem:[%s8661_s20 + $0x90] sm:$0xff] }
 0x9ea   : > { %v3309_v10 = vmul.f32 %v7201_v7, %v7185_v46 }
 0x9eb   : > { %6904 = vmatmul.mubr.msk.f32.vlgmr.msra.gmra.mxu0 %vm1002_vm2, %v3308_v9  ;;  %v4097_v9 = vld [vmem:[%s8661_s20 + $0xd0] sm:$0xff] }
 0x9ec   : > { %v7203_v11 = vpop.eup %7202  ;;  %6909 = vmatmul.mubr.msk.f32.vlgmr.msra.gmra.mxu1 %vm1002_vm2, %v3309_v10  ;;  %6912 = vmatpush3.msra.mxu0 %v3619_v38 }
 0x9ed   : > { %v7205_v12 = vpop.eup %7204  ;;  %6917 = vmatpush3.msra.mxu1 %v3695_v56  ;;  %6913 = vmatprep.mubr.msk.f32.mxu0 %vm7278_vm0, %v7277_v1  ;;  %v3310_v13 = vmul.f32 %v7203_v11, %v7187_v49  ;;  %v6310_v11 = vcombine.low %v4089_v6, %v4097_v9 }
 0x9ee   : > { %6918 = vmatprep.mubr.msk.f32.mxu1 %vm7278_vm0, %v7277_v1  ;;  %6921 = vmatprep.subr.mxu0 %v7277_v1  ;;  %v3311_v14 = vmul.f32 %v7205_v12, %v7189_v50  ;;  %v6311_v12 = vcombine.high %v4089_v6, %v4097_v9  ;;  %v4094_v9 = vld [vmem:[%s8661_s20 + $0xb8] sm:$0xff] }
 0x9ef   : > { %6926 = vmatprep.subr.mxu1 %v7277_v1  ;;  %6914 = vmatmul.mubr.msk.f32.vlgmr.msra.gmra.mxu0 %vm1002_vm2, %v3310_v13  ;;  %v4071_v13 = vld [vmem:[%s8661_s20] sm:$0xff] }
 0x9f0   : > { %6919 = vmatmul.mubr.msk.f32.vlgmr.msra.gmra.mxu1 %vm1002_vm2, %v3311_v14  ;;  %6922 = vmatpush3.msra.mxu0 %v3771_v15  ;;  %v4079_v14 = vld [vmem:[%s8661_s20 + $0x40] sm:$0xff]  ;;  %v4073_v15 = vld [vmem:[%s8661_s20 + $0x10] sm:$0xff] }
 0x9f1   : > { %v7207_v17 = vpop.eup %7206  ;;  %6927 = vmatpush3.msra.mxu1 %v3847_v16  ;;  %6923 = vmatprep.mubr.msk.f32.mxu0 %vm7278_vm0, %v7277_v1  ;;  %v6291_v16 = vcombine.high %v4071_v13, %v4079_v14 }
 0x9f2   : > { %v7209_v18 = vpop.eup %7208  ;;  %6928 = vmatprep.mubr.msk.f32.mxu1 %vm7278_vm0, %v7277_v1  ;;  %v3312_v19 = vmul.f32 %v7207_v17, %v7906_v29  ;;  %6931 = vmatprep.subr.bf16.mxu0 %v7277_v1  ;;  %v4081_v17 = vld [vmem:[%s8661_s20 + $0x50] sm:$0xff] }
 0x9f3   : > { %v3313_v20 = vmul.f32 %v7209_v18, %v7908_v53  ;;  %v6290_v18 = vcombine.low %v4071_v13, %v4079_v14  ;;  %v7019_v14 = vld [vmem:[%s8663_s22 + $0x30] sm:$0xff]  }
 0x9f4   : > { %6924 = vmatmul.mubr.msk.f32.vlgmr.msra.gmra.mxu0 %vm1002_vm2, %v3312_v19  ;;  %v6294_v19 = vcombine.low %v4073_v15, %v4081_v17 }
 0x9f5   : > { %6929 = vmatmul.mubr.msk.f32.vlgmr.msra.gmra.mxu1 %vm1002_vm2, %v3313_v20  ;;  %6939 = vmatprep.mubr.msk.bf16.mxu0 %vm7278_vm0, %v7277_v1  ;;  %v6295_v20 = vcombine.high %v4073_v15, %v4081_v17  ;;  %v4078_v15 = vld [vmem:[%s8661_s20 + $0x38] sm:$0xff]  ;;  %v7020_v17 = vld [vmem:[%s8663_s22 + $0x68] sm:$0xff]  }
 0x9f6   : > { %6932 = vmatpush3.bf16.msra.mxu0 %v7012_v23  ;;  %v4091_v23 = vld [vmem:[%s8661_s20 + $0xa0] sm:$0xff] }
 0x9f7   : > { %6933 = vmatprep.subr.bf16.mxu0 %v7277_v1 }
 0x9fa   : > { %6934 = vmatpush3.bf16.msra.mxu0 %v7013_v24  ;;  %v7294_v24 = vmov 0  }
 0x9fb   : > { %6935 = vmatprep.subr.bf16.mxu0 %v7277_v1  ;;  %4382 = vmatprep.mubr.bf16.mxu1 %v7294_v24 }
 0x9fe   : > { %6936 = vmatpush3.bf16.msra.mxu0 %v7014_v25 }
 0x9ff   : > { %6937 = vmatprep.subr.bf16.mxu0 %v7277_v1 }
 0xa02   : > { %6938 = vmatpush3.bf16.msra.mxu0 %v7015_v28 }
 0xa03   : > { %4444 = vmatprep.subr.bf16.mxu0 %v6311_v12 }
 0xa54   : > { %v3386_v21 = vpop.f32.mrf.mxu0 }
 0xa56   : > { %v6895_v22 = vpop.f32.mrf.mxu0 }
 0xa57   : > { %v4096_v22 = vld [vmem:[%s8661_s20 + $0xc8] sm:$0xff] }
 0xaa7   : > { %v3462_v26 = vpop.f32.mrf.mxu1 }
 0xaa8   : > { %3923 = vrot.lane.b32.xlu1 %v3462_v26, %s8743_s6  ;;  %s819_s6 = sand.u32 1, %s7267_s3  }
 0xaa9   : > { %v6900_v27 = vpop.f32.mrf.mxu1  ;;  %s6205_s0 = sshll.u32 %s819_s6, 3  ;;  %s6093_s13 = scalar_lea.sflag [#allocation3], %s819_s6 }
 0xaaa   : > { %v4099_v27 = vld [vmem:[%s8661_s20 + $0xe0] sm:$0xff] }
 0xaab   : > { %v3538_v31 = vpop.f32.mrf.mxu0  ;;  %v6314_v28 = vcombine.low %v4091_v23, %v4099_v27 }
 0xaac   : > { %v3614_v32 = vpop.f32.mrf.mxu1  ;;  %3927 = vrot.lane.b32.xlu0 %v3538_v31, %s8744_s30  ;;  %v6315_v31 = vcombine.high %v4091_v23, %v4099_v27  ;;  %v7021_v23 = vld [vmem:[%s8663_s22 + $0xf8] sm:$0xff]   ;;  %v7025_v27 = vld [vmem:[%s8663_s22 + $0xf0] sm:$0xff]   ;;  %s7295_s30 = smov [#allocation2]  }
 0xaad   : > { %3931 = vrot.lane.b32.xlu1 %v3614_v32, %s8745_s7  ;;  %v6905_v33 = vpop.f32.mrf.mxu0  ;;  %s7219_s7 = sshll.u32 %s7295_s30, 4  ;;  %s7220_s7 = int_to_ptr.vmem [resolvable:$false] %s7219_s7 }
 0xaae   : > { %v6910_v34 = vpop.f32.mrf.mxu1 }
 0xaaf   : > { %v3690_v35 = vpop.f32.mrf.mxu0 }
 0xab0   : > { %v3766_v36 = vpop.f32.mrf.mxu1  ;;  %3935 = vrot.lane.b32.xlu0 %v3690_v35, %s8746_s9 }
 0xab1   : > { %3939 = vrot.lane.b32.xlu1 %v3766_v36, %s8747_s29  ;;  %v6915_v1 = vpop.f32.mrf.mxu0  ;;  %v6288_v36 = vld [vmem:[%s8659_s18] ss:$0 sm:$0xff]  ;;  %s6462_s29 = sshll.u32 %s7452_s8, 7  ;;  %s7221_s8 = scalar_lea.vmem %s7220_s7, 256 }
 0xab2   : > { %v6920_v37 = vpop.f32.mrf.mxu1  ;;  %s6104_s11 = scalar_lea.hbm %s8667_s26, %s6462_s29 }
 0xab3   : > { %v6289_v37 = vld [vmem:[%s8660_s19] ss:$0 sm:$0xff] }
 0xab4   : > { %v3842_v40 = vpop.f32.mrf.mxu0 }
 0xab5   : > { %v3918_v41 = vpop.f32.mrf.mxu1  ;;  %3943 = vrot.lane.b32.xlu0 %v3842_v40, %s8748_s1  ;;  %s821_s1 = scalar_lea.vmem [#allocation2], %s6205_s0 }
 0xab6   : > { %3947 = vrot.lane.b32.xlu1 %v3918_v41, %s8749_s10  ;;  %v6925_v42 = vpop.f32.mrf.mxu0  ;;  %v4072_v41 = vld [vmem:[%s8661_s20 + $0x8] sm:$0xff]  ;;  %s6106_s10 = sshll.u32 %s821_s1, 4  ;;  %s6107_s10 = int_to_ptr.vmem [resolvable:$true] %s6106_s10 }
 0xab7   : > { %v6930_v43 = vpop.f32.mrf.mxu1  ;;  %v4080_v42 = vld [vmem:[%s8661_s20 + $0x48] sm:$0xff]  ;;  %s7215_s5 = scalar_lea.vmem %s6107_s10, 128  ;;  %p7222_p0 = scmp.lt.s32.totalorder %s6107_s10, %s7220_s7 }
 0xab8   : > { %v4075_v43 = vld [vmem:[%s8661_s20 + $0x20] sm:$0xff]  ;;  %p7216_p11 = scmp.ne.s32.totalorder %s6107_s10, %s7215_s5  ;;  %p7223_p1 = scmp.lt.s32.totalorder %s7221_s8, %s7215_s5 }
 0xaba   : > { %p7217_p12 = pnand %p7216_p11, %p7469_p5  ;;  %p7224_p2 = por %p7223_p1, %p7222_p0 }
 0xabc   : > { %p7218_p13 = pneg %p7217_p12 }
 0xabe   : > { %p7225_p3 = pnand %p7224_p2, %p7218_p13 }
 0xb1a   : > { %v3924_v44 = vpop.permute.xlu1 %3923 }
 0xb1b   : > { %v3950_v46 = vsel %vm1002_vm2, %v3386_v21, %v3924_v44  ;;  %v4088_v21 = vld [vmem:[%s8661_s20 + $0x88] sm:$0xff]  ;;  %v4083_v44 = vld [vmem:[%s8661_s20 + $0x60] sm:$0xff] }
 0xb1c   : > { %v6308_v25 = vcombine.low %v4088_v21, %v4096_v22  ;;  %v6309_v26 = vcombine.high %v4088_v21, %v4096_v22  ;;  %v7024_v21 = vld [vmem:[%s8663_s22 + $0x60] sm:$0xff]  }
 0xb1e   : > { %v3928_v45 = vpop.permute.xlu0 %3927 }
 0xb1f   : > { %v3932_v47 = vpop.permute.xlu1 %3931  ;;  %v3951_v48 = vsel %vm2331_vm4, %v3950_v46, %v3928_v45 }
 0xb20   : > { %v3952_v51 = vsel %vm2333_vm5, %v3951_v48, %v3932_v47  ;;  %v6293_v47 = vcombine.high %v4072_v41, %v4080_v42  ;;  %v6299_v48 = vcombine.high %v4075_v43, %v4083_v44 }
 0xb22   : > { %v3936_v49 = vpop.permute.xlu0 %3935 }
 0xb23   : > { %v3940_v50 = vpop.permute.xlu1 %3939  ;;  %v3953_v52 = vsel %vm865_vm1, %v3952_v51, %v3936_v49  ;;  %v4090_v49 = vld [vmem:[%s8661_s20 + $0x98] sm:$0xff]  ;;  %v4093_v51 = vld [vmem:[%s8661_s20 + $0xb0] sm:$0xff] }
 0xb24   : > { %v3954_v29 = vsel %vm2336_vm6, %v3953_v52, %v3940_v50  ;;  %v4098_v50 = vld [vmem:[%s8661_s20 + $0xd8] sm:$0xff]  ;;  %v4101_v52 = vld [vmem:[%s8661_s20 + $0xf0] sm:$0xff] }
 0xb27   : > { %v3944_v53 = vpop.permute.xlu0 %3943 }
 0xb28   : > { %v3948_v30 = vpop.permute.xlu1 %3947  ;;  %v3955_v54 = vsel %vm2338_vm7, %v3954_v29, %v3944_v53  ;;  %v6292_v29 = vcombine.low %v4072_v41, %v4080_v42  ;;  %v6298_v53 = vcombine.low %v4075_v43, %v4083_v44  ;;  %v7038_v41 = vld [vmem:[%s8663_s22 + $0x8] sm:$0xff]   ;;  %v7039_v42 = vld [vmem:[%s8663_s22 + $0x98] sm:$0xff]   ;;  %v7040_v43 = vld [vmem:[%s8663_s22 + $0x40] sm:$0xff]  }
 0xb29   : > { %v3956_v55 = vsel %vm2340_vm8, %v3955_v54, %v3948_v30  ;;  %v6313_v30 = vcombine.high %v4090_v49, %v4098_v50  ;;  %v6319_v54 = vcombine.high %v4093_v51, %v4101_v52  ;;  %v7041_v44 = vld [vmem:[%s8663_s22 + $0xd0] sm:$0xff]  }
 0xb2a   : > { %v3957_v56 = vpack.c.bf16 %v3956_v55, %v3956_v55  ;;  %v4074_v55 = vld [vmem:[%s8661_s20 + $0x18] sm:$0xff] }
 0xb2c   : > { %6940 = vmatmul.mubr.msk.bf16.vlgmr.msra.gmra.mxu0 %vm2382_vm9, %v3957_v56  ;;  %v4082_v56 = vld [vmem:[%s8661_s20 + $0x58] sm:$0xff] }
 0xb2d   : > { %4445 = vmatpush1.bf16.msra.mxu0 %v6310_v11  ;;  %4464 = vmatprep.mubr.bf16.mxu0 %v7294_v24  ;;  %v7018_v11 = vld [vmem:[%s8663_s22 + $0x70] sm:$0xff]  }
 0xb2e   : > { %4446 = vmatprep.subr.bf16.mxu0 %v6295_v20  ;;  %v7022_v20 = vld [vmem:[%s8663_s22 + $0x28] sm:$0xff]  }
 0xb31   : > { %4447 = vmatpush1.bf16.msra.mxu0 %v6294_v19 }
 0xb32   : > { %4526 = vmatprep.subr.bf16.mxu0 %v6315_v31  ;;  %v7032_v31 = vld [vmem:[%s8663_s22 + $0x50] sm:$0xff]  }
 0xbec   : > { %v4034_v58 = vpop.f32.mrf.mxu0 }
 0xbed   : > { %v4035_v59 = vadd.f32 %v6282_v57, %v4034_v58  ;;  %v4077_v57 = vld [vmem:[%s8661_s20 + $0x30] sm:$0xff] }
 0xbee   : > { %v6941_v60 = vpop.f32.mrf.mxu0  ;;  %v4085_v58 = vld [vmem:[%s8661_s20 + $0x70] sm:$0xff] }
 0xbef   : > { %v4040_v38 = vadd.f32 %v4035_v59, %v7750_v8  ;;  %v4095_v8 = vld [vmem:[%s8661_s20 + $0xc0] sm:$0xff]  ;;  %v6312_v59 = vcombine.low %v4090_v49, %v4098_v50  ;;  %v6318_v60 = vcombine.low %v4093_v51, %v4101_v52  ;;  %v7045_v49 = vld [vmem:[%s8663_s22 + $0x178] sm:$0xff]   ;;  %v7046_v50 = vld [vmem:[%s8663_s22 + $0x88] sm:$0xff]  }
 0xbf0   : > { %v4037_v61 = vpop.f32.mrf.mxu0  ;;  %v6307_v7 = vcombine.high %v4087_v5, %v4095_v8  ;;  %v6306_v10 = vcombine.low %v4087_v5, %v4095_v8  ;;  %v4084_v5 = vld [vmem:[%s8661_s20 + $0x68] sm:$0xff]  ;;  %v7048_v51 = vld [vmem:[%s8663_s22 + $0xc0] sm:$0xff]  }
 0xbf1   : > { %v4043_v39 = vsel %vm865_vm1, %v4040_v38, 0.0  ;;  %v6303_v61 = vcombine.high %v4077_v57, %v4085_v58  ;;  %v7050_v52 = vld [vmem:[%s8663_s22 + $0x80] sm:$0xff]  }
 0xbf2   : > { %4044 = vadd.xlane.f32.xlu0 %v4043_v39  ;;  %v6942_v62 = vpop.f32.mrf.mxu0  ;;  %4362 = vmatprep.subr.bf16.mxu1 %v6307_v7  ;;  %v4092_v39 = vld [vmem:[%s8661_s20 + $0xa8] sm:$0xff]  ;;  %v7017_v7 = vld [vmem:[%s8663_s22 + $0x38] sm:$0xff]  }
 0xbf3   : > { %4363 = vmatpush1.bf16.msra.mxu1 %v6306_v10  ;;  %v4100_v62 = vld [vmem:[%s8661_s20 + $0xe8] sm:$0xff]  ;;  %v4102_v10 = vld [vmem:[%s8661_s20 + $0xf8] sm:$0xff] }
 0xbf4   : > { %4364 = vmatprep.subr.bf16.mxu1 %v6291_v16  ;;  %v6316_v8 = vcombine.low %v4092_v39, %v4100_v62  ;;  %v6321_v13 = vcombine.high %v4094_v9, %v4102_v10  ;;  %v4086_v16 = vld [vmem:[%s8661_s20 + $0x78] sm:$0xff] }
 0xbf5   : > { %v6305_v19 = vcombine.high %v4078_v15, %v4086_v16  ;;  %v6304_v22 = vcombine.low %v4078_v15, %v4086_v16 }
 0xbf7   : > { %4365 = vmatpush1.bf16.msra.mxu1 %v6290_v18  ;;  %v6320_v18 = vcombine.low %v4094_v9, %v4102_v10 }
 0xbf8   : > { %4403 = vmatprep.subr.bf16.mxu1 %v6309_v26  ;;  %v7028_v26 = vld [vmem:[%s8663_s22 + $0x58] sm:$0xff]  }
 0xc7b   : > { %v4045_v63 = vpop.xlane.xlu0 %4044 }
 0xc7c   : > { %v4046_v0 = vmul.f32 0.03125, %v4045_v63  ;;  %v6296_v63 = vcombine.low %v4074_v55, %v4082_v56 }
 0xc7e   : > { %v4047_v2 = vsub.f32 %v4040_v38, %v4046_v0  ;;  %v6297_v38 = vcombine.high %v4074_v55, %v4082_v56  ;;  %v6302_v0 = vcombine.low %v4077_v57, %v4085_v58  ;;  %v8224_v55 = vld [vmem:[%s8662_s21 + $0x8] sm:$0xff]  ;;  %v8235_v58 = vld [vmem:[%s8662_s21] sm:$0xff] }
 0xc80   : > { %v4048_v3 = vmul.f32 %v4047_v2, %v4047_v2 }
 0xc82   : > { %v4049_v4 = vsel %vm865_vm1, %v4048_v3, 0.0  ;;  %v7016_v3 = vld [vmem:[%s8663_s22 + $0x78] sm:$0xff]  }
 0xc83   : > { %4050 = vadd.xlane.f32.xlu1 %v4049_v4  ;;  %v4076_v4 = vld [vmem:[%s8661_s20 + $0x28] sm:$0xff] }
 0xc84   : > { %v6301_v6 = vcombine.high %v4076_v4, %v4084_v5  ;;  %v6300_v12 = vcombine.low %v4076_v4, %v4084_v5 }
 0xd0c   : > { %v4051_v32 = vpop.xlane.xlu1 %4050 }
 0xd0d   : > { %v4052_v33 = vmul.f32 0.03125, %v4051_v32  ;;  %v7027_v32 = vld [vmem:[%s8663_s22 + $0xb0] sm:$0xff]  }
 0xd0f   : > { %v4053_v34 = vadd.f32 1e-05, %v4052_v33  ;;  %v7029_v33 = vld [vmem:[%s8663_s22 + $0xe8] sm:$0xff]  }
 0xd11   : > { %7210 = vrsqrt.f32 %v4053_v34  ;;  %v7034_v34 = vld [vmem:[%s8663_s22 + $0x10] sm:$0xff]  }
 0xd1e   : > { %v7211_v35 = vpop.eup %7210 }
 0xd1f   : > { %v4055_v1 = vmul.f32 %v7211_v35, %v4047_v2  ;;  %v6317_v2 = vcombine.high %v4092_v39, %v4100_v62  ;;  %v7031_v35 = vld [vmem:[%s8663_s22 + $0xa8] sm:$0xff]  }
 0xd21   : > { %v4062_v40 = vmul.f32 %v6288_v36, %v4055_v1  ;;  %v7033_v36 = vld [vmem:[%s8663_s22 + $0xe0] sm:$0xff]  }
 0xd22   : > { %v7035_v1 = vld [vmem:[%s8663_s22 + $0xa0] sm:$0xff]  }
 0xd23   : > { %v8040_v45 = vadd.f32 %v6289_v37, %v4062_v40  ;;  %v7036_v37 = vld [vmem:[%s8663_s22 + $0x48] sm:$0xff]   ;;  %v7037_v40 = vld [vmem:[%s8663_s22 + $0xd8] sm:$0xff]  }
 0xd25   : > { %v8044_v46 = vpack.c.bf16 %v8040_v45, %v8040_v45 }
 0xd27   : > { %6322 = vmatmul.mubr.msk.bf16.vlgmr.msra.gmra.mxu1 %vm865_vm1, %v8044_v46  ;;  %6324 = vmatmul.mubr.msk.bf16.vlgmr.msra.gmra.mxu0 %vm865_vm1, %v8044_v46 }
 0xd28   : > { %4404 = vmatpush1.bf16.msra.mxu1 %v6308_v25  ;;  %4527 = vmatpush1.bf16.msra.mxu0 %v6314_v28  ;;  %v7026_v25 = vld [vmem:[%s8663_s22 + $0x20] sm:$0xff]   ;;  %v7030_v28 = vld [vmem:[%s8663_s22 + $0x18] sm:$0xff]  }
 0xd29   : > { %4405 = vmatprep.subr.bf16.mxu1 %v6293_v47  ;;  %4528 = vmatprep.subr.bf16.mxu0 %v6299_v48  ;;  %v7043_v47 = vld [vmem:[%s8663_s22 + $0x90] sm:$0xff]   ;;  %v7044_v48 = vld [vmem:[%s8663_s22 + $0xc8] sm:$0xff]  }
 0xd2a   : > { %4423 = vmatprep.mubr.bf16.mxu1 %v7294_v24  ;;  %4546 = vmatprep.mubr.bf16.mxu0 %v7294_v24 }
 0xd2c   : > { %4406 = vmatpush1.bf16.msra.mxu1 %v6292_v29  ;;  %4529 = vmatpush1.bf16.msra.mxu0 %v6298_v53  ;;  %v7053_v29 = vld [vmem:[%s8663_s22 + $0x1f8] sm:$0xff]   ;;  %v4107_v53 = vlaneseq }
 0xd2d   : > { %4485 = vmatprep.subr.bf16.mxu1 %v6313_v30  ;;  %4608 = vmatprep.subr.bf16.mxu0 %v6319_v54 }
 0xd2e   : > { %v8218_v30 = vshrl.u32 %v4107_v53, 7 }
 0xd2f   : > { %6323 = vmatmul.mubr.msk.bf16.vlgmr.msra.gmra.mxu1 %vm865_vm1, %v8044_v46  ;;  %6326 = vmatmul.mubr.msk.bf16.vlgmr.msra.gmra.mxu0 %vm865_vm1, %v8044_v46 }
 0xd30   : > { %4486 = vmatpush1.bf16.msra.mxu1 %v6312_v59  ;;  %4609 = vmatpush1.bf16.msra.mxu0 %v6318_v60  ;;  %v4133_v54 = vsub.s32 6, %v8218_v30  ;;  %v4109_v57 = vsub.s32 0, %v8218_v30  ;;  %v4113_v59 = vsub.s32 1, %v8218_v30  ;;  %v4129_v60 = vsub.s32 5, %v8218_v30 }
 0xd31   : > { %4487 = vmatprep.subr.bf16.mxu1 %v6297_v38  ;;  %4610 = vmatprep.subr.bf16.mxu0 %v6303_v61 }
 0xd32   : > { %4505 = vmatprep.mubr.bf16.mxu1 %v7294_v24  ;;  %4628 = vmatprep.mubr.bf16.mxu0 %v7294_v24  ;;  %v8229_v56 = vrot.slane %v8224_v55, %v4133_v54  ;;  %v4110_v38 = vrot.slane %v8235_v58, %v4109_v57  ;;  %v4114_v61 = vrot.slane %v8235_v58, %v4113_v59 }
 0xd33   : > { %v4130_v39 = vrot.slane %v8235_v58, %v4129_v60 }
 0xd34   : > { %4488 = vmatpush1.bf16.msra.mxu1 %v6296_v63  ;;  %4611 = vmatpush1.bf16.msra.mxu0 %v6302_v0 }
 0xd35   : > { %4567 = vmatprep.subr.bf16.mxu1 %v6317_v2  ;;  %6551 = vmatprep.subr.bf16.mxu0 %v7016_v3  ;;  %v4117_v2 = vsub.s32 2, %v8218_v30 }
 0xd37   : > { %6325 = vmatmul.mubr.msk.bf16.vlgmr.msra.gmra.mxu1 %vm865_vm1, %v8044_v46  ;;  %6328 = vmatmul.mubr.msk.bf16.vlgmr.msra.gmra.mxu0 %vm865_vm1, %v8044_v46 }
 0xd38   : > { %4568 = vmatpush1.bf16.msra.mxu1 %v6316_v8  ;;  %4587 = vmatprep.mubr.bf16.mxu1 %v7294_v24 }
 0xd39   : > { %4569 = vmatprep.subr.bf16.mxu1 %v6301_v6  ;;  %6552 = vmatpush3.bf16.msra.mxu0 %v7017_v7  ;;  %v4121_v6 = vsub.s32 3, %v8218_v30 }
 0xd3a   : > { %6553 = vmatprep.subr.bf16.mxu0 %v7018_v11 }
 0xd3c   : > { %4570 = vmatpush1.bf16.msra.mxu1 %v6300_v12 }
 0xd3d   : > { %4649 = vmatprep.subr.bf16.mxu1 %v6321_v13  ;;  %6554 = vmatpush3.bf16.msra.mxu0 %v7019_v14  ;;  %v4118_v13 = vrot.slane %v8235_v58, %v4117_v2 }
 0xd3e   : > { %6555 = vmatprep.subr.bf16.mxu0 %v7020_v17  ;;  %v4122_v17 = vrot.slane %v8235_v58, %v4121_v6 }
 0xd3f   : > { %6327 = vmatmul.mubr.msk.bf16.vlgmr.msra.gmra.mxu1 %vm865_vm1, %v8044_v46 }
 0xd40   : > { %4650 = vmatpush1.bf16.msra.mxu1 %v6320_v18  ;;  %4669 = vmatprep.mubr.bf16.mxu1 %v7294_v24  ;;  %v7023_v24 = vld [vmem:[%s8663_s22 + $0xb8] sm:$0xff]  }
 0xd41   : > { %4651 = vmatprep.subr.bf16.mxu1 %v6305_v19  ;;  %6556 = vmatpush3.bf16.msra.mxu0 %v7022_v20  ;;  %v7047_v18 = vld [vmem:[%s8663_s22 + $0x138] sm:$0xff]  }
 0xd42   : > { %6557 = vmatprep.subr.bf16.mxu0 %v7024_v21 }
 0xd44   : > { %4652 = vmatpush1.bf16.msra.mxu1 %v6304_v22  ;;  %v7049_v22 = vld [vmem:[%s8663_s22 + $0x170] sm:$0xff]  }
 0xd45   : > { %6573 = vmatprep.subr.bf16.mxu1 %v7021_v23  ;;  %6558 = vmatpush3.bf16.msra.mxu0 %v7026_v25 }
 0xd46   : > { %6559 = vmatprep.subr.bf16.mxu0 %v7028_v26 }
 0xd47   : > { %6329 = vmatmul.mubr.msk.bf16.vlgmr.msra.gmra.mxu1 %vm865_vm1, %v8044_v46  ;;  %v7042_v46 = vld [vmem:[%s8663_s22] sm:$0xff]  }
 0xd48   : > { %6574 = vmatpush3.bf16.msra.mxu1 %v7023_v24 }
 0xd49   : > { %6575 = vmatprep.subr.bf16.mxu1 %v7025_v27  ;;  %6560 = vmatpush3.bf16.msra.mxu0 %v7030_v28  ;;  %v4125_v27 = vsub.s32 4, %v8218_v30 }
 0xd4a   : > { %6561 = vmatprep.subr.bf16.mxu0 %v7032_v31  ;;  %v7051_v31 = vld [vmem:[%s8663_s22 + $0x130] sm:$0xff]  }
 0xd4c   : > { %6576 = vmatpush3.bf16.msra.mxu1 %v7027_v32  ;;  %v4137_v32 = vsub.s32 7, %v8218_v30  ;;  %v7112_v30 = vld [vmem:[%s8663_s22 + $0x2c0] sm:$0xff]  }
 0xd4d   : > { %6577 = vmatprep.subr.bf16.mxu1 %v7029_v33  ;;  %6562 = vmatpush3.bf16.msra.mxu0 %v7034_v34 }
 0xd4e   : > { %6563 = vmatprep.subr.bf16.mxu0 %v7036_v37  ;;  %v4158_v37 = vrot.slane %v8224_v55, %v4125_v27 }
 0xd50   : > { %6578 = vmatpush3.bf16.msra.mxu1 %v7031_v35 }
 0xd51   : > { %6579 = vmatprep.subr.bf16.mxu1 %v7033_v36  ;;  %6564 = vmatpush3.bf16.msra.mxu0 %v7038_v41  ;;  %v7052_v36 = vld [vmem:[%s8663_s22 + $0x168] sm:$0xff]  }
 0xd52   : > { %6565 = vmatprep.subr.bf16.mxu0 %v7040_v43  ;;  %v4138_v43 = vrot.slane %v8235_v58, %v4137_v32 }
 0xd54   : > { %6580 = vmatpush3.bf16.msra.mxu1 %v7035_v1 }
 0xd55   : > { %6581 = vmatprep.subr.bf16.mxu1 %v7037_v40  ;;  %6566 = vmatpush3.bf16.msra.mxu0 %v7042_v46  ;;  %v7055_v46 = vld [vmem:[%s8663_s22 + $0x1b8] sm:$0xff]  }
 0xd56   : > { %6595 = vmatprep.subr.bf16.mxu0 %v7045_v49 }
 0xd58   : > { %6582 = vmatpush3.bf16.msra.mxu1 %v7039_v42 }
 0xd59   : > { %6583 = vmatprep.subr.bf16.mxu1 %v7041_v44  ;;  %v7054_v44 = vld [vmem:[%s8663_s22 + $0x128] sm:$0xff]  }
 0xd5c   : > { %6584 = vmatpush3.bf16.msra.mxu1 %v7043_v47 }
 0xd5d   : > { %6585 = vmatprep.subr.bf16.mxu1 %v7044_v48 }
 0xd60   : > { %6586 = vmatpush3.bf16.msra.mxu1 %v7046_v50  ;;  %v7056_v50 = vld [vmem:[%s8663_s22 + $0x160] sm:$0xff]  }
 0xd61   : > { %6587 = vmatprep.subr.bf16.mxu1 %v7048_v51  ;;  %v7057_v51 = vld [vmem:[%s8663_s22 + $0x1f0] sm:$0xff]  }
 0xd64   : > { %6588 = vmatpush3.bf16.msra.mxu1 %v7050_v52 }
 0xd65   : > { %6617 = vmatprep.subr.bf16.mxu1 %v7053_v29 }
 0xde7   : > { %v4384_v62 = vpop.f32.mrf.mxu1  ;;  %v8248_v63 = vpop.f32.mrf.mxu0 }
 0xde8   : > { %v4385_v0 = vadd.f32 %v4384_v62, %v4110_v38 }
 0xde9   : > { %v4386_v3 = vpop.f32.mrf.mxu1  ;;  %v4468_v4 = vpop.f32.mrf.mxu0 }
 0xdea   : > { %v4387_v5 = vadd.f32 %v4386_v3, %v4114_v61  ;;  %v4469_v8 = vadd.f32 %v4468_v4, %v4130_v39  ;;  %v4678_v7 = vmax.f32 %v4385_v0, 0.0  ;;  %v7058_v61 = vld [vmem:[%s8663_s22 + $0x120] sm:$0xff]   ;;  %v7059_v39 = vld [vmem:[%s8663_s22 + $0x1b0] sm:$0xff]   ;;  %v7060_v3 = vld [vmem:[%s8663_s22 + $0x158] sm:$0xff]  }
 0xdeb   : > { %v4388_v9 = vpop.f32.mrf.mxu1  ;;  %v4470_v10 = vpop.f32.mrf.mxu0  ;;  %v7061_v4 = vld [vmem:[%s8663_s22 + $0x1e8] sm:$0xff]  }
 0xdec   : > { %v4679_v11 = vmax.f32 %v4387_v5, 0.0  ;;  %v4683_v12 = vmax.f32 %v4469_v8, 0.0  ;;  %v4694_v19 = vpack.c.bf16 %v4678_v7, %v4678_v7  ;;  %v7062_v10 = vld [vmem:[%s8663_s22 + $0x118] sm:$0xff]  }
 0xded   : > { %v4389_v14 = vpop.f32.mrf.mxu1  ;;  %v4471_v15 = vpop.f32.mrf.mxu0 }
 0xdee   : > { %v4695_v16 = vpack.c.bf16 %v4679_v11, %v4679_v11  ;;  %v4699_v23 = vpack.c.bf16 %v4683_v12, %v4683_v12  ;;  %v7063_v11 = vld [vmem:[%s8663_s22 + $0x1a8] sm:$0xff]   ;;  %v7065_v14 = vld [vmem:[%s8663_s22 + $0x1e0] sm:$0xff]  }
 0xdef   : > { %v4425_v20 = vpop.f32.mrf.mxu1  ;;  %v8261_v21 = vpop.f32.mrf.mxu0 }
 0xdf0   : > { %v4426_v25 = vadd.f32 %v4425_v20, %v4118_v13  ;;  %5773 = vmatprep.mubr.bf16.mxu0 %v4695_v16  ;;  %v7064_v13 = vld [vmem:[%s8663_s22 + $0x150] sm:$0xff]   ;;  %v7068_v20 = vld [vmem:[%s8663_s22 + $0x148] sm:$0xff]  }
 0xdf1   : > { %v4427_v26 = vpop.f32.mrf.mxu1  ;;  %v8266_v24 = vpop.f32.mrf.mxu0  ;;  %5774 = vmatmul.mubr.bf16.vlgmr.msra.gmra.mxu0 %v4694_v19  ;;  %v7066_v16 = vld [vmem:[%s8663_s22 + $0x110] sm:$0xff]  }
 0xdf2   : > { %v4428_v28 = vadd.f32 %v4427_v26, %v4122_v17  ;;  %6596 = vmatpush3.bf16.msra.mxu0 %v7047_v18  ;;  %5853 = vmatprep.mubr.bf16.mxu0 %v4699_v23  ;;  %v4680_v33 = vmax.f32 %v4426_v25, 0.0  ;;  %v7067_v17 = vld [vmem:[%s8663_s22 + $0x1a0] sm:$0xff]   ;;  %v4126_v18 = vrot.slane %v8235_v58, %v4125_v27  ;;  %v4146_v23 = vrot.slane %v8224_v55, %v4113_v59  ;;  %v7070_v26 = vld [vmem:[%s8663_s22 + $0x108] sm:$0xff]   ;;  %v7071_v27 = vld [vmem:[%s8663_s22 + $0x198] sm:$0xff]  }
 0xdf3   : > { %v4429_v34 = vpop.f32.mrf.mxu1  ;;  %v4552_v35 = vpop.f32.mrf.mxu0  ;;  %6597 = vmatprep.subr.bf16.mxu0 %v7049_v22  ;;  %v7069_v22 = vld [vmem:[%s8663_s22 + $0x1d8] sm:$0xff]   ;;  %v7072_v59 = vld [vmem:[%s8663_s22 + $0x140] sm:$0xff]  }
 0xdf4   : > { %v4681_v1 = vmax.f32 %v4428_v28, 0.0  ;;  %v4696_v47 = vpack.c.bf16 %v4680_v33, %v4680_v33  ;;  %v4467_v28 = vadd.f32 %v8248_v63, %v4126_v18  ;;  %v7073_v33 = vld [vmem:[%s8663_s22 + $0x1d0] sm:$0xff]   ;;  %v4551_v35 = vadd.f32 %v8266_v24, %v4146_v23  ;;  %v7074_v63 = vld [vmem:[%s8663_s22 + $0x100] sm:$0xff]   ;;  %v7076_v24 = vld [vmem:[%s8663_s22 + $0x1c8] sm:$0xff]  }
 0xdf5   : > { %v4430_v40 = vpop.f32.mrf.mxu1  ;;  %v4553_v41 = vpop.f32.mrf.mxu0  ;;  %v7098_v18 = vld [vmem:[%s8663_s22 + $0x210] sm:$0xff]   ;;  %v7101_v23 = vld [vmem:[%s8663_s22 + $0x2d8] sm:$0xff]  }
 0xdf6   : > { %v4697_v42 = vpack.c.bf16 %v4681_v1, %v4681_v1  ;;  %6598 = vmatpush3.bf16.msra.mxu0 %v7051_v31  ;;  %v7075_v1 = vld [vmem:[%s8663_s22 + $0x190] sm:$0xff]   ;;  %v7077_v41 = vld [vmem:[%s8663_s22 + $0x278] sm:$0xff]  }
 0xdf7   : > { %v8286_v48 = vpop.f32.mrf.mxu1  ;;  %v4630_v49 = vpop.f32.mrf.mxu0  ;;  %6599 = vmatprep.subr.bf16.mxu0 %v7052_v36 }
 0xdf8   : > { %v8294_v52 = vadd.f32 %v4630_v49, %v4158_v37  ;;  %5813 = vmatprep.mubr.bf16.mxu1 %v4697_v42  ;;  %v4682_v37 = vmax.f32 %v4467_v28, 0.0  ;;  %v4687_v42 = vmax.f32 %v4551_v35, 0.0  ;;  %v7081_v49 = vld [vmem:[%s8663_s22 + $0x270] sm:$0xff]   ;;  %v7104_v28 = vld [vmem:[%s8663_s22 + $0x240] sm:$0xff]   ;;  %v4150_v35 = vrot.slane %v8224_v55, %v4117_v2  ;;  %v7110_v2 = vld [vmem:[%s8663_s22 + $0x288] sm:$0xff]  }
 0xdf9   : > { %v4509_v29 = vpop.f32.mrf.mxu1  ;;  %v8296_v53 = vpop.f32.mrf.mxu0  ;;  %5814 = vmatmul.mubr.bf16.vlgmr.msra.gmra.mxu1 %v4696_v47 }
 0xdfa   : > { %v4510_v38 = vadd.f32 %v4509_v29, %v4138_v43  ;;  %6600 = vmatpush3.bf16.msra.mxu0 %v7054_v44  ;;  %6618 = vmatpush3.bf16.msra.mxu1 %v7055_v46  ;;  %v4154_v43 = vrot.slane %v8224_v55, %v4121_v6  ;;  %v4698_v46 = vpack.c.bf16 %v4682_v37, %v4682_v37  ;;  %v7080_v6 = vld [vmem:[%s8663_s22 + $0x1c0] sm:$0xff]  }
 0xdfb   : > { %v4511_v62 = vpop.f32.mrf.mxu1  ;;  %v4634_v0 = vpop.f32.mrf.mxu0  ;;  %6601 = vmatprep.subr.bf16.mxu0 %v7056_v50  ;;  %6619 = vmatprep.subr.bf16.mxu1 %v7057_v51  ;;  %v4703_v50 = vpack.c.bf16 %v4687_v42, %v4687_v42  ;;  %v7082_v29 = vld [vmem:[%s8663_s22 + $0x180] sm:$0xff]   ;;  %v4170_v37 = vrot.slane %v8224_v55, %v4137_v32  ;;  %v7115_v42 = vld [vmem:[%s8663_s22 + $0x330] sm:$0xff]  }
 0xdfc   : > { %v4685_v5 = vmax.f32 %v4510_v38, 0.0  ;;  %v7086_v0 = vld [vmem:[%s8663_s22 + $0x228] sm:$0xff]  }
 0xdfd   : > { %v4512_v8 = vpop.f32.mrf.mxu1  ;;  %v4635_v7 = vpop.f32.mrf.mxu0 }
 0xdfe   : > { %v4701_v9 = vpack.c.bf16 %v4685_v5, %v4685_v5  ;;  %6602 = vmatpush3.bf16.msra.mxu0 %v7058_v61  ;;  %6620 = vmatpush3.bf16.msra.mxu1 %v7059_v39  ;;  %v7084_v61 = vld [vmem:[%s8663_s22 + $0x268] sm:$0xff]   ;;  %v7085_v39 = vld [vmem:[%s8663_s22 + $0x2f8] sm:$0xff]   ;;  %v7088_v5 = vld [vmem:[%s8663_s22 + $0x260] sm:$0xff]  }
 0xdff   : > { %v8316_v12 = vpop.f32.mrf.mxu1  ;;  %6603 = vmatprep.subr.bf16.mxu0 %v7060_v3  ;;  %6621 = vmatprep.subr.bf16.mxu1 %v7061_v4  ;;  %v7087_v3 = vld [vmem:[%s8663_s22 + $0x2b8] sm:$0xff]   ;;  %v7089_v8 = vld [vmem:[%s8663_s22 + $0x2f0] sm:$0xff]  }
 0xe00   : > { %5893 = vmatprep.mubr.bf16.mxu1 %v4701_v9  ;;  %v7090_v9 = vld [vmem:[%s8663_s22 + $0x220] sm:$0xff]  }
 0xe01   : > { %v4591_v15 = vpop.f32.mrf.mxu1 }
 0xe02   : > { %6604 = vmatpush3.bf16.msra.mxu0 %v7062_v10  ;;  %6622 = vmatpush3.bf16.msra.mxu1 %v7063_v11  ;;  %v4592_v51 = vadd.f32 %v4591_v15, %v4154_v43  ;;  %v7091_v10 = vld [vmem:[%s8663_s22 + $0x2b0] sm:$0xff]   ;;  %v7092_v11 = vld [vmem:[%s8663_s22 + $0x258] sm:$0xff]   ;;  %v7095_v15 = vld [vmem:[%s8663_s22 + $0x2a8] sm:$0xff]  }
 0xe03   : > { %v4593_v19 = vpop.f32.mrf.mxu1  ;;  %6605 = vmatprep.subr.bf16.mxu0 %v7064_v13  ;;  %6623 = vmatprep.subr.bf16.mxu1 %v7065_v14  ;;  %v7093_v13 = vld [vmem:[%s8663_s22 + $0x2e8] sm:$0xff]   ;;  %v7094_v14 = vld [vmem:[%s8663_s22 + $0x218] sm:$0xff]  }
 0xe04   : > { %v4689_v62 = vmax.f32 %v4592_v51, 0.0  ;;  %v7099_v19 = vld [vmem:[%s8663_s22 + $0x2a0] sm:$0xff]  }
 0xe05   : > { %v4594_v25 = vpop.f32.mrf.mxu1  ;;  %v7122_v51 = vld [vmem:[%s8663_s22 + $0x320] sm:$0xff]  }
 0xe06   : > { %6606 = vmatpush3.bf16.msra.mxu0 %v7066_v16  ;;  %6624 = vmatpush3.bf16.msra.mxu1 %v7067_v17  ;;  %v4705_v7 = vpack.c.bf16 %v4689_v62, %v4689_v62  ;;  %v7096_v16 = vld [vmem:[%s8663_s22 + $0x250] sm:$0xff]   ;;  %v7097_v17 = vld [vmem:[%s8663_s22 + $0x2e0] sm:$0xff]   ;;  %v4162_v25 = vrot.slane %v8224_v55, %v4129_v60 }
 0xe07   : > { %v4671_v31 = vpop.f32.mrf.mxu1  ;;  %6607 = vmatprep.subr.bf16.mxu0 %v7068_v20  ;;  %6625 = vmatprep.subr.bf16.mxu1 %v7069_v22  ;;  %v4142_v20 = vrot.slane %v8224_v55, %v4109_v57  ;;  %v7100_v22 = vld [vmem:[%s8663_s22 + $0x248] sm:$0xff]   ;;  %v7105_v60 = vld [vmem:[%s8663_s22 + $0x2d0] sm:$0xff]  }
 0xe08   : > { %v8354_v34 = vadd.f32 %v4671_v31, %v8229_v56  ;;  %v4134_v56 = vrot.slane %v8235_v58, %v4133_v54  ;;  %v7078_v54 = vld [vmem:[%s8663_s22 + $0x188] sm:$0xff]   ;;  %v7079_v58 = vld [vmem:[%s8663_s22 + $0x238] sm:$0xff]   ;;  %v4633_v31 = vadd.f32 %v8296_v53, %v4162_v25  ;;  %v7113_v55 = vld [vmem:[%s8663_s22 + $0x370] sm:$0xff]  }
 0xe09   : > { %v8357_v36 = vpop.f32.mrf.mxu1  ;;  %v7102_v57 = vld [vmem:[%s8663_s22 + $0x208] sm:$0xff]   ;;  %v7128_v62 = vld [vmem:[%s8663_s22 + $0x350] sm:$0xff]  }
 0xe0a   : > { %6608 = vmatpush3.bf16.msra.mxu0 %v7070_v26  ;;  %6626 = vmatpush3.bf16.msra.mxu1 %v7071_v27  ;;  %v4508_v47 = vadd.f32 %v8286_v48, %v4134_v56  ;;  %v7083_v48 = vld [vmem:[%s8663_s22 + $0x230] sm:$0xff]   ;;  %v7103_v26 = vld [vmem:[%s8663_s22 + $0x298] sm:$0xff]   ;;  %v4549_v27 = vadd.f32 %v8261_v21, %v4142_v20  ;;  %v7108_v53 = vld [vmem:[%s8663_s22 + $0x2c8] sm:$0xff]   ;;  %v4692_v20 = vmax.f32 %v8354_v34, 0.0 }
 0xe0b   : > { %v4675_v40 = vpop.f32.mrf.mxu1  ;;  %6609 = vmatprep.subr.bf16.mxu0 %v7072_v59  ;;  %6627 = vmatprep.subr.bf16.mxu1 %v7073_v33  ;;  %v7106_v59 = vld [vmem:[%s8663_s22 + $0x200] sm:$0xff]   ;;  %v7107_v21 = vld [vmem:[%s8663_s22 + $0x290] sm:$0xff]   ;;  %v7111_v56 = vld [vmem:[%s8663_s22 + $0x338] sm:$0xff]  }
 0xe0c   : > { %v4684_v38 = vmax.f32 %v4508_v47, 0.0  ;;  %v4686_v33 = vmax.f32 %v4549_v27, 0.0 }
 0xe0d   : > { %v4676_v44 = vpop.f32.mrf.mxu1 }
 0xe0e   : > { %6610 = vmatpush3.bf16.msra.mxu0 %v7074_v63  ;;  %6628 = vmatpush3.bf16.msra.mxu1 %v7075_v1  ;;  %v4700_v4 = vpack.c.bf16 %v4684_v38, %v4684_v38  ;;  %v7109_v63 = vld [vmem:[%s8663_s22 + $0x378] sm:$0xff]   ;;  %v4691_v1 = vmax.f32 %v4633_v31, 0.0  ;;  %v4702_v40 = vpack.c.bf16 %v4686_v33, %v4686_v33  ;;  %v7116_v44 = vld [vmem:[%s8663_s22 + $0x368] sm:$0xff]  }
 0xe0f   : > { %6629 = vmatprep.subr.bf16.mxu1 %v7076_v24  ;;  %6639 = vmatprep.subr.bf16.mxu0 %v7077_v41  ;;  %v4590_v24 = vadd.f32 %v8316_v12, %v4150_v35  ;;  %v4674_v41 = vadd.f32 %v8357_v36, %v4170_v37  ;;  %v7114_v12 = vld [vmem:[%s8663_s22 + $0x280] sm:$0xff]   ;;  %v7117_v36 = vld [vmem:[%s8663_s22 + $0x3f8] sm:$0xff]   ;;  %v7125_v38 = vld [vmem:[%s8663_s22 + $0x3e8] sm:$0xff]  }
 0xe10   : > { %v4707_v32 = vpack.c.bf16 %v4691_v1, %v4691_v1 }
 0xe11   : > { %5854 = vmatmul.mubr.bf16.vlgmr.msra.gmra.mxu0 %v4698_v46  ;;  %v4688_v43 = vmax.f32 %v4590_v24, 0.0  ;;  %v7119_v46 = vld [vmem:[%s8663_s22 + $0x3b8] sm:$0xff]  }
 0xe12   : > { %6630 = vmatpush3.bf16.msra.mxu1 %v7078_v54  ;;  %6640 = vmatpush3.bf16.msra.mxu0 %v7079_v58  ;;  %v4693_v54 = vmax.f32 %v4674_v41, 0.0  ;;  %v7118_v58 = vld [vmem:[%s8663_s22 + $0x328] sm:$0xff]  }
 0xe13   : > { %5933 = vmatprep.mubr.bf16.mxu0 %v4703_v50  ;;  %6631 = vmatprep.subr.bf16.mxu1 %v7080_v6  ;;  %v4704_v47 = vpack.c.bf16 %v4688_v43, %v4688_v43  ;;  %v7120_v6 = vld [vmem:[%s8663_s22 + $0x360] sm:$0xff]  }
 0xe14   : > { %6641 = vmatprep.subr.bf16.mxu0 %v7081_v49  ;;  %v7121_v49 = vld [vmem:[%s8663_s22 + $0x3f0] sm:$0xff]   ;;  %v4709_v50 = vpack.c.bf16 %v4693_v54, %v4693_v54 }
 0xe16   : > { %6632 = vmatpush3.bf16.msra.mxu1 %v7082_v29  ;;  %6642 = vmatpush3.bf16.msra.mxu0 %v7083_v48  ;;  %v7123_v29 = vld [vmem:[%s8663_s22 + $0x3b0] sm:$0xff]   ;;  %v7124_v48 = vld [vmem:[%s8663_s22 + $0x358] sm:$0xff]  }
 0xe17   : > { %6643 = vmatprep.subr.bf16.mxu0 %v7084_v61  ;;  %6661 = vmatprep.subr.bf16.mxu1 %v7085_v39  ;;  %v7126_v61 = vld [vmem:[%s8663_s22 + $0x318] sm:$0xff]   ;;  %v7127_v39 = vld [vmem:[%s8663_s22 + $0x3a8] sm:$0xff]  }
 0xe19   : > { %5894 = vmatmul.mubr.bf16.vlgmr.msra.gmra.mxu1 %v4700_v4  ;;  %v7131_v4 = vld [vmem:[%s8663_s22 + $0x3a0] sm:$0xff]  }
 0xe1a   : > { %6644 = vmatpush3.bf16.msra.mxu0 %v7086_v0  ;;  %6662 = vmatpush3.bf16.msra.mxu1 %v7087_v3  ;;  %v7129_v0 = vld [vmem:[%s8663_s22 + $0x3e0] sm:$0xff]   ;;  %v7130_v3 = vld [vmem:[%s8663_s22 + $0x310] sm:$0xff]  }
 0xe1b   : > { %5973 = vmatprep.mubr.bf16.mxu1 %v4705_v7  ;;  %6645 = vmatprep.subr.bf16.mxu0 %v7088_v5  ;;  %v7132_v5 = vld [vmem:[%s8663_s22 + $0x348] sm:$0xff]  }
 0xe1c   : > { %6663 = vmatprep.subr.bf16.mxu1 %v7089_v8  ;;  %v7133_v8 = vld [vmem:[%s8663_s22 + $0x3d8] sm:$0xff]   ;;  %v7134_v7 = vld [vmem:[%s8663_s22 + $0x308] sm:$0xff]  }
 0xe1e   : > { %6646 = vmatpush3.bf16.msra.mxu0 %v7090_v9  ;;  %6664 = vmatpush3.bf16.msra.mxu1 %v7091_v10  ;;  %v7135_v9 = vld [vmem:[%s8663_s22 + $0x398] sm:$0xff]   ;;  %v7136_v10 = vld [vmem:[%s8663_s22 + $0x340] sm:$0xff]  }
 0xe1f   : > { %6647 = vmatprep.subr.bf16.mxu0 %v7092_v11  ;;  %6665 = vmatprep.subr.bf16.mxu1 %v7093_v13  ;;  %v7137_v11 = vld [vmem:[%s8663_s22 + $0x3d0] sm:$0xff]   ;;  %v7138_v13 = vld [vmem:[%s8663_s22 + $0x300] sm:$0xff]  }
 0xe22   : > { %6648 = vmatpush3.bf16.msra.mxu0 %v7094_v14  ;;  %6666 = vmatpush3.bf16.msra.mxu1 %v7095_v15  ;;  %v7139_v14 = vld [vmem:[%s8663_s22 + $0x390] sm:$0xff]   ;;  %v4690_v15 = vmax.f32 %v8294_v52, 0.0  ;;  %v7143_v52 = vld [vmem:[%s8663_s22 + $0x380] sm:$0xff]  }
 0xe23   : > { %6649 = vmatprep.subr.bf16.mxu0 %v7096_v16  ;;  %6667 = vmatprep.subr.bf16.mxu1 %v7097_v17  ;;  %v7140_v16 = vld [vmem:[%s8663_s22 + $0x3c8] sm:$0xff]  }
 0xe24   : > { %v7141_v17 = vld [vmem:[%s8663_s22 + $0x388] sm:$0xff]  }
 0xe26   : > { %6650 = vmatpush3.bf16.msra.mxu0 %v7098_v18  ;;  %6668 = vmatpush3.bf16.msra.mxu1 %v7099_v19  ;;  %v4706_v18 = vpack.c.bf16 %v4690_v15, %v4690_v15  ;;  %v7142_v19 = vld [vmem:[%s8663_s22 + $0x3c0] sm:$0xff]  }
 0xe27   : > { %6651 = vmatprep.subr.bf16.mxu0 %v7100_v22  ;;  %6669 = vmatprep.subr.bf16.mxu1 %v7101_v23  ;;  %v4708_v22 = vpack.c.bf16 %v4692_v20, %v4692_v20  ;;  %v6460_v20 = vld [vmem:[%s8666_s25] ss:$0 sm:$0xff] }
 0xe2a   : > { %6652 = vmatpush3.bf16.msra.mxu0 %v7102_v57  ;;  %6670 = vmatpush3.bf16.msra.mxu1 %v7103_v26 }
 0xe2b   : > { %6653 = vmatprep.subr.bf16.mxu0 %v7104_v28  ;;  %6671 = vmatprep.subr.bf16.mxu1 %v7105_v60  ;;  %v6330_v28 = vld [vmem:[%s8664_s23] ss:$0 sm:$0xff] }
 0xe2e   : > { %6654 = vmatpush3.bf16.msra.mxu0 %v7106_v59  ;;  %6672 = vmatpush3.bf16.msra.mxu1 %v7107_v21 }
 0xe2f   : > { %6673 = vmatprep.subr.bf16.mxu1 %v7108_v53  ;;  %6683 = vmatprep.subr.bf16.mxu0 %v7109_v63 }
 0xe31   : > { %5934 = vmatmul.mubr.bf16.vlgmr.msra.gmra.mxu0 %v4702_v40 }
 0xe32   : > { %6674 = vmatpush3.bf16.msra.mxu1 %v7110_v2  ;;  %6684 = vmatpush3.bf16.msra.mxu0 %v7111_v56 }
 0xe33   : > { %6013 = vmatprep.mubr.bf16.mxu0 %v4707_v32  ;;  %6675 = vmatprep.subr.bf16.mxu1 %v7112_v30 }
 0xe34   : > { %6685 = vmatprep.subr.bf16.mxu0 %v7113_v55 }
 0xe36   : > { %6676 = vmatpush3.bf16.msra.mxu1 %v7114_v12  ;;  %6686 = vmatpush3.bf16.msra.mxu0 %v7115_v42 }
 0xe37   : > { %6687 = vmatprep.subr.bf16.mxu0 %v7116_v44  ;;  %6705 = vmatprep.subr.bf16.mxu1 %v7117_v36 }
 0xe39   : > { %5974 = vmatmul.mubr.bf16.vlgmr.msra.gmra.mxu1 %v4704_v47 }
 0xe3a   : > { %6688 = vmatpush3.bf16.msra.mxu0 %v7118_v58  ;;  %6706 = vmatpush3.bf16.msra.mxu1 %v7119_v46 }
 0xe3b   : > { %6053 = vmatprep.mubr.bf16.mxu1 %v4709_v50  ;;  %6689 = vmatprep.subr.bf16.mxu0 %v7120_v6 }
 0xe3c   : > { %6707 = vmatprep.subr.bf16.mxu1 %v7121_v49 }
 0xe3e   : > { %6690 = vmatpush3.bf16.msra.mxu0 %v7122_v51  ;;  %6708 = vmatpush3.bf16.msra.mxu1 %v7123_v29 }
 0xe3f   : > { %6691 = vmatprep.subr.bf16.mxu0 %v7124_v48  ;;  %6709 = vmatprep.subr.bf16.mxu1 %v7125_v38 }
 0xe42   : > { %6692 = vmatpush3.bf16.msra.mxu0 %v7126_v61  ;;  %6710 = vmatpush3.bf16.msra.mxu1 %v7127_v39 }
 0xe43   : > { %6693 = vmatprep.subr.bf16.mxu0 %v7128_v62  ;;  %6711 = vmatprep.subr.bf16.mxu1 %v7129_v0 }
 0xe46   : > { %6694 = vmatpush3.bf16.msra.mxu0 %v7130_v3  ;;  %6712 = vmatpush3.bf16.msra.mxu1 %v7131_v4 }
 0xe47   : > { %6695 = vmatprep.subr.bf16.mxu0 %v7132_v5  ;;  %6713 = vmatprep.subr.bf16.mxu1 %v7133_v8 }
 0xe4a   : > { %6696 = vmatpush3.bf16.msra.mxu0 %v7134_v7  ;;  %6714 = vmatpush3.bf16.msra.mxu1 %v7135_v9 }
 0xe4b   : > { %6697 = vmatprep.subr.bf16.mxu0 %v7136_v10  ;;  %6715 = vmatprep.subr.bf16.mxu1 %v7137_v11 }
 0xe4e   : > { %6698 = vmatpush3.bf16.msra.mxu0 %v7138_v13  ;;  %6716 = vmatpush3.bf16.msra.mxu1 %v7139_v14 }
 0xe4f   : > { %6717 = vmatprep.subr.bf16.mxu1 %v7140_v16 }
 0xe51   : > { %6014 = vmatmul.mubr.bf16.vlgmr.msra.gmra.mxu0 %v4706_v18 }
 0xe52   : > { %6718 = vmatpush3.bf16.msra.mxu1 %v7141_v17 }
 0xe53   : > { %6719 = vmatprep.subr.bf16.mxu1 %v7142_v19 }
 0xe56   : > { %6720 = vmatpush3.bf16.msra.mxu1 %v7143_v52 }
 0xe59   : > { %6054 = vmatmul.mubr.bf16.vlgmr.msra.gmra.mxu1 %v4708_v22 }
 0xeb1   : > { %v6567_v23 = vpop.f32.mrf.mxu0 }
 0xeb3   : > { %v6568_v25 = vpop.f32.mrf.mxu0 }
 0xeb4   : > { %v6569_v57 = vadd.f32 %v6568_v25, %v6567_v23 }
 0xeb5   : > { %v6570_v26 = vpop.f32.mrf.mxu0 }
 0xeb6   : > { %v5776_v59 = vadd.f32 %v6569_v57, %v6330_v28 }
 0xeb7   : > { %v6571_v27 = vpop.f32.mrf.mxu0 }
 0xeb9   : > { %v6589_v60 = vpop.f32.mrf.mxu1 }
 0xebb   : > { %v6590_v31 = vpop.f32.mrf.mxu1 }
 0xebc   : > { %v6591_v21 = vadd.f32 %v6590_v31, %v6589_v60 }
 0xebd   : > { %v6592_v33 = vpop.f32.mrf.mxu1 }
 0xebe   : > { %v5816_v35 = vadd.f32 %v6591_v21, %v5776_v59 }
 0xebf   : > { %v6593_v34 = vpop.f32.mrf.mxu1 }
 0xed1   : > { %v6611_v53 = vpop.f32.mrf.mxu0 }
 0xed3   : > { %v6612_v63 = vpop.f32.mrf.mxu0 }
 0xed4   : > { %v6613_v1 = vadd.f32 %v6612_v63, %v6611_v53 }
 0xed5   : > { %v6614_v37 = vpop.f32.mrf.mxu0 }
 0xed6   : > { %v5856_v2 = vadd.f32 %v6613_v1, %v5816_v35 }
 0xed7   : > { %v6615_v56 = vpop.f32.mrf.mxu0 }
 0xed9   : > { %v6633_v40 = vpop.f32.mrf.mxu1 }
 0xedb   : > { %v6634_v24 = vpop.f32.mrf.mxu1 }
 0xedc   : > { %v6635_v46 = vadd.f32 %v6634_v24, %v6633_v40 }
 0xedd   : > { %v6636_v30 = vpop.f32.mrf.mxu1 }
 0xede   : > { %v5896_v50 = vadd.f32 %v6635_v46, %v5856_v2 }
 0xedf   : > { %v6637_v55 = vpop.f32.mrf.mxu1 }
 0xef1   : > { %v6655_v32 = vpop.f32.mrf.mxu0 }
 0xef3   : > { %v6656_v41 = vpop.f32.mrf.mxu0 }
 0xef4   : > { %v6657_v6 = vadd.f32 %v6656_v41, %v6655_v32 }
 0xef5   : > { %v6658_v12 = vpop.f32.mrf.mxu0 }
 0xef6   : > { %v5936_v48 = vadd.f32 %v6657_v6, %v5896_v50 }
 0xef7   : > { %v6659_v42 = vpop.f32.mrf.mxu0 }
 0xef9   : > { %v6677_v43 = vpop.f32.mrf.mxu1 }
 0xefb   : > { %v6678_v44 = vpop.f32.mrf.mxu1 }
 0xefc   : > { %v6679_v51 = vadd.f32 %v6678_v44, %v6677_v43 }
 0xefd   : > { %v6680_v36 = vpop.f32.mrf.mxu1 }
 0xefe   : > { %v5976_v39 = vadd.f32 %v6679_v51, %v5936_v48 }
 0xeff   : > { %v6681_v54 = vpop.f32.mrf.mxu1 }
 0xf11   : > { %v6699_v58 = vpop.f32.mrf.mxu0 }
 0xf13   : > { %v6700_v47 = vpop.f32.mrf.mxu0 }
 0xf14   : > { %v6701_v38 = vadd.f32 %v6700_v47, %v6699_v58 }
 0xf15   : > { %v6702_v49 = vpop.f32.mrf.mxu0 }
 0xf16   : > { %v6016_v0 = vadd.f32 %v6701_v38, %v5976_v39 }
 0xf17   : > { %v6703_v29 = vpop.f32.mrf.mxu0 }
 0xf19   : > { %v6721_v61 = vpop.f32.mrf.mxu1 }
 0xf1b   : > { %v6722_v62 = vpop.f32.mrf.mxu1 }
 0xf1c   : > { %v6723_v3 = vadd.f32 %v6722_v62, %v6721_v61 }
 0xf1d   : > { %v6724_v4 = vpop.f32.mrf.mxu1 }
 0xf1e   : > { %v6056_v5 = vadd.f32 %v6723_v3, %v6016_v0 }
 0xf1f   : > { %v6725_v8 = vpop.f32.mrf.mxu1 }
 0xf20   : > { %v6061_v7 = vadd.f32 %v6056_v5, %v8040_v45  ;;  %v6459_v45 = vld [vmem:[%s8665_s24] ss:$0 sm:$0xff] }
 0xf22   : > { %v6064_v9 = vsel %vm865_vm1, %v6061_v7, 0.0 }
 0xf23   : > { %6065 = vadd.xlane.f32.xlu0 %v6064_v9 }
 0xfac   : > { %v6066_v10 = vpop.xlane.xlu0 %6065 }
 0xfad   : > { %v6067_v11 = vmul.f32 0.03125, %v6066_v10 }
 0xfaf   : > { %v6068_v13 = vsub.f32 %v6061_v7, %v6067_v11 }
 0xfb1   : > { %v6069_v14 = vmul.f32 %v6068_v13, %v6068_v13 }
 0xfb3   : > { %v6070_v15 = vsel %vm865_vm1, %v6069_v14, 0.0 }
 0xfb4   : > { %6071 = vadd.xlane.f32.xlu0 %v6070_v15 }
0x103d   : > { %v6072_v16 = vpop.xlane.xlu0 %6071 }
0x103e   : > { %v6073_v17 = vmul.f32 0.03125, %v6072_v16 }
0x1040   : > { %v6074_v18 = vadd.f32 1e-05, %v6073_v17 }
0x1042   : > { %7212 = vrsqrt.f32 %v6074_v18 }
0x104f   : > { %v7213_v19 = vpop.eup %7212 }
0x1050   : > { %v6076_v52 = vmul.f32 %v7213_v19, %v6068_v13 }
0x1052   : > { %v6083_v22 = vmul.f32 %v6459_v45, %v6076_v52 }
0x1054   : > { %v6090_v23 = vadd.f32 %v6460_v20, %v6083_v22 }
0x1056   : > { %6091 = vst.msk [vmem:[%s821_s1] sm:$0xff] %vm865_vm1, %v6090_v23 }
0x1057   : > { %7228 = shalt.err (!%p7225_p3)
}
0x1058   : > { %s7229_s0 = scalar_lea.hbm %s6104_s11, 128  ;;  %s7233_s29 = scalar_lea.hbm %s8667_s26, 256 }
0x1059   : > { %p7230_p4 = scmp.ne.s32.totalorder %s6104_s11, %s7229_s0  ;;  %p7234_p9 = scmp.lt.s32.totalorder %s6104_s11, %s8667_s26 }
0x105a   : > { %p7235_p10 = scmp.lt.s32.totalorder %s7233_s29, %s7229_s0 }
0x105b   : > { %p7231_p7 = pnand %p7230_p4, %p7469_p5 }
0x105c   : > { %p7236_p11 = por %p7235_p10, %p7234_p9 }
0x105d   : > { %p7232_p8 = pneg %p7231_p7 }
0x105f   : > { %p7237_p12 = pnand %p7236_p11, %p7232_p8 }
0x1061   : > { %7240 = shalt.err (!%p7237_p12)
}
0x1062   : > { %6943 = dma.vmem_to_hbm [thread:$0]  (%p7469_p5), %s6107_s10, 128, %s6104_s11, %s6093_s13  }
0x1063 PF: > { %p6949_p13 = scmp.ge.s32.totalorder %s7275_s28, 2  ;;  %s6118_s5 = sand.u32 1, %s7263_s27  }
0x1064   : > { %s6119_s30 = scalar_lea.sflag [#allocation3], %s6118_s5 }
0x1065   : > { %p6946_p0 = pnand %p6949_p13, %p7473_p6 }
0x1067   : > { %p6947_p1 = pneg %p6946_p0 }
0x1069   : > { %7258 = dma.done.wait (%p6947_p1), %s6119_s30, 128  }
0x106a   : > { %7260 = vsyncadd (%p6947_p1), %s6119_s30, 4294967168  ;;  %s8751_s28 = sld [smem:[#allocation6_spill]]  ;;  %s8754_s27 = smov %s7267_s3 }
0x106b   : > { %s8752_s7 = sld [smem:[#allocation5_spill]] }
0x106c   : > { %s8753_s8 = sld [smem:[#allocation7_spill]] }
0x1070   : > { %p36_p2 = scmp.ge.s32.totalorder %s8751_s28, 4  }
0x1071   : > { %s8755_s3 = smov %s8752_s7 }
0x1072   : > { %s8756_s7 = smov %s8753_s8  ;;  %38 = sbr.rel (!%p36_p2) target bundleno = 18 (0x12), region = 168 }
0x1077   :  { %6124 = vsyncpa [#allocation3], 1 }
0x1078   :  { %6126 = vsyncpa [#allocation3 + $0x1], 1 }

</bundles_post_ra>
